<compile_context>
chip_gen: v7x
topology: tpu7x:2x2x1
jax: 0.10.0
libtpu: 0.0.40
codegen_flags: <defaults>
</compile_context>

<pallas_src>
import jax
import jax.numpy as jnp
from jax.experimental import pallas as pl
from jax.experimental.pallas import tpu as pltpu


def _round_up(x, m):
    return ((x + m - 1) // m) * m


def _pack_slab(named_arrays, dtype, row_align=16, min_cols=128):
    """Pack (name, 2D array) pairs into one row-stacked, lane-padded slab + offsets."""
    cols = max(int(a.shape[1]) for _, a in named_arrays)
    cols = max(min_cols, _round_up(cols, 128))
    offsets, r = {}, 0
    for name, a in named_arrays:
        offsets[name] = r
        r += _round_up(int(a.shape[0]), row_align)
    rows = _round_up(r, row_align)
    slab = jnp.zeros((rows, cols), dtype)
    for name, a in named_arrays:
        o = offsets[name]
        slab = slab.at[o:o + a.shape[0], :a.shape[1]].set(a.astype(dtype))
    return slab, offsets


def _pick_tb(B, N):
    """How many batch elements to pack per grid step (sublane packing)."""
    divisors = [tb for tb in range(1, B + 1) if B % tb == 0]
    good = [tb for tb in divisors if (tb * N) % 8 == 0] or divisors
    multi = [tb for tb in good if B // tb >= 2] or good     # keep grid >= 2 for v7x's 2 TCs
    return max(multi)


def _make_kernel(T, N, D, H, E, KA, TB, goff, woff):
    """Kernel body for one grid step: TB packed batch elements, full (T-1)-step recurrence."""
    TBN, TBE = TB * N, TB * E
    KAH = KA * H
    H3 = 3 * H
    TS = T - 1
    f32, bf16 = jnp.float32, jnp.bfloat16

    def kernel(ins_ref, rt_ref, g_ref, w_ref, b_ref, pred_ref, hbuf_ref):
        # ---- constants: static slices of the pre-packed slabs (resident in VMEM) ----
        rr = g_ref[goff["rr"]:goff["rr"] + TBE, 0:TBN]        # bf16 block-diag one-hot [TBE,TBN]
        rs = g_ref[goff["rs"]:goff["rs"] + TBE, 0:TBN]
        rrT = g_ref[goff["rrT"]:goff["rrT"] + TBN, 0:TBE]     # [TBN, TBE]
        w1 = w_ref[woff["w1"]:woff["w1"] + H, 0:2 * KAH]      # [H, 2*KA*H]  (recv | send halves)
        w2 = w_ref[woff["w2"]:woff["w2"] + KAH, 0:KAH]        # block-diag msg_fc2
        whf = w_ref[woff["whf"]:woff["whf"] + KAH, 0:H3]      # KA-stacked [hr|hi|hn] / D
        wi = w_ref[woff["wi"]:woff["wi"] + D, 0:H3]           # [ir|ii|in]
        o1w = w_ref[woff["o1"]:woff["o1"] + H, 0:H]
        o2w = w_ref[woff["o2"]:woff["o2"] + H, 0:H]
        o3w = w_ref[woff["o3"]:woff["o3"] + H, 0:D]
        b1 = b_ref[0:1, 0:KAH]                                # f32 biases
        b2 = b_ref[1:2, 0:KAH]
        bi = b_ref[2:3, 0:H3]
        ob1 = b_ref[3:4, 0:H]
        ob2 = b_ref[4:5, 0:H]
        ob3 = b_ref[5:6, 0:D]

        rt = rt_ref[...]                                      # f32 [TBE, KA*H] (pre /norm, lane-repeated)

        hidden = jnp.zeros((TBN, H), f32)

        # (T-1)-step recurrence fully in-kernel; tiny static trip count -> Python unroll.
        for t in range(TS):
            ins_t = ins_ref[pl.ds(t * TBN, TBN), :]                                  # f32 [TBN, D]

            # message MLP, reassociated: project hidden once, then gather onto edges.
            hp = jnp.dot(hidden.astype(bf16), w1, preferred_element_type=f32)        # [TBN, 2*KA*H]
            hpA = hp[:, :KAH].astype(bf16)
            hpB = hp[:, KAH:2 * KAH].astype(bf16)
            h1 = jnp.tanh(jnp.dot(rr, hpA, preferred_element_type=f32)
                          + jnp.dot(rs, hpB, preferred_element_type=f32) + b1)       # [TBE, KA*H]
            h2 = jnp.tanh(jnp.dot(h1.astype(bf16), w2, preferred_element_type=f32) + b2)

            # edge-type weighting + aggregation (sum over types folded into whf).
            weighted = (h2 * rt).astype(bf16)                                         # [TBE, KA*H]
            aggp = jnp.dot(rrT, weighted, preferred_element_type=f32)                 # [TBN, KA*H]

            # fused GRU-style update; gates stay f32 on the VPU/EUP.
            gi = jnp.dot(ins_t.astype(bf16), wi, preferred_element_type=f32) + bi     # [TBN, 3H]
            gh = jnp.dot(aggp.astype(bf16), whf, preferred_element_type=f32)          # [TBN, 3H]
            r = jax.nn.sigmoid(gi[:, :H] + gh[:, :H])
            i = jax.nn.sigmoid(gi[:, H:2 * H] + gh[:, H:2 * H])
            n = jnp.tanh(gi[:, 2 * H:H3] + r * gh[:, 2 * H:H3])
            hidden = (1.0 - i) * n + i * hidden

            hbuf_ref[pl.ds(t * TBN, TBN), :] = hidden         # stash for batched output MLP

        # output MLP batched over all time steps (wide M), single residual add + store.
        # TODO(synk): a fully lane-dense (TB*N*D-wide) output store would need an in-kernel
        # sublane->lane relayout; kept the natural layout and a single store statement instead.
        hs = hbuf_ref[...]                                                            # [(T-1)*TBN, H]
        p1 = jax.nn.relu(jnp.dot(hs.astype(bf16), o1w, preferred_element_type=f32) + ob1)
        p2 = jax.nn.relu(jnp.dot(p1.astype(bf16), o2w, preferred_element_type=f32) + ob2)
        p3 = jnp.dot(p2.astype(bf16), o3w, preferred_element_type=f32) + ob3          # [(T-1)*TBN, D]
        pred_ref[...] = ins_ref[...] + p3

    return kernel


def _prepare_params(p, D, H, K, skip_first):
    """Fuse / fold PyTorch-style parameters into kernel-friendly packed slabs."""
    start = 1 if skip_first else 0
    KA = K - start
    KAH = KA * H

    # layer-1 message weights: recv/send halves, stacked over active edge types, concatenated.
    w1r = jnp.concatenate([p["msg_w1"][start + k][:H, :] for k in range(KA)], axis=1)  # [H, KA*H]
    w1s = jnp.concatenate([p["msg_w1"][start + k][H:, :] for k in range(KA)], axis=1)  # [H, KA*H]
    w1cat = jnp.concatenate([w1r, w1s], axis=1)                                        # [H, 2*KA*H]
    b1 = jnp.concatenate([p["msg_b1"][start + k] for k in range(KA)], axis=1)          # [1, KA*H]

    # layer-2 message weights as one block-diagonal matrix.
    w2 = jnp.zeros((KAH, KAH), jnp.float32)
    for k in range(KA):
        w2 = w2.at[k * H:(k + 1) * H, k * H:(k + 1) * H].set(p["msg_w2"][start + k])
    b2 = jnp.concatenate([p["msg_b2"][start + k] for k in range(KA)], axis=1)          # [1, KA*H]

    # fused GRU projections; fold the sum-over-edge-types and the /D scale into whf.
    wi = jnp.concatenate([p["irw"], p["iiw"], p["inw"]], axis=1)                       # [D, 3H]
    bi = jnp.concatenate([p["irb"], p["iib"], p["inb"]], axis=1)                       # [1, 3H]
    wh = jnp.concatenate([p["hr"], p["hi"], p["hn"]], axis=1)                          # [H, 3H]
    whf = jnp.tile(wh, (KA, 1)) / float(D)                                             # [KA*H, 3H]

    wslab, woff = _pack_slab(
        [("w1", w1cat), ("w2", w2), ("whf", whf), ("wi", wi),
         ("o1", p["o1w"]), ("o2", p["o2w"]), ("o3", p["o3w"])],
        jnp.bfloat16)

    # all biases in one small f32 slab, one group per row.
    bias_rows = [b1, b2, bi, p["o1b"], p["o2b"], p["o3b"]]
    widths = [KAH, KAH, 3 * H, H, H, D]
    bcols = max(128, _round_up(max(widths), 128))
    bslab = jnp.zeros((8, bcols), jnp.float32)
    for r, (row, w) in enumerate(zip(bias_rows, widths)):
        bslab = bslab.at[r, :w].set(row[0])

    return {"KA": KA, "wslab": wslab, "woff": woff, "bslab": bslab}


def interaction_decoder_forward(data, rel_type, rel_rec, rel_send, params,
                                H, K, skip_first=True, tb=None):
    """data: [B, N, T, D]; rel_type: [B, E, K]; rel_rec/rel_send: [E, N] (one-hot)."""
    B, N, T, D = data.shape
    E = rel_rec.shape[0]
    start = 1 if skip_first else 0
    KA = K - start
    norm = float(KA)
    KAH = KA * H

    if tb is None:
        tb = _pick_tb(B, N)
    assert B % tb == 0
    G = B // tb
    TBN, TBE = tb * N, tb * E
    TS = T - 1

    fused = _prepare_params(params, D, H, K, skip_first)

    # batch-packed block-diagonal graph operators (batch-shared -> built once, bf16 exact 0/1).
    eye = jnp.eye(tb, dtype=jnp.float32)
    rr_bd = jnp.kron(eye, rel_rec)                                               # [TBE, TBN]
    rs_bd = jnp.kron(eye, rel_send)
    gslab, goff = _pack_slab([("rr", rr_bd), ("rs", rs_bd), ("rrT", rr_bd.T)], jnp.bfloat16)

    # inputs = data.transpose(1,2) -> [B, T, N, D]; pred_steps=1 => ground-truth input each step.
    inputs = jnp.transpose(data, (0, 2, 1, 3))[:, :TS]                           # [B, T-1, N, D]
    ins_packed = (inputs.reshape(G, tb, TS, N, D)
                  .transpose(0, 2, 1, 3, 4)
                  .reshape(G, TS * TBN, D))                                      # [G, (T-1)*TB*N, D]

    # edge-type probabilities: active types only, pre-divided by norm, lane-repeated to KA*H.
    rt_active = rel_type[:, :, start:] / norm                                    # [B, E, KA]
    rt_rep = jnp.repeat(rt_active, H, axis=2)                                    # [B, E, KA*H]
    rt_packed = rt_rep.reshape(G, TBE, KAH)                                      # [G, TB*E, KA*H]

    kernel = _make_kernel(T, N, D, H, E, KA, tb, goff, fused["woff"])

    def const_spec(arr):
        nd = arr.ndim
        return pl.BlockSpec(arr.shape, lambda g, _nd=nd: (0,) * _nd)

    in_specs = [
        pl.BlockSpec((None, TS * TBN, D), lambda g: (g, 0, 0)),    # packed inputs (batch squeezed)
        pl.BlockSpec((None, TBE, KAH), lambda g: (g, 0, 0)),       # packed edge-type probabilities
        const_spec(gslab),                                         # graph slab (bf16)
        const_spec(fused["wslab"]),                                # weight slab (bf16)
        const_spec(fused["bslab"]),                                # bias slab (f32)
    ]
    out_spec = pl.BlockSpec((None, TS * TBN, D), lambda g: (g, 0, 0))

    preds = pl.pallas_call(
        kernel,
        out_shape=jax.ShapeDtypeStruct((G, TS * TBN, D), jnp.float32),
        grid_spec=pltpu.PrefetchScalarGridSpec(
            num_scalar_prefetch=0,
            grid=(G,),                                   # batch groups only; time loop in-kernel
            in_specs=in_specs,
            out_specs=out_spec,
            scratch_shapes=[pltpu.VMEM((TS * TBN, H), jnp.float32)],
        ),
        compiler_params=pltpu.CompilerParams(
            dimension_semantics=("parallel",)),          # sharded over v7x's 2 TCs; neutral elsewhere
    )(ins_packed, rt_packed, gslab, fused["wslab"], fused["bslab"])

    # [G, (T-1)*TB*N, D] -> stack(dim=1).transpose(1,2) semantics -> [B, N, T-1, D]
    out = (preds.reshape(G, TS, tb, N, D)
           .transpose(0, 2, 3, 1, 4)
           .reshape(B, N, TS, D))
    return out


def reference_forward(data, rel_type, rel_rec, rel_send, p, H, K, skip_first=True):
    """Pure-JAX reference mirroring the PyTorch forward (unfused parameters)."""
    B, N, T, D = data.shape
    E = rel_rec.shape[0]
    start_idx = 1 if skip_first else 0
    norm = float(K - 1) if skip_first else float(K)

    inputs = jnp.transpose(data, (0, 2, 1, 3))
    hidden = jnp.zeros((B, N, H), jnp.float32)
    preds = []
    for step in range(T - 1):
        ins = inputs[:, step]
        recv = jnp.einsum('en,bnh->beh', rel_rec, hidden)
        send = jnp.einsum('en,bnh->beh', rel_send, hidden)
        pre = jnp.concatenate([recv, send], -1)
        all_msgs = jnp.zeros((B, E, H), jnp.float32)
        for k in range(start_idx, K):
            m = jnp.tanh(pre @ p["msg_w1"][k] + p["msg_b1"][k])
            m = jnp.tanh(m @ p["msg_w2"][k] + p["msg_b2"][k])
            m = m * rel_type[:, :, k:k + 1]
            all_msgs = all_msgs + m / norm
        agg = jnp.einsum('beh,en->bnh', all_msgs, rel_rec) / float(D)
        r = jax.nn.sigmoid(ins @ p["irw"] + p["irb"] + agg @ p["hr"])
        i = jax.nn.sigmoid(ins @ p["iiw"] + p["iib"] + agg @ p["hi"])
        n = jnp.tanh(ins @ p["inw"] + p["inb"] + r * (agg @ p["hn"]))
        hidden = (1.0 - i) * n + i * hidden
        pr = jax.nn.relu(hidden @ p["o1w"] + p["o1b"])
        pr = jax.nn.relu(pr @ p["o2w"] + p["o2b"])
        pr = pr @ p["o3w"] + p["o3b"]
        preds.append(ins + pr)
    out = jnp.stack(preds, 1)
    return jnp.transpose(out, (0, 2, 1, 3))


def init_params(key, D, H, K):
    ks = jax.random.split(key, 32)
    s = 0.1

    def w(k, shape):
        return (s * jax.random.normal(k, shape)).astype(jnp.float32)

    return {
        "msg_w1": w(ks[0], (K, 2 * H, H)), "msg_b1": w(ks[1], (K, 1, H)),
        "msg_w2": w(ks[2], (K, H, H)),     "msg_b2": w(ks[3], (K, 1, H)),
        "hr": w(ks[4], (H, H)), "hi": w(ks[5], (H, H)), "hn": w(ks[6], (H, H)),
        "irw": w(ks[7], (D, H)), "irb": w(ks[8], (1, H)),
        "iiw": w(ks[9], (D, H)), "iib": w(ks[10], (1, H)),
        "inw": w(ks[11], (D, H)), "inb": w(ks[12], (1, H)),
        "o1w": w(ks[13], (H, H)), "o1b": w(ks[14], (1, H)),
        "o2w": w(ks[15], (H, H)), "o2b": w(ks[16], (1, H)),
        "o3w": w(ks[17], (H, D)), "o3b": w(ks[18], (1, D)),
    }


if __name__ == "__main__":
    B, N, T, D = 16, 4, 8, 4     # batch, atoms, time steps, n_in_node
    H, K = 32, 3                 # n_hid, edge_types
    E = N * (N - 1)              # fully connected graph, no self loops

    key = jax.random.PRNGKey(0)
    k_data, k_rel, k_par = jax.random.split(key, 3)

    data = jax.random.normal(k_data, (B, N, T, D), dtype=jnp.float32)

    # one-hot receiver / sender matrices for all off-diagonal edges
    recv_idx, send_idx = [], []
    for i in range(N):
        for j in range(N):
            if i != j:
                recv_idx.append(i)
                send_idx.append(j)
    rel_rec = jax.nn.one_hot(jnp.array(recv_idx), N, dtype=jnp.float32)    # [E, N]
    rel_send = jax.nn.one_hot(jnp.array(send_idx), N, dtype=jnp.float32)   # [E, N]

    rel_type = jax.nn.softmax(
        jax.random.normal(k_rel, (B, E, K), dtype=jnp.float32), axis=-1)   # [B, E, K]

    params = init_params(k_par, D, H, K)

    out = interaction_decoder_forward(data, rel_type, rel_rec, rel_send, params,
                                      H=H, K=K, skip_first=True)
    out = jax.block_until_ready(out)
    assert out.shape == (B, N, T - 1, D), out.shape

    ref = reference_forward(data, rel_type, rel_rec, rel_send, params,
                            H=H, K=K, skip_first=True)
    ref = jax.block_until_ready(ref)
    assert jnp.allclose(out, ref, rtol=2e-2, atol=2e-2), float(jnp.max(jnp.abs(out - ref)))

    print("KERNEL_OK")
</pallas_src>

<mosaic_0001>
module attributes {stable_mosaic.version = 11 : i64} {
  func.func @kernel(%arg0: i32, %arg1: memref<1x224x4xf32, #tpu.memory_space<vmem>>, %arg2: memref<1x96x64xf32, #tpu.memory_space<vmem>>, %arg3: memref<224x128xbf16, #tpu.memory_space<vmem>>, %arg4: memref<272x128xbf16, #tpu.memory_space<vmem>>, %arg5: memref<8x128xf32, #tpu.memory_space<vmem>>, %arg6: memref<1x224x4xf32, #tpu.memory_space<vmem>>, %arg7: memref<224x32xf32, #tpu.memory_space<vmem>>) attributes {dimension_semantics = [#tpu.dimension_semantics<parallel>], iteration_bounds = array<i64: 2>, scalar_prefetch = 0 : i64, scratch_operands = 1 : i64, tpu.core_type = #tpu.core_type<tc>, window_params = [{transform_indices = @transform_0, window_bounds = array<i64: 1, 224, 4>}, {transform_indices = @transform_1, window_bounds = array<i64: 1, 96, 64>}, {pipeline_mode = #tpu.pipeline_mode<synchronous>, transform_indices = @transform_2, window_bounds = array<i64: 224, 128>}, {pipeline_mode = #tpu.pipeline_mode<synchronous>, transform_indices = @transform_3, window_bounds = array<i64: 272, 128>}, {pipeline_mode = #tpu.pipeline_mode<synchronous>, transform_indices = @transform_4, window_bounds = array<i64: 8, 128>}, {transform_indices = @transform_5, window_bounds = array<i64: 1, 224, 4>}]} {
    %c0 = arith.constant 0 : index
    %c0_0 = arith.constant 0 : index
    %0 = vector.load %arg3[%c0, %c0_0] : memref<224x128xbf16, #tpu.memory_space<vmem>>, vector<96x32xbf16>
    %c96 = arith.constant 96 : index
    %c0_1 = arith.constant 0 : index
    %1 = vector.load %arg3[%c96, %c0_1] : memref<224x128xbf16, #tpu.memory_space<vmem>>, vector<96x32xbf16>
    %c192 = arith.constant 192 : index
    %c0_2 = arith.constant 0 : index
    %2 = vector.load %arg3[%c192, %c0_2] : memref<224x128xbf16, #tpu.memory_space<vmem>>, vector<32x96xbf16>
    %c0_3 = arith.constant 0 : index
    %c0_4 = arith.constant 0 : index
    %3 = vector.load %arg4[%c0_3, %c0_4] : memref<272x128xbf16, #tpu.memory_space<vmem>>, vector<32x128xbf16>
    %c32 = arith.constant 32 : index
    %c0_5 = arith.constant 0 : index
    %4 = vector.load %arg4[%c32, %c0_5] : memref<272x128xbf16, #tpu.memory_space<vmem>>, vector<64x64xbf16>
    %c96_6 = arith.constant 96 : index
    %c0_7 = arith.constant 0 : index
    %5 = vector.load %arg4[%c96_6, %c0_7] : memref<272x128xbf16, #tpu.memory_space<vmem>>, vector<64x96xbf16>
    %c160 = arith.constant 160 : index
    %c0_8 = arith.constant 0 : index
    %6 = vector.load %arg4[%c160, %c0_8] : memref<272x128xbf16, #tpu.memory_space<vmem>>, vector<4x96xbf16>
    %c176 = arith.constant 176 : index
    %c0_9 = arith.constant 0 : index
    %7 = vector.load %arg4[%c176, %c0_9] : memref<272x128xbf16, #tpu.memory_space<vmem>>, vector<32x32xbf16>
    %c208 = arith.constant 208 : index
    %c0_10 = arith.constant 0 : index
    %8 = vector.load %arg4[%c208, %c0_10] : memref<272x128xbf16, #tpu.memory_space<vmem>>, vector<32x32xbf16>
    %c240 = arith.constant 240 : index
    %c0_11 = arith.constant 0 : index
    %9 = vector.load %arg4[%c240, %c0_11] : memref<272x128xbf16, #tpu.memory_space<vmem>>, vector<32x4xbf16>
    %c0_12 = arith.constant 0 : index
    %c0_13 = arith.constant 0 : index
    %10 = vector.load %arg5[%c0_12, %c0_13] : memref<8x128xf32, #tpu.memory_space<vmem>>, vector<1x64xf32>
    %c1 = arith.constant 1 : index
    %c0_14 = arith.constant 0 : index
    %11 = vector.load %arg5[%c1, %c0_14] : memref<8x128xf32, #tpu.memory_space<vmem>>, vector<1x64xf32>
    %c2 = arith.constant 2 : index
    %c0_15 = arith.constant 0 : index
    %12 = vector.load %arg5[%c2, %c0_15] : memref<8x128xf32, #tpu.memory_space<vmem>>, vector<1x96xf32>
    %c3 = arith.constant 3 : index
    %c0_16 = arith.constant 0 : index
    %13 = vector.load %arg5[%c3, %c0_16] : memref<8x128xf32, #tpu.memory_space<vmem>>, vector<1x32xf32>
    %c4 = arith.constant 4 : index
    %c0_17 = arith.constant 0 : index
    %14 = vector.load %arg5[%c4, %c0_17] : memref<8x128xf32, #tpu.memory_space<vmem>>, vector<1x32xf32>
    %c5 = arith.constant 5 : index
    %c0_18 = arith.constant 0 : index
    %15 = vector.load %arg5[%c5, %c0_18] : memref<8x128xf32, #tpu.memory_space<vmem>>, vector<1x4xf32>
    %c0_19 = arith.constant 0 : index
    %c0_20 = arith.constant 0 : index
    %c0_21 = arith.constant 0 : index
    %16 = vector.load %arg2[%c0_19, %c0_20, %c0_21] : memref<1x96x64xf32, #tpu.memory_space<vmem>>, vector<1x96x64xf32>
    %17 = vector.shape_cast %16 : vector<1x96x64xf32> to vector<96x64xf32>
    %cst = arith.constant 0.000000e+00 : f32
    %18 = vector.broadcast %cst : f32 to vector<32x32xf32>
    %c0_22 = arith.constant 0 : index
    %c0_23 = arith.constant 0 : index
    %c0_24 = arith.constant 0 : index
    %19 = vector.load %arg1[%c0_22, %c0_23, %c0_24] : memref<1x224x4xf32, #tpu.memory_space<vmem>>, vector<1x32x4xf32>
    %20 = vector.shape_cast %19 : vector<1x32x4xf32> to vector<32x4xf32>
    %21 = arith.truncf %18 : vector<32x32xf32> to vector<32x32xbf16>
    %cst_25 = arith.constant dense<0.000000e+00> : vector<32x128xf32>
    %22 = tpu.matmul %21, %3, %cst_25 {dimension_numbers = #tpu.dot_dimension_numbers<[1], [0], [0], [1], [0, 0, 1, 1], [], []>} : vector<32x32xbf16>, vector<32x128xbf16>, vector<32x128xf32> -> vector<32x128xf32>
    %23 = vector.extract_strided_slice %22 {offsets = [0, 0], sizes = [32, 64], strides = [1, 1]} : vector<32x128xf32> to vector<32x64xf32>
    %24 = arith.truncf %23 : vector<32x64xf32> to vector<32x64xbf16>
    %25 = vector.extract_strided_slice %22 {offsets = [0, 64], sizes = [32, 64], strides = [1, 1]} : vector<32x128xf32> to vector<32x64xf32>
    %26 = arith.truncf %25 : vector<32x64xf32> to vector<32x64xbf16>
    %cst_26 = arith.constant dense<0.000000e+00> : vector<96x64xf32>
    %27 = tpu.matmul %0, %24, %cst_26 {dimension_numbers = #tpu.dot_dimension_numbers<[1], [0], [0], [1], [0, 0, 1, 1], [], []>} : vector<96x32xbf16>, vector<32x64xbf16>, vector<96x64xf32> -> vector<96x64xf32>
    %cst_27 = arith.constant dense<0.000000e+00> : vector<96x64xf32>
    %28 = tpu.matmul %1, %26, %cst_27 {dimension_numbers = #tpu.dot_dimension_numbers<[1], [0], [0], [1], [0, 0, 1, 1], [], []>} : vector<96x32xbf16>, vector<32x64xbf16>, vector<96x64xf32> -> vector<96x64xf32>
    %29 = arith.addf %27, %28 : vector<96x64xf32>
    %30 = vector.broadcast %10 : vector<1x64xf32> to vector<96x64xf32>
    %31 = arith.addf %29, %30 : vector<96x64xf32>
    %32 = math.tanh %31 : vector<96x64xf32>
    %33 = arith.truncf %32 : vector<96x64xf32> to vector<96x64xbf16>
    %cst_28 = arith.constant dense<0.000000e+00> : vector<96x64xf32>
    %34 = tpu.matmul %33, %4, %cst_28 {dimension_numbers = #tpu.dot_dimension_numbers<[1], [0], [0], [1], [0, 0, 1, 1], [], []>} : vector<96x64xbf16>, vector<64x64xbf16>, vector<96x64xf32> -> vector<96x64xf32>
    %35 = vector.broadcast %11 : vector<1x64xf32> to vector<96x64xf32>
    %36 = arith.addf %34, %35 : vector<96x64xf32>
    %37 = math.tanh %36 : vector<96x64xf32>
    %38 = arith.mulf %37, %17 : vector<96x64xf32>
    %39 = arith.truncf %38 : vector<96x64xf32> to vector<96x64xbf16>
    %cst_29 = arith.constant dense<0.000000e+00> : vector<32x64xf32>
    %40 = tpu.matmul %2, %39, %cst_29 {dimension_numbers = #tpu.dot_dimension_numbers<[1], [0], [0], [1], [0, 0, 1, 1], [], []>} : vector<32x96xbf16>, vector<96x64xbf16>, vector<32x64xf32> -> vector<32x64xf32>
    %41 = arith.truncf %20 : vector<32x4xf32> to vector<32x4xbf16>
    %cst_30 = arith.constant dense<0.000000e+00> : vector<32x96xf32>
    %42 = tpu.matmul %41, %6, %cst_30 {dimension_numbers = #tpu.dot_dimension_numbers<[1], [0], [0], [1], [0, 0, 1, 1], [], []>} : vector<32x4xbf16>, vector<4x96xbf16>, vector<32x96xf32> -> vector<32x96xf32>
    %43 = vector.broadcast %12 : vector<1x96xf32> to vector<32x96xf32>
    %44 = arith.addf %42, %43 : vector<32x96xf32>
    %45 = arith.truncf %40 : vector<32x64xf32> to vector<32x64xbf16>
    %cst_31 = arith.constant dense<0.000000e+00> : vector<32x96xf32>
    %46 = tpu.matmul %45, %5, %cst_31 {dimension_numbers = #tpu.dot_dimension_numbers<[1], [0], [0], [1], [0, 0, 1, 1], [], []>} : vector<32x64xbf16>, vector<64x96xbf16>, vector<32x96xf32> -> vector<32x96xf32>
    %47 = vector.extract_strided_slice %44 {offsets = [0, 0], sizes = [32, 32], strides = [1, 1]} : vector<32x96xf32> to vector<32x32xf32>
    %48 = vector.extract_strided_slice %46 {offsets = [0, 0], sizes = [32, 32], strides = [1, 1]} : vector<32x96xf32> to vector<32x32xf32>
    %49 = arith.addf %47, %48 : vector<32x32xf32>
    %50 = arith.negf %49 : vector<32x32xf32>
    %51 = math.exp %50 : vector<32x32xf32>
    %cst_32 = arith.constant 1.000000e+00 : f32
    %52 = vector.broadcast %cst_32 : f32 to vector<32x32xf32>
    %53 = arith.addf %52, %51 : vector<32x32xf32>
    %54 = arith.divf %52, %53 : vector<32x32xf32>
    %55 = vector.extract_strided_slice %44 {offsets = [0, 32], sizes = [32, 32], strides = [1, 1]} : vector<32x96xf32> to vector<32x32xf32>
    %56 = vector.extract_strided_slice %46 {offsets = [0, 32], sizes = [32, 32], strides = [1, 1]} : vector<32x96xf32> to vector<32x32xf32>
    %57 = arith.addf %55, %56 : vector<32x32xf32>
    %58 = arith.negf %57 : vector<32x32xf32>
    %59 = math.exp %58 : vector<32x32xf32>
    %cst_33 = arith.constant 1.000000e+00 : f32
    %60 = vector.broadcast %cst_33 : f32 to vector<32x32xf32>
    %61 = arith.addf %60, %59 : vector<32x32xf32>
    %62 = arith.divf %60, %61 : vector<32x32xf32>
    %63 = vector.extract_strided_slice %44 {offsets = [0, 64], sizes = [32, 32], strides = [1, 1]} : vector<32x96xf32> to vector<32x32xf32>
    %64 = vector.extract_strided_slice %46 {offsets = [0, 64], sizes = [32, 32], strides = [1, 1]} : vector<32x96xf32> to vector<32x32xf32>
    %65 = arith.mulf %54, %64 : vector<32x32xf32>
    %66 = arith.addf %63, %65 : vector<32x32xf32>
    %67 = math.tanh %66 : vector<32x32xf32>
    %cst_34 = arith.constant 1.000000e+00 : f32
    %68 = vector.broadcast %cst_34 : f32 to vector<32x32xf32>
    %69 = arith.subf %68, %62 : vector<32x32xf32>
    %70 = arith.mulf %69, %67 : vector<32x32xf32>
    %71 = arith.mulf %62, %18 : vector<32x32xf32>
    %72 = arith.addf %70, %71 : vector<32x32xf32>
    %c0_35 = arith.constant 0 : index
    %c0_36 = arith.constant 0 : index
    %73 = vector.load %arg7[%c0_35, %c0_36] : memref<224x32xf32, #tpu.memory_space<vmem>>, vector<32x32xf32>
    tpu.vector_store %arg7[%c0_35, %c0_36], %72 {strides = array<i32>} : memref<224x32xf32, #tpu.memory_space<vmem>>, vector<32x32xf32>,
    %c0_37 = arith.constant 0 : index
    %c32_38 = arith.constant 32 : index
    %c0_39 = arith.constant 0 : index
    %74 = vector.load %arg1[%c0_37, %c32_38, %c0_39] : memref<1x224x4xf32, #tpu.memory_space<vmem>>, vector<1x32x4xf32>
    %75 = vector.shape_cast %74 : vector<1x32x4xf32> to vector<32x4xf32>
    %76 = arith.truncf %72 : vector<32x32xf32> to vector<32x32xbf16>
    %cst_40 = arith.constant dense<0.000000e+00> : vector<32x128xf32>
    %77 = tpu.matmul %76, %3, %cst_40 {dimension_numbers = #tpu.dot_dimension_numbers<[1], [0], [0], [1], [0, 0, 1, 1], [], []>} : vector<32x32xbf16>, vector<32x128xbf16>, vector<32x128xf32> -> vector<32x128xf32>
    %78 = vector.extract_strided_slice %77 {offsets = [0, 0], sizes = [32, 64], strides = [1, 1]} : vector<32x128xf32> to vector<32x64xf32>
    %79 = arith.truncf %78 : vector<32x64xf32> to vector<32x64xbf16>
    %80 = vector.extract_strided_slice %77 {offsets = [0, 64], sizes = [32, 64], strides = [1, 1]} : vector<32x128xf32> to vector<32x64xf32>
    %81 = arith.truncf %80 : vector<32x64xf32> to vector<32x64xbf16>
    %cst_41 = arith.constant dense<0.000000e+00> : vector<96x64xf32>
    %82 = tpu.matmul %0, %79, %cst_41 {dimension_numbers = #tpu.dot_dimension_numbers<[1], [0], [0], [1], [0, 0, 1, 1], [], []>} : vector<96x32xbf16>, vector<32x64xbf16>, vector<96x64xf32> -> vector<96x64xf32>
    %cst_42 = arith.constant dense<0.000000e+00> : vector<96x64xf32>
    %83 = tpu.matmul %1, %81, %cst_42 {dimension_numbers = #tpu.dot_dimension_numbers<[1], [0], [0], [1], [0, 0, 1, 1], [], []>} : vector<96x32xbf16>, vector<32x64xbf16>, vector<96x64xf32> -> vector<96x64xf32>
    %84 = arith.addf %82, %83 : vector<96x64xf32>
    %85 = vector.broadcast %10 : vector<1x64xf32> to vector<96x64xf32>
    %86 = arith.addf %84, %85 : vector<96x64xf32>
    %87 = math.tanh %86 : vector<96x64xf32>
    %88 = arith.truncf %87 : vector<96x64xf32> to vector<96x64xbf16>
    %cst_43 = arith.constant dense<0.000000e+00> : vector<96x64xf32>
    %89 = tpu.matmul %88, %4, %cst_43 {dimension_numbers = #tpu.dot_dimension_numbers<[1], [0], [0], [1], [0, 0, 1, 1], [], []>} : vector<96x64xbf16>, vector<64x64xbf16>, vector<96x64xf32> -> vector<96x64xf32>
    %90 = vector.broadcast %11 : vector<1x64xf32> to vector<96x64xf32>
    %91 = arith.addf %89, %90 : vector<96x64xf32>
    %92 = math.tanh %91 : vector<96x64xf32>
    %93 = arith.mulf %92, %17 : vector<96x64xf32>
    %94 = arith.truncf %93 : vector<96x64xf32> to vector<96x64xbf16>
    %cst_44 = arith.constant dense<0.000000e+00> : vector<32x64xf32>
    %95 = tpu.matmul %2, %94, %cst_44 {dimension_numbers = #tpu.dot_dimension_numbers<[1], [0], [0], [1], [0, 0, 1, 1], [], []>} : vector<32x96xbf16>, vector<96x64xbf16>, vector<32x64xf32> -> vector<32x64xf32>
    %96 = arith.truncf %75 : vector<32x4xf32> to vector<32x4xbf16>
    %cst_45 = arith.constant dense<0.000000e+00> : vector<32x96xf32>
    %97 = tpu.matmul %96, %6, %cst_45 {dimension_numbers = #tpu.dot_dimension_numbers<[1], [0], [0], [1], [0, 0, 1, 1], [], []>} : vector<32x4xbf16>, vector<4x96xbf16>, vector<32x96xf32> -> vector<32x96xf32>
    %98 = vector.broadcast %12 : vector<1x96xf32> to vector<32x96xf32>
    %99 = arith.addf %97, %98 : vector<32x96xf32>
    %100 = arith.truncf %95 : vector<32x64xf32> to vector<32x64xbf16>
    %cst_46 = arith.constant dense<0.000000e+00> : vector<32x96xf32>
    %101 = tpu.matmul %100, %5, %cst_46 {dimension_numbers = #tpu.dot_dimension_numbers<[1], [0], [0], [1], [0, 0, 1, 1], [], []>} : vector<32x64xbf16>, vector<64x96xbf16>, vector<32x96xf32> -> vector<32x96xf32>
    %102 = vector.extract_strided_slice %99 {offsets = [0, 0], sizes = [32, 32], strides = [1, 1]} : vector<32x96xf32> to vector<32x32xf32>
    %103 = vector.extract_strided_slice %101 {offsets = [0, 0], sizes = [32, 32], strides = [1, 1]} : vector<32x96xf32> to vector<32x32xf32>
    %104 = arith.addf %102, %103 : vector<32x32xf32>
    %105 = arith.negf %104 : vector<32x32xf32>
    %106 = math.exp %105 : vector<32x32xf32>
    %cst_47 = arith.constant 1.000000e+00 : f32
    %107 = vector.broadcast %cst_47 : f32 to vector<32x32xf32>
    %108 = arith.addf %107, %106 : vector<32x32xf32>
    %109 = arith.divf %107, %108 : vector<32x32xf32>
    %110 = vector.extract_strided_slice %99 {offsets = [0, 32], sizes = [32, 32], strides = [1, 1]} : vector<32x96xf32> to vector<32x32xf32>
    %111 = vector.extract_strided_slice %101 {offsets = [0, 32], sizes = [32, 32], strides = [1, 1]} : vector<32x96xf32> to vector<32x32xf32>
    %112 = arith.addf %110, %111 : vector<32x32xf32>
    %113 = arith.negf %112 : vector<32x32xf32>
    %114 = math.exp %113 : vector<32x32xf32>
    %cst_48 = arith.constant 1.000000e+00 : f32
    %115 = vector.broadcast %cst_48 : f32 to vector<32x32xf32>
    %116 = arith.addf %115, %114 : vector<32x32xf32>
    %117 = arith.divf %115, %116 : vector<32x32xf32>
    %118 = vector.extract_strided_slice %99 {offsets = [0, 64], sizes = [32, 32], strides = [1, 1]} : vector<32x96xf32> to vector<32x32xf32>
    %119 = vector.extract_strided_slice %101 {offsets = [0, 64], sizes = [32, 32], strides = [1, 1]} : vector<32x96xf32> to vector<32x32xf32>
    %120 = arith.mulf %109, %119 : vector<32x32xf32>
    %121 = arith.addf %118, %120 : vector<32x32xf32>
    %122 = math.tanh %121 : vector<32x32xf32>
    %cst_49 = arith.constant 1.000000e+00 : f32
    %123 = vector.broadcast %cst_49 : f32 to vector<32x32xf32>
    %124 = arith.subf %123, %117 : vector<32x32xf32>
    %125 = arith.mulf %124, %122 : vector<32x32xf32>
    %126 = arith.mulf %117, %72 : vector<32x32xf32>
    %127 = arith.addf %125, %126 : vector<32x32xf32>
    %c32_50 = arith.constant 32 : index
    %c0_51 = arith.constant 0 : index
    %128 = vector.load %arg7[%c32_50, %c0_51] : memref<224x32xf32, #tpu.memory_space<vmem>>, vector<32x32xf32>
    tpu.vector_store %arg7[%c32_50, %c0_51], %127 {strides = array<i32>} : memref<224x32xf32, #tpu.memory_space<vmem>>, vector<32x32xf32>,
    %c0_52 = arith.constant 0 : index
    %c64 = arith.constant 64 : index
    %c0_53 = arith.constant 0 : index
    %129 = vector.load %arg1[%c0_52, %c64, %c0_53] : memref<1x224x4xf32, #tpu.memory_space<vmem>>, vector<1x32x4xf32>
    %130 = vector.shape_cast %129 : vector<1x32x4xf32> to vector<32x4xf32>
    %131 = arith.truncf %127 : vector<32x32xf32> to vector<32x32xbf16>
    %cst_54 = arith.constant dense<0.000000e+00> : vector<32x128xf32>
    %132 = tpu.matmul %131, %3, %cst_54 {dimension_numbers = #tpu.dot_dimension_numbers<[1], [0], [0], [1], [0, 0, 1, 1], [], []>} : vector<32x32xbf16>, vector<32x128xbf16>, vector<32x128xf32> -> vector<32x128xf32>
    %133 = vector.extract_strided_slice %132 {offsets = [0, 0], sizes = [32, 64], strides = [1, 1]} : vector<32x128xf32> to vector<32x64xf32>
    %134 = arith.truncf %133 : vector<32x64xf32> to vector<32x64xbf16>
    %135 = vector.extract_strided_slice %132 {offsets = [0, 64], sizes = [32, 64], strides = [1, 1]} : vector<32x128xf32> to vector<32x64xf32>
    %136 = arith.truncf %135 : vector<32x64xf32> to vector<32x64xbf16>
    %cst_55 = arith.constant dense<0.000000e+00> : vector<96x64xf32>
    %137 = tpu.matmul %0, %134, %cst_55 {dimension_numbers = #tpu.dot_dimension_numbers<[1], [0], [0], [1], [0, 0, 1, 1], [], []>} : vector<96x32xbf16>, vector<32x64xbf16>, vector<96x64xf32> -> vector<96x64xf32>
    %cst_56 = arith.constant dense<0.000000e+00> : vector<96x64xf32>
    %138 = tpu.matmul %1, %136, %cst_56 {dimension_numbers = #tpu.dot_dimension_numbers<[1], [0], [0], [1], [0, 0, 1, 1], [], []>} : vector<96x32xbf16>, vector<32x64xbf16>, vector<96x64xf32> -> vector<96x64xf32>
    %139 = arith.addf %137, %138 : vector<96x64xf32>
    %140 = vector.broadcast %10 : vector<1x64xf32> to vector<96x64xf32>
    %141 = arith.addf %139, %140 : vector<96x64xf32>
    %142 = math.tanh %141 : vector<96x64xf32>
    %143 = arith.truncf %142 : vector<96x64xf32> to vector<96x64xbf16>
    %cst_57 = arith.constant dense<0.000000e+00> : vector<96x64xf32>
    %144 = tpu.matmul %143, %4, %cst_57 {dimension_numbers = #tpu.dot_dimension_numbers<[1], [0], [0], [1], [0, 0, 1, 1], [], []>} : vector<96x64xbf16>, vector<64x64xbf16>, vector<96x64xf32> -> vector<96x64xf32>
    %145 = vector.broadcast %11 : vector<1x64xf32> to vector<96x64xf32>
    %146 = arith.addf %144, %145 : vector<96x64xf32>
    %147 = math.tanh %146 : vector<96x64xf32>
    %148 = arith.mulf %147, %17 : vector<96x64xf32>
    %149 = arith.truncf %148 : vector<96x64xf32> to vector<96x64xbf16>
    %cst_58 = arith.constant dense<0.000000e+00> : vector<32x64xf32>
    %150 = tpu.matmul %2, %149, %cst_58 {dimension_numbers = #tpu.dot_dimension_numbers<[1], [0], [0], [1], [0, 0, 1, 1], [], []>} : vector<32x96xbf16>, vector<96x64xbf16>, vector<32x64xf32> -> vector<32x64xf32>
    %151 = arith.truncf %130 : vector<32x4xf32> to vector<32x4xbf16>
    %cst_59 = arith.constant dense<0.000000e+00> : vector<32x96xf32>
    %152 = tpu.matmul %151, %6, %cst_59 {dimension_numbers = #tpu.dot_dimension_numbers<[1], [0], [0], [1], [0, 0, 1, 1], [], []>} : vector<32x4xbf16>, vector<4x96xbf16>, vector<32x96xf32> -> vector<32x96xf32>
    %153 = vector.broadcast %12 : vector<1x96xf32> to vector<32x96xf32>
    %154 = arith.addf %152, %153 : vector<32x96xf32>
    %155 = arith.truncf %150 : vector<32x64xf32> to vector<32x64xbf16>
    %cst_60 = arith.constant dense<0.000000e+00> : vector<32x96xf32>
    %156 = tpu.matmul %155, %5, %cst_60 {dimension_numbers = #tpu.dot_dimension_numbers<[1], [0], [0], [1], [0, 0, 1, 1], [], []>} : vector<32x64xbf16>, vector<64x96xbf16>, vector<32x96xf32> -> vector<32x96xf32>
    %157 = vector.extract_strided_slice %154 {offsets = [0, 0], sizes = [32, 32], strides = [1, 1]} : vector<32x96xf32> to vector<32x32xf32>
    %158 = vector.extract_strided_slice %156 {offsets = [0, 0], sizes = [32, 32], strides = [1, 1]} : vector<32x96xf32> to vector<32x32xf32>
    %159 = arith.addf %157, %158 : vector<32x32xf32>
    %160 = arith.negf %159 : vector<32x32xf32>
    %161 = math.exp %160 : vector<32x32xf32>
    %cst_61 = arith.constant 1.000000e+00 : f32
    %162 = vector.broadcast %cst_61 : f32 to vector<32x32xf32>
    %163 = arith.addf %162, %161 : vector<32x32xf32>
    %164 = arith.divf %162, %163 : vector<32x32xf32>
    %165 = vector.extract_strided_slice %154 {offsets = [0, 32], sizes = [32, 32], strides = [1, 1]} : vector<32x96xf32> to vector<32x32xf32>
    %166 = vector.extract_strided_slice %156 {offsets = [0, 32], sizes = [32, 32], strides = [1, 1]} : vector<32x96xf32> to vector<32x32xf32>
    %167 = arith.addf %165, %166 : vector<32x32xf32>
    %168 = arith.negf %167 : vector<32x32xf32>
    %169 = math.exp %168 : vector<32x32xf32>
    %cst_62 = arith.constant 1.000000e+00 : f32
    %170 = vector.broadcast %cst_62 : f32 to vector<32x32xf32>
    %171 = arith.addf %170, %169 : vector<32x32xf32>
    %172 = arith.divf %170, %171 : vector<32x32xf32>
    %173 = vector.extract_strided_slice %154 {offsets = [0, 64], sizes = [32, 32], strides = [1, 1]} : vector<32x96xf32> to vector<32x32xf32>
    %174 = vector.extract_strided_slice %156 {offsets = [0, 64], sizes = [32, 32], strides = [1, 1]} : vector<32x96xf32> to vector<32x32xf32>
    %175 = arith.mulf %164, %174 : vector<32x32xf32>
    %176 = arith.addf %173, %175 : vector<32x32xf32>
    %177 = math.tanh %176 : vector<32x32xf32>
    %cst_63 = arith.constant 1.000000e+00 : f32
    %178 = vector.broadcast %cst_63 : f32 to vector<32x32xf32>
    %179 = arith.subf %178, %172 : vector<32x32xf32>
    %180 = arith.mulf %179, %177 : vector<32x32xf32>
    %181 = arith.mulf %172, %127 : vector<32x32xf32>
    %182 = arith.addf %180, %181 : vector<32x32xf32>
    %c64_64 = arith.constant 64 : index
    %c0_65 = arith.constant 0 : index
    %183 = vector.load %arg7[%c64_64, %c0_65] : memref<224x32xf32, #tpu.memory_space<vmem>>, vector<32x32xf32>
    tpu.vector_store %arg7[%c64_64, %c0_65], %182 {strides = array<i32>} : memref<224x32xf32, #tpu.memory_space<vmem>>, vector<32x32xf32>,
    %c0_66 = arith.constant 0 : index
    %c96_67 = arith.constant 96 : index
    %c0_68 = arith.constant 0 : index
    %184 = vector.load %arg1[%c0_66, %c96_67, %c0_68] : memref<1x224x4xf32, #tpu.memory_space<vmem>>, vector<1x32x4xf32>
    %185 = vector.shape_cast %184 : vector<1x32x4xf32> to vector<32x4xf32>
    %186 = arith.truncf %182 : vector<32x32xf32> to vector<32x32xbf16>
    %cst_69 = arith.constant dense<0.000000e+00> : vector<32x128xf32>
    %187 = tpu.matmul %186, %3, %cst_69 {dimension_numbers = #tpu.dot_dimension_numbers<[1], [0], [0], [1], [0, 0, 1, 1], [], []>} : vector<32x32xbf16>, vector<32x128xbf16>, vector<32x128xf32> -> vector<32x128xf32>
    %188 = vector.extract_strided_slice %187 {offsets = [0, 0], sizes = [32, 64], strides = [1, 1]} : vector<32x128xf32> to vector<32x64xf32>
    %189 = arith.truncf %188 : vector<32x64xf32> to vector<32x64xbf16>
    %190 = vector.extract_strided_slice %187 {offsets = [0, 64], sizes = [32, 64], strides = [1, 1]} : vector<32x128xf32> to vector<32x64xf32>
    %191 = arith.truncf %190 : vector<32x64xf32> to vector<32x64xbf16>
    %cst_70 = arith.constant dense<0.000000e+00> : vector<96x64xf32>
    %192 = tpu.matmul %0, %189, %cst_70 {dimension_numbers = #tpu.dot_dimension_numbers<[1], [0], [0], [1], [0, 0, 1, 1], [], []>} : vector<96x32xbf16>, vector<32x64xbf16>, vector<96x64xf32> -> vector<96x64xf32>
    %cst_71 = arith.constant dense<0.000000e+00> : vector<96x64xf32>
    %193 = tpu.matmul %1, %191, %cst_71 {dimension_numbers = #tpu.dot_dimension_numbers<[1], [0], [0], [1], [0, 0, 1, 1], [], []>} : vector<96x32xbf16>, vector<32x64xbf16>, vector<96x64xf32> -> vector<96x64xf32>
    %194 = arith.addf %192, %193 : vector<96x64xf32>
    %195 = vector.broadcast %10 : vector<1x64xf32> to vector<96x64xf32>
    %196 = arith.addf %194, %195 : vector<96x64xf32>
    %197 = math.tanh %196 : vector<96x64xf32>
    %198 = arith.truncf %197 : vector<96x64xf32> to vector<96x64xbf16>
    %cst_72 = arith.constant dense<0.000000e+00> : vector<96x64xf32>
    %199 = tpu.matmul %198, %4, %cst_72 {dimension_numbers = #tpu.dot_dimension_numbers<[1], [0], [0], [1], [0, 0, 1, 1], [], []>} : vector<96x64xbf16>, vector<64x64xbf16>, vector<96x64xf32> -> vector<96x64xf32>
    %200 = vector.broadcast %11 : vector<1x64xf32> to vector<96x64xf32>
    %201 = arith.addf %199, %200 : vector<96x64xf32>
    %202 = math.tanh %201 : vector<96x64xf32>
    %203 = arith.mulf %202, %17 : vector<96x64xf32>
    %204 = arith.truncf %203 : vector<96x64xf32> to vector<96x64xbf16>
    %cst_73 = arith.constant dense<0.000000e+00> : vector<32x64xf32>
    %205 = tpu.matmul %2, %204, %cst_73 {dimension_numbers = #tpu.dot_dimension_numbers<[1], [0], [0], [1], [0, 0, 1, 1], [], []>} : vector<32x96xbf16>, vector<96x64xbf16>, vector<32x64xf32> -> vector<32x64xf32>
    %206 = arith.truncf %185 : vector<32x4xf32> to vector<32x4xbf16>
    %cst_74 = arith.constant dense<0.000000e+00> : vector<32x96xf32>
    %207 = tpu.matmul %206, %6, %cst_74 {dimension_numbers = #tpu.dot_dimension_numbers<[1], [0], [0], [1], [0, 0, 1, 1], [], []>} : vector<32x4xbf16>, vector<4x96xbf16>, vector<32x96xf32> -> vector<32x96xf32>
    %208 = vector.broadcast %12 : vector<1x96xf32> to vector<32x96xf32>
    %209 = arith.addf %207, %208 : vector<32x96xf32>
    %210 = arith.truncf %205 : vector<32x64xf32> to vector<32x64xbf16>
    %cst_75 = arith.constant dense<0.000000e+00> : vector<32x96xf32>
    %211 = tpu.matmul %210, %5, %cst_75 {dimension_numbers = #tpu.dot_dimension_numbers<[1], [0], [0], [1], [0, 0, 1, 1], [], []>} : vector<32x64xbf16>, vector<64x96xbf16>, vector<32x96xf32> -> vector<32x96xf32>
    %212 = vector.extract_strided_slice %209 {offsets = [0, 0], sizes = [32, 32], strides = [1, 1]} : vector<32x96xf32> to vector<32x32xf32>
    %213 = vector.extract_strided_slice %211 {offsets = [0, 0], sizes = [32, 32], strides = [1, 1]} : vector<32x96xf32> to vector<32x32xf32>
    %214 = arith.addf %212, %213 : vector<32x32xf32>
    %215 = arith.negf %214 : vector<32x32xf32>
    %216 = math.exp %215 : vector<32x32xf32>
    %cst_76 = arith.constant 1.000000e+00 : f32
    %217 = vector.broadcast %cst_76 : f32 to vector<32x32xf32>
    %218 = arith.addf %217, %216 : vector<32x32xf32>
    %219 = arith.divf %217, %218 : vector<32x32xf32>
    %220 = vector.extract_strided_slice %209 {offsets = [0, 32], sizes = [32, 32], strides = [1, 1]} : vector<32x96xf32> to vector<32x32xf32>
    %221 = vector.extract_strided_slice %211 {offsets = [0, 32], sizes = [32, 32], strides = [1, 1]} : vector<32x96xf32> to vector<32x32xf32>
    %222 = arith.addf %220, %221 : vector<32x32xf32>
    %223 = arith.negf %222 : vector<32x32xf32>
    %224 = math.exp %223 : vector<32x32xf32>
    %cst_77 = arith.constant 1.000000e+00 : f32
    %225 = vector.broadcast %cst_77 : f32 to vector<32x32xf32>
    %226 = arith.addf %225, %224 : vector<32x32xf32>
    %227 = arith.divf %225, %226 : vector<32x32xf32>
    %228 = vector.extract_strided_slice %209 {offsets = [0, 64], sizes = [32, 32], strides = [1, 1]} : vector<32x96xf32> to vector<32x32xf32>
    %229 = vector.extract_strided_slice %211 {offsets = [0, 64], sizes = [32, 32], strides = [1, 1]} : vector<32x96xf32> to vector<32x32xf32>
    %230 = arith.mulf %219, %229 : vector<32x32xf32>
    %231 = arith.addf %228, %230 : vector<32x32xf32>
    %232 = math.tanh %231 : vector<32x32xf32>
    %cst_78 = arith.constant 1.000000e+00 : f32
    %233 = vector.broadcast %cst_78 : f32 to vector<32x32xf32>
    %234 = arith.subf %233, %227 : vector<32x32xf32>
    %235 = arith.mulf %234, %232 : vector<32x32xf32>
    %236 = arith.mulf %227, %182 : vector<32x32xf32>
    %237 = arith.addf %235, %236 : vector<32x32xf32>
    %c96_79 = arith.constant 96 : index
    %c0_80 = arith.constant 0 : index
    %238 = vector.load %arg7[%c96_79, %c0_80] : memref<224x32xf32, #tpu.memory_space<vmem>>, vector<32x32xf32>
    tpu.vector_store %arg7[%c96_79, %c0_80], %237 {strides = array<i32>} : memref<224x32xf32, #tpu.memory_space<vmem>>, vector<32x32xf32>,
    %c0_81 = arith.constant 0 : index
    %c128 = arith.constant 128 : index
    %c0_82 = arith.constant 0 : index
    %239 = vector.load %arg1[%c0_81, %c128, %c0_82] : memref<1x224x4xf32, #tpu.memory_space<vmem>>, vector<1x32x4xf32>
    %240 = vector.shape_cast %239 : vector<1x32x4xf32> to vector<32x4xf32>
    %241 = arith.truncf %237 : vector<32x32xf32> to vector<32x32xbf16>
    %cst_83 = arith.constant dense<0.000000e+00> : vector<32x128xf32>
    %242 = tpu.matmul %241, %3, %cst_83 {dimension_numbers = #tpu.dot_dimension_numbers<[1], [0], [0], [1], [0, 0, 1, 1], [], []>} : vector<32x32xbf16>, vector<32x128xbf16>, vector<32x128xf32> -> vector<32x128xf32>
    %243 = vector.extract_strided_slice %242 {offsets = [0, 0], sizes = [32, 64], strides = [1, 1]} : vector<32x128xf32> to vector<32x64xf32>
    %244 = arith.truncf %243 : vector<32x64xf32> to vector<32x64xbf16>
    %245 = vector.extract_strided_slice %242 {offsets = [0, 64], sizes = [32, 64], strides = [1, 1]} : vector<32x128xf32> to vector<32x64xf32>
    %246 = arith.truncf %245 : vector<32x64xf32> to vector<32x64xbf16>
    %cst_84 = arith.constant dense<0.000000e+00> : vector<96x64xf32>
    %247 = tpu.matmul %0, %244, %cst_84 {dimension_numbers = #tpu.dot_dimension_numbers<[1], [0], [0], [1], [0, 0, 1, 1], [], []>} : vector<96x32xbf16>, vector<32x64xbf16>, vector<96x64xf32> -> vector<96x64xf32>
    %cst_85 = arith.constant dense<0.000000e+00> : vector<96x64xf32>
    %248 = tpu.matmul %1, %246, %cst_85 {dimension_numbers = #tpu.dot_dimension_numbers<[1], [0], [0], [1], [0, 0, 1, 1], [], []>} : vector<96x32xbf16>, vector<32x64xbf16>, vector<96x64xf32> -> vector<96x64xf32>
    %249 = arith.addf %247, %248 : vector<96x64xf32>
    %250 = vector.broadcast %10 : vector<1x64xf32> to vector<96x64xf32>
    %251 = arith.addf %249, %250 : vector<96x64xf32>
    %252 = math.tanh %251 : vector<96x64xf32>
    %253 = arith.truncf %252 : vector<96x64xf32> to vector<96x64xbf16>
    %cst_86 = arith.constant dense<0.000000e+00> : vector<96x64xf32>
    %254 = tpu.matmul %253, %4, %cst_86 {dimension_numbers = #tpu.dot_dimension_numbers<[1], [0], [0], [1], [0, 0, 1, 1], [], []>} : vector<96x64xbf16>, vector<64x64xbf16>, vector<96x64xf32> -> vector<96x64xf32>
    %255 = vector.broadcast %11 : vector<1x64xf32> to vector<96x64xf32>
    %256 = arith.addf %254, %255 : vector<96x64xf32>
    %257 = math.tanh %256 : vector<96x64xf32>
    %258 = arith.mulf %257, %17 : vector<96x64xf32>
    %259 = arith.truncf %258 : vector<96x64xf32> to vector<96x64xbf16>
    %cst_87 = arith.constant dense<0.000000e+00> : vector<32x64xf32>
    %260 = tpu.matmul %2, %259, %cst_87 {dimension_numbers = #tpu.dot_dimension_numbers<[1], [0], [0], [1], [0, 0, 1, 1], [], []>} : vector<32x96xbf16>, vector<96x64xbf16>, vector<32x64xf32> -> vector<32x64xf32>
    %261 = arith.truncf %240 : vector<32x4xf32> to vector<32x4xbf16>
    %cst_88 = arith.constant dense<0.000000e+00> : vector<32x96xf32>
    %262 = tpu.matmul %261, %6, %cst_88 {dimension_numbers = #tpu.dot_dimension_numbers<[1], [0], [0], [1], [0, 0, 1, 1], [], []>} : vector<32x4xbf16>, vector<4x96xbf16>, vector<32x96xf32> -> vector<32x96xf32>
    %263 = vector.broadcast %12 : vector<1x96xf32> to vector<32x96xf32>
    %264 = arith.addf %262, %263 : vector<32x96xf32>
    %265 = arith.truncf %260 : vector<32x64xf32> to vector<32x64xbf16>
    %cst_89 = arith.constant dense<0.000000e+00> : vector<32x96xf32>
    %266 = tpu.matmul %265, %5, %cst_89 {dimension_numbers = #tpu.dot_dimension_numbers<[1], [0], [0], [1], [0, 0, 1, 1], [], []>} : vector<32x64xbf16>, vector<64x96xbf16>, vector<32x96xf32> -> vector<32x96xf32>
    %267 = vector.extract_strided_slice %264 {offsets = [0, 0], sizes = [32, 32], strides = [1, 1]} : vector<32x96xf32> to vector<32x32xf32>
    %268 = vector.extract_strided_slice %266 {offsets = [0, 0], sizes = [32, 32], strides = [1, 1]} : vector<32x96xf32> to vector<32x32xf32>
    %269 = arith.addf %267, %268 : vector<32x32xf32>
    %270 = arith.negf %269 : vector<32x32xf32>
    %271 = math.exp %270 : vector<32x32xf32>
    %cst_90 = arith.constant 1.000000e+00 : f32
    %272 = vector.broadcast %cst_90 : f32 to vector<32x32xf32>
    %273 = arith.addf %272, %271 : vector<32x32xf32>
    %274 = arith.divf %272, %273 : vector<32x32xf32>
    %275 = vector.extract_strided_slice %264 {offsets = [0, 32], sizes = [32, 32], strides = [1, 1]} : vector<32x96xf32> to vector<32x32xf32>
    %276 = vector.extract_strided_slice %266 {offsets = [0, 32], sizes = [32, 32], strides = [1, 1]} : vector<32x96xf32> to vector<32x32xf32>
    %277 = arith.addf %275, %276 : vector<32x32xf32>
    %278 = arith.negf %277 : vector<32x32xf32>
    %279 = math.exp %278 : vector<32x32xf32>
    %cst_91 = arith.constant 1.000000e+00 : f32
    %280 = vector.broadcast %cst_91 : f32 to vector<32x32xf32>
    %281 = arith.addf %280, %279 : vector<32x32xf32>
    %282 = arith.divf %280, %281 : vector<32x32xf32>
    %283 = vector.extract_strided_slice %264 {offsets = [0, 64], sizes = [32, 32], strides = [1, 1]} : vector<32x96xf32> to vector<32x32xf32>
    %284 = vector.extract_strided_slice %266 {offsets = [0, 64], sizes = [32, 32], strides = [1, 1]} : vector<32x96xf32> to vector<32x32xf32>
    %285 = arith.mulf %274, %284 : vector<32x32xf32>
    %286 = arith.addf %283, %285 : vector<32x32xf32>
    %287 = math.tanh %286 : vector<32x32xf32>
    %cst_92 = arith.constant 1.000000e+00 : f32
    %288 = vector.broadcast %cst_92 : f32 to vector<32x32xf32>
    %289 = arith.subf %288, %282 : vector<32x32xf32>
    %290 = arith.mulf %289, %287 : vector<32x32xf32>
    %291 = arith.mulf %282, %237 : vector<32x32xf32>
    %292 = arith.addf %290, %291 : vector<32x32xf32>
    %c128_93 = arith.constant 128 : index
    %c0_94 = arith.constant 0 : index
    %293 = vector.load %arg7[%c128_93, %c0_94] : memref<224x32xf32, #tpu.memory_space<vmem>>, vector<32x32xf32>
    tpu.vector_store %arg7[%c128_93, %c0_94], %292 {strides = array<i32>} : memref<224x32xf32, #tpu.memory_space<vmem>>, vector<32x32xf32>,
    %c0_95 = arith.constant 0 : index
    %c160_96 = arith.constant 160 : index
    %c0_97 = arith.constant 0 : index
    %294 = vector.load %arg1[%c0_95, %c160_96, %c0_97] : memref<1x224x4xf32, #tpu.memory_space<vmem>>, vector<1x32x4xf32>
    %295 = vector.shape_cast %294 : vector<1x32x4xf32> to vector<32x4xf32>
    %296 = arith.truncf %292 : vector<32x32xf32> to vector<32x32xbf16>
    %cst_98 = arith.constant dense<0.000000e+00> : vector<32x128xf32>
    %297 = tpu.matmul %296, %3, %cst_98 {dimension_numbers = #tpu.dot_dimension_numbers<[1], [0], [0], [1], [0, 0, 1, 1], [], []>} : vector<32x32xbf16>, vector<32x128xbf16>, vector<32x128xf32> -> vector<32x128xf32>
    %298 = vector.extract_strided_slice %297 {offsets = [0, 0], sizes = [32, 64], strides = [1, 1]} : vector<32x128xf32> to vector<32x64xf32>
    %299 = arith.truncf %298 : vector<32x64xf32> to vector<32x64xbf16>
    %300 = vector.extract_strided_slice %297 {offsets = [0, 64], sizes = [32, 64], strides = [1, 1]} : vector<32x128xf32> to vector<32x64xf32>
    %301 = arith.truncf %300 : vector<32x64xf32> to vector<32x64xbf16>
    %cst_99 = arith.constant dense<0.000000e+00> : vector<96x64xf32>
    %302 = tpu.matmul %0, %299, %cst_99 {dimension_numbers = #tpu.dot_dimension_numbers<[1], [0], [0], [1], [0, 0, 1, 1], [], []>} : vector<96x32xbf16>, vector<32x64xbf16>, vector<96x64xf32> -> vector<96x64xf32>
    %cst_100 = arith.constant dense<0.000000e+00> : vector<96x64xf32>
    %303 = tpu.matmul %1, %301, %cst_100 {dimension_numbers = #tpu.dot_dimension_numbers<[1], [0], [0], [1], [0, 0, 1, 1], [], []>} : vector<96x32xbf16>, vector<32x64xbf16>, vector<96x64xf32> -> vector<96x64xf32>
    %304 = arith.addf %302, %303 : vector<96x64xf32>
    %305 = vector.broadcast %10 : vector<1x64xf32> to vector<96x64xf32>
    %306 = arith.addf %304, %305 : vector<96x64xf32>
    %307 = math.tanh %306 : vector<96x64xf32>
    %308 = arith.truncf %307 : vector<96x64xf32> to vector<96x64xbf16>
    %cst_101 = arith.constant dense<0.000000e+00> : vector<96x64xf32>
    %309 = tpu.matmul %308, %4, %cst_101 {dimension_numbers = #tpu.dot_dimension_numbers<[1], [0], [0], [1], [0, 0, 1, 1], [], []>} : vector<96x64xbf16>, vector<64x64xbf16>, vector<96x64xf32> -> vector<96x64xf32>
    %310 = vector.broadcast %11 : vector<1x64xf32> to vector<96x64xf32>
    %311 = arith.addf %309, %310 : vector<96x64xf32>
    %312 = math.tanh %311 : vector<96x64xf32>
    %313 = arith.mulf %312, %17 : vector<96x64xf32>
    %314 = arith.truncf %313 : vector<96x64xf32> to vector<96x64xbf16>
    %cst_102 = arith.constant dense<0.000000e+00> : vector<32x64xf32>
    %315 = tpu.matmul %2, %314, %cst_102 {dimension_numbers = #tpu.dot_dimension_numbers<[1], [0], [0], [1], [0, 0, 1, 1], [], []>} : vector<32x96xbf16>, vector<96x64xbf16>, vector<32x64xf32> -> vector<32x64xf32>
    %316 = arith.truncf %295 : vector<32x4xf32> to vector<32x4xbf16>
    %cst_103 = arith.constant dense<0.000000e+00> : vector<32x96xf32>
    %317 = tpu.matmul %316, %6, %cst_103 {dimension_numbers = #tpu.dot_dimension_numbers<[1], [0], [0], [1], [0, 0, 1, 1], [], []>} : vector<32x4xbf16>, vector<4x96xbf16>, vector<32x96xf32> -> vector<32x96xf32>
    %318 = vector.broadcast %12 : vector<1x96xf32> to vector<32x96xf32>
    %319 = arith.addf %317, %318 : vector<32x96xf32>
    %320 = arith.truncf %315 : vector<32x64xf32> to vector<32x64xbf16>
    %cst_104 = arith.constant dense<0.000000e+00> : vector<32x96xf32>
    %321 = tpu.matmul %320, %5, %cst_104 {dimension_numbers = #tpu.dot_dimension_numbers<[1], [0], [0], [1], [0, 0, 1, 1], [], []>} : vector<32x64xbf16>, vector<64x96xbf16>, vector<32x96xf32> -> vector<32x96xf32>
    %322 = vector.extract_strided_slice %319 {offsets = [0, 0], sizes = [32, 32], strides = [1, 1]} : vector<32x96xf32> to vector<32x32xf32>
    %323 = vector.extract_strided_slice %321 {offsets = [0, 0], sizes = [32, 32], strides = [1, 1]} : vector<32x96xf32> to vector<32x32xf32>
    %324 = arith.addf %322, %323 : vector<32x32xf32>
    %325 = arith.negf %324 : vector<32x32xf32>
    %326 = math.exp %325 : vector<32x32xf32>
    %cst_105 = arith.constant 1.000000e+00 : f32
    %327 = vector.broadcast %cst_105 : f32 to vector<32x32xf32>
    %328 = arith.addf %327, %326 : vector<32x32xf32>
    %329 = arith.divf %327, %328 : vector<32x32xf32>
    %330 = vector.extract_strided_slice %319 {offsets = [0, 32], sizes = [32, 32], strides = [1, 1]} : vector<32x96xf32> to vector<32x32xf32>
    %331 = vector.extract_strided_slice %321 {offsets = [0, 32], sizes = [32, 32], strides = [1, 1]} : vector<32x96xf32> to vector<32x32xf32>
    %332 = arith.addf %330, %331 : vector<32x32xf32>
    %333 = arith.negf %332 : vector<32x32xf32>
    %334 = math.exp %333 : vector<32x32xf32>
    %cst_106 = arith.constant 1.000000e+00 : f32
    %335 = vector.broadcast %cst_106 : f32 to vector<32x32xf32>
    %336 = arith.addf %335, %334 : vector<32x32xf32>
    %337 = arith.divf %335, %336 : vector<32x32xf32>
    %338 = vector.extract_strided_slice %319 {offsets = [0, 64], sizes = [32, 32], strides = [1, 1]} : vector<32x96xf32> to vector<32x32xf32>
    %339 = vector.extract_strided_slice %321 {offsets = [0, 64], sizes = [32, 32], strides = [1, 1]} : vector<32x96xf32> to vector<32x32xf32>
    %340 = arith.mulf %329, %339 : vector<32x32xf32>
    %341 = arith.addf %338, %340 : vector<32x32xf32>
    %342 = math.tanh %341 : vector<32x32xf32>
    %cst_107 = arith.constant 1.000000e+00 : f32
    %343 = vector.broadcast %cst_107 : f32 to vector<32x32xf32>
    %344 = arith.subf %343, %337 : vector<32x32xf32>
    %345 = arith.mulf %344, %342 : vector<32x32xf32>
    %346 = arith.mulf %337, %292 : vector<32x32xf32>
    %347 = arith.addf %345, %346 : vector<32x32xf32>
    %c160_108 = arith.constant 160 : index
    %c0_109 = arith.constant 0 : index
    %348 = vector.load %arg7[%c160_108, %c0_109] : memref<224x32xf32, #tpu.memory_space<vmem>>, vector<32x32xf32>
    tpu.vector_store %arg7[%c160_108, %c0_109], %347 {strides = array<i32>} : memref<224x32xf32, #tpu.memory_space<vmem>>, vector<32x32xf32>,
    %c0_110 = arith.constant 0 : index
    %c192_111 = arith.constant 192 : index
    %c0_112 = arith.constant 0 : index
    %349 = vector.load %arg1[%c0_110, %c192_111, %c0_112] : memref<1x224x4xf32, #tpu.memory_space<vmem>>, vector<1x32x4xf32>
    %350 = vector.shape_cast %349 : vector<1x32x4xf32> to vector<32x4xf32>
    %351 = arith.truncf %347 : vector<32x32xf32> to vector<32x32xbf16>
    %cst_113 = arith.constant dense<0.000000e+00> : vector<32x128xf32>
    %352 = tpu.matmul %351, %3, %cst_113 {dimension_numbers = #tpu.dot_dimension_numbers<[1], [0], [0], [1], [0, 0, 1, 1], [], []>} : vector<32x32xbf16>, vector<32x128xbf16>, vector<32x128xf32> -> vector<32x128xf32>
    %353 = vector.extract_strided_slice %352 {offsets = [0, 0], sizes = [32, 64], strides = [1, 1]} : vector<32x128xf32> to vector<32x64xf32>
    %354 = arith.truncf %353 : vector<32x64xf32> to vector<32x64xbf16>
    %355 = vector.extract_strided_slice %352 {offsets = [0, 64], sizes = [32, 64], strides = [1, 1]} : vector<32x128xf32> to vector<32x64xf32>
    %356 = arith.truncf %355 : vector<32x64xf32> to vector<32x64xbf16>
    %cst_114 = arith.constant dense<0.000000e+00> : vector<96x64xf32>
    %357 = tpu.matmul %0, %354, %cst_114 {dimension_numbers = #tpu.dot_dimension_numbers<[1], [0], [0], [1], [0, 0, 1, 1], [], []>} : vector<96x32xbf16>, vector<32x64xbf16>, vector<96x64xf32> -> vector<96x64xf32>
    %cst_115 = arith.constant dense<0.000000e+00> : vector<96x64xf32>
    %358 = tpu.matmul %1, %356, %cst_115 {dimension_numbers = #tpu.dot_dimension_numbers<[1], [0], [0], [1], [0, 0, 1, 1], [], []>} : vector<96x32xbf16>, vector<32x64xbf16>, vector<96x64xf32> -> vector<96x64xf32>
    %359 = arith.addf %357, %358 : vector<96x64xf32>
    %360 = vector.broadcast %10 : vector<1x64xf32> to vector<96x64xf32>
    %361 = arith.addf %359, %360 : vector<96x64xf32>
    %362 = math.tanh %361 : vector<96x64xf32>
    %363 = arith.truncf %362 : vector<96x64xf32> to vector<96x64xbf16>
    %cst_116 = arith.constant dense<0.000000e+00> : vector<96x64xf32>
    %364 = tpu.matmul %363, %4, %cst_116 {dimension_numbers = #tpu.dot_dimension_numbers<[1], [0], [0], [1], [0, 0, 1, 1], [], []>} : vector<96x64xbf16>, vector<64x64xbf16>, vector<96x64xf32> -> vector<96x64xf32>
    %365 = vector.broadcast %11 : vector<1x64xf32> to vector<96x64xf32>
    %366 = arith.addf %364, %365 : vector<96x64xf32>
    %367 = math.tanh %366 : vector<96x64xf32>
    %368 = arith.mulf %367, %17 : vector<96x64xf32>
    %369 = arith.truncf %368 : vector<96x64xf32> to vector<96x64xbf16>
    %cst_117 = arith.constant dense<0.000000e+00> : vector<32x64xf32>
    %370 = tpu.matmul %2, %369, %cst_117 {dimension_numbers = #tpu.dot_dimension_numbers<[1], [0], [0], [1], [0, 0, 1, 1], [], []>} : vector<32x96xbf16>, vector<96x64xbf16>, vector<32x64xf32> -> vector<32x64xf32>
    %371 = arith.truncf %350 : vector<32x4xf32> to vector<32x4xbf16>
    %cst_118 = arith.constant dense<0.000000e+00> : vector<32x96xf32>
    %372 = tpu.matmul %371, %6, %cst_118 {dimension_numbers = #tpu.dot_dimension_numbers<[1], [0], [0], [1], [0, 0, 1, 1], [], []>} : vector<32x4xbf16>, vector<4x96xbf16>, vector<32x96xf32> -> vector<32x96xf32>
    %373 = vector.broadcast %12 : vector<1x96xf32> to vector<32x96xf32>
    %374 = arith.addf %372, %373 : vector<32x96xf32>
    %375 = arith.truncf %370 : vector<32x64xf32> to vector<32x64xbf16>
    %cst_119 = arith.constant dense<0.000000e+00> : vector<32x96xf32>
    %376 = tpu.matmul %375, %5, %cst_119 {dimension_numbers = #tpu.dot_dimension_numbers<[1], [0], [0], [1], [0, 0, 1, 1], [], []>} : vector<32x64xbf16>, vector<64x96xbf16>, vector<32x96xf32> -> vector<32x96xf32>
    %377 = vector.extract_strided_slice %374 {offsets = [0, 0], sizes = [32, 32], strides = [1, 1]} : vector<32x96xf32> to vector<32x32xf32>
    %378 = vector.extract_strided_slice %376 {offsets = [0, 0], sizes = [32, 32], strides = [1, 1]} : vector<32x96xf32> to vector<32x32xf32>
    %379 = arith.addf %377, %378 : vector<32x32xf32>
    %380 = arith.negf %379 : vector<32x32xf32>
    %381 = math.exp %380 : vector<32x32xf32>
    %cst_120 = arith.constant 1.000000e+00 : f32
    %382 = vector.broadcast %cst_120 : f32 to vector<32x32xf32>
    %383 = arith.addf %382, %381 : vector<32x32xf32>
    %384 = arith.divf %382, %383 : vector<32x32xf32>
    %385 = vector.extract_strided_slice %374 {offsets = [0, 32], sizes = [32, 32], strides = [1, 1]} : vector<32x96xf32> to vector<32x32xf32>
    %386 = vector.extract_strided_slice %376 {offsets = [0, 32], sizes = [32, 32], strides = [1, 1]} : vector<32x96xf32> to vector<32x32xf32>
    %387 = arith.addf %385, %386 : vector<32x32xf32>
    %388 = arith.negf %387 : vector<32x32xf32>
    %389 = math.exp %388 : vector<32x32xf32>
    %cst_121 = arith.constant 1.000000e+00 : f32
    %390 = vector.broadcast %cst_121 : f32 to vector<32x32xf32>
    %391 = arith.addf %390, %389 : vector<32x32xf32>
    %392 = arith.divf %390, %391 : vector<32x32xf32>
    %393 = vector.extract_strided_slice %374 {offsets = [0, 64], sizes = [32, 32], strides = [1, 1]} : vector<32x96xf32> to vector<32x32xf32>
    %394 = vector.extract_strided_slice %376 {offsets = [0, 64], sizes = [32, 32], strides = [1, 1]} : vector<32x96xf32> to vector<32x32xf32>
    %395 = arith.mulf %384, %394 : vector<32x32xf32>
    %396 = arith.addf %393, %395 : vector<32x32xf32>
    %397 = math.tanh %396 : vector<32x32xf32>
    %cst_122 = arith.constant 1.000000e+00 : f32
    %398 = vector.broadcast %cst_122 : f32 to vector<32x32xf32>
    %399 = arith.subf %398, %392 : vector<32x32xf32>
    %400 = arith.mulf %399, %397 : vector<32x32xf32>
    %401 = arith.mulf %392, %347 : vector<32x32xf32>
    %402 = arith.addf %400, %401 : vector<32x32xf32>
    %c192_123 = arith.constant 192 : index
    %c0_124 = arith.constant 0 : index
    %403 = vector.load %arg7[%c192_123, %c0_124] : memref<224x32xf32, #tpu.memory_space<vmem>>, vector<32x32xf32>
    tpu.vector_store %arg7[%c192_123, %c0_124], %402 {strides = array<i32>} : memref<224x32xf32, #tpu.memory_space<vmem>>, vector<32x32xf32>,
    %c0_125 = arith.constant 0 : index
    %c0_126 = arith.constant 0 : index
    %404 = vector.load %arg7[%c0_125, %c0_126] : memref<224x32xf32, #tpu.memory_space<vmem>>, vector<224x32xf32>
    %405 = arith.truncf %404 : vector<224x32xf32> to vector<224x32xbf16>
    %cst_127 = arith.constant dense<0.000000e+00> : vector<224x32xf32>
    %406 = tpu.matmul %405, %7, %cst_127 {dimension_numbers = #tpu.dot_dimension_numbers<[1], [0], [0], [1], [0, 0, 1, 1], [], []>} : vector<224x32xbf16>, vector<32x32xbf16>, vector<224x32xf32> -> vector<224x32xf32>
    %407 = vector.broadcast %13 : vector<1x32xf32> to vector<224x32xf32>
    %408 = arith.addf %406, %407 : vector<224x32xf32>
    %cst_128 = arith.constant 0.000000e+00 : f32
    %409 = vector.broadcast %cst_128 : f32 to vector<224x32xf32>
    %410 = arith.maximumf %408, %409 : vector<224x32xf32>
    %411 = arith.truncf %410 : vector<224x32xf32> to vector<224x32xbf16>
    %cst_129 = arith.constant dense<0.000000e+00> : vector<224x32xf32>
    %412 = tpu.matmul %411, %8, %cst_129 {dimension_numbers = #tpu.dot_dimension_numbers<[1], [0], [0], [1], [0, 0, 1, 1], [], []>} : vector<224x32xbf16>, vector<32x32xbf16>, vector<224x32xf32> -> vector<224x32xf32>
    %413 = vector.broadcast %14 : vector<1x32xf32> to vector<224x32xf32>
    %414 = arith.addf %412, %413 : vector<224x32xf32>
    %cst_130 = arith.constant 0.000000e+00 : f32
    %415 = vector.broadcast %cst_130 : f32 to vector<224x32xf32>
    %416 = arith.maximumf %414, %415 : vector<224x32xf32>
    %417 = arith.truncf %416 : vector<224x32xf32> to vector<224x32xbf16>
    %cst_131 = arith.constant dense<0.000000e+00> : vector<224x4xf32>
    %418 = tpu.matmul %417, %9, %cst_131 {dimension_numbers = #tpu.dot_dimension_numbers<[1], [0], [0], [1], [0, 0, 1, 1], [], []>} : vector<224x32xbf16>, vector<32x4xbf16>, vector<224x4xf32> -> vector<224x4xf32>
    %419 = vector.broadcast %15 : vector<1x4xf32> to vector<224x4xf32>
    %420 = arith.addf %418, %419 : vector<224x4xf32>
    %c0_132 = arith.constant 0 : index
    %c0_133 = arith.constant 0 : index
    %c0_134 = arith.constant 0 : index
    %421 = vector.load %arg1[%c0_132, %c0_133, %c0_134] : memref<1x224x4xf32, #tpu.memory_space<vmem>>, vector<1x224x4xf32>
    %422 = vector.shape_cast %421 : vector<1x224x4xf32> to vector<224x4xf32>
    %423 = arith.addf %422, %420 : vector<224x4xf32>
    %c0_135 = arith.constant 0 : index
    %c0_136 = arith.constant 0 : index
    %c0_137 = arith.constant 0 : index
    %424 = vector.load %arg6[%c0_135, %c0_136, %c0_137] : memref<1x224x4xf32, #tpu.memory_space<vmem>>, vector<1x224x4xf32>
    %425 = vector.shape_cast %424 : vector<1x224x4xf32> to vector<224x4xf32>
    %426 = vector.shape_cast %423 : vector<224x4xf32> to vector<1x224x4xf32>
    tpu.vector_store %arg6[%c0_135, %c0_136, %c0_137], %426 {strides = array<i32>} : memref<1x224x4xf32, #tpu.memory_space<vmem>>, vector<1x224x4xf32>,
    return
  }
  func.func @transform_0(%arg0: i32) -> (i32, i32, i32) {
    %c0_i32 = arith.constant 0 : i32
    %c0_i32_0 = arith.constant 0 : i32
    %c0_i32_1 = arith.constant 0 : i32
    return %arg0, %c0_i32, %c0_i32_0 : i32, i32, i32
  }
  func.func @transform_1(%arg0: i32) -> (i32, i32, i32) {
    %c0_i32 = arith.constant 0 : i32
    %c0_i32_0 = arith.constant 0 : i32
    %c0_i32_1 = arith.constant 0 : i32
    return %arg0, %c0_i32, %c0_i32_0 : i32, i32, i32
  }
  func.func @transform_2(%arg0: i32) -> (i32, i32) {
    %c0_i32 = arith.constant 0 : i32
    %c0_i32_0 = arith.constant 0 : i32
    %c0_i32_1 = arith.constant 0 : i32
    return %c0_i32, %c0_i32_0 : i32, i32
  }
  func.func @transform_3(%arg0: i32) -> (i32, i32) {
    %c0_i32 = arith.constant 0 : i32
    %c0_i32_0 = arith.constant 0 : i32
    %c0_i32_1 = arith.constant 0 : i32
    return %c0_i32, %c0_i32_0 : i32, i32
  }
  func.func @transform_4(%arg0: i32) -> (i32, i32) {
    %c0_i32 = arith.constant 0 : i32
    %c0_i32_0 = arith.constant 0 : i32
    %c0_i32_1 = arith.constant 0 : i32
    return %c0_i32, %c0_i32_0 : i32, i32
  }
  func.func @transform_5(%arg0: i32) -> (i32, i32, i32) {
    %c0_i32 = arith.constant 0 : i32
    %c0_i32_0 = arith.constant 0 : i32
    %c0_i32_1 = arith.constant 0 : i32
    return %arg0, %c0_i32, %c0_i32_0 : i32, i32, i32
  }
}

</mosaic_0001>

<bundles_post_ra>
// kernel: tpu_custom_call.1
= control target key start
LH: loop header
LB: loop body
LE: loop exit
PB: predicated region body
PF: predicated region fallthrough
CT: control target
= control target key end

     0   :  { %s8416_s18 = smov 0   ;;  %s10306_s0 = inlined_call_operand.vmem [shape: f32[2,224,4], index: 0, kind: input, shape index: {}]   ;;  %s10307_s1 = inlined_call_operand.vmem [shape: f32[2,96,64], index: 1, kind: input, shape index: {}]   ;;  %s10308_s2 = inlined_call_operand.vmem [shape: bf16[224,128], index: 2, kind: input, shape index: {}]   ;;  %s10309_s3 = inlined_call_operand.vmem [shape: bf16[272,128], index: 3, kind: input, shape index: {}]   ;;  %s10310_s4 = inlined_call_operand.vmem [shape: f32[8,128], index: 4, kind: input, shape index: {}]   ;;  %s10311_s5 = inlined_call_operand.vmem [shape: f32[2,224,4], index: 5, kind: output, shape index: {}]  }
   0x1 LB: > { %s6187_s19 = sadd.s32 4294967295, %s8381_s18   ;;  %p6191_p0 = scmp.ge.s32.totalorder %s8381_s18, 1  ;;  %s8381_s18 = sphi %s8416_s18, %s15_s18  }
   0x2   : > { %p197_p1 = scmp.lt.s32.totalorder %s8381_s18, 3 }
   0x4   : > { %p198_p2 = pnand %p6191_p0, %p197_p1 }
   0x6   : > { %201 = sbr.rel (%p198_p2) target bundleno = 13079 (0x3317), region = 40 }
   0xd   : > { %v8427_v0 = vld [vmem:[%s10309_s3] sm:$0xff]   ;;  %v8432_v1 = vld [vmem:[%s10309_s3 + $0x8] sm:$0xff]   ;;  %v8383_v2 = vmov 0   ;;  %v8441_v3 = vld [vmem:[%s10308_s2 + $0x30] sm:$0xff]   ;;  %vm341_vm0 = vcmask 261120   ;;  %s8384_s26 = smov 64  }
   0xe   : > { %6864 = vmatprep.mubr.bf16.mxu0 %v8383_v2  ;;  %6860 = vmatprep.subr.bf16.mxu0 %v8427_v0  ;;  %v8450_v12 = vld [vmem:[%s10308_s2 + $0x38] sm:$0xff]   ;;  %v8455_v13 = vld [vmem:[%s10308_s2 + $0x40] sm:$0xff]   ;;  %v8464_v14 = vld [vmem:[%s10308_s2 + $0x48] sm:$0xff]   ;;  %vm724_vm1 = vcmask 523264   ;;  %vm864_vm2 = vcmask 785408   ;;  %p230_p3 = scmp.lt.s32.totalorder %s6187_s19, 1 }
   0xf   : > { %6861 = vmatpush3.bf16.msra.mxu0 %v8427_v0  ;;  %6872 = vmatprep.mubr.msk.bf16.mxu1 %vm341_vm0, %v8441_v3  ;;  %v8469_v15 = vld [vmem:[%s10308_s2 + $0x50] sm:$0xff]   ;;  %v8478_v16 = vld [vmem:[%s10308_s2 + $0x58] sm:$0xff]   ;;  %v8483_v17 = vld [vmem:[%s10308_s2] sm:$0xff]   ;;  %vm933_vm3 = vcmask 1041408   ;;  %vm926_vm4 = vcmask 31744   ;;  %s8385_s16 = smov 96  }
  0x10   : > { %6862 = vmatprep.subr.bf16.mxu0 %v8432_v1  ;;  %v8492_v18 = vld [vmem:[%s10308_s2 + $0x8] sm:$0xff]   ;;  %v8497_v19 = vld [vmem:[%s10308_s2 + $0x10] sm:$0xff]   ;;  %v8506_v20 = vld [vmem:[%s10308_s2 + $0x18] sm:$0xff]   ;;  %s10349_s19 = smov (!%p230_p3, %s6187_s19), 1 }
  0x11   : > { %v8511_v21 = vld [vmem:[%s10308_s2 + $0x20] sm:$0xff]   ;;  %v8520_v22 = vld [vmem:[%s10308_s2 + $0x28] sm:$0xff]   ;;  %v8527_v23 = vld [vmem:[%s10309_s3 + $0x10] sm:$0xff]   ;;  %s7710_s24 = smul.u32 96, %s10349_s19 }
  0x12   : > { %v8534_v24 = vld [vmem:[%s10309_s3 + $0x18] sm:$0xff]   ;;  %v8541_v25 = vld [vmem:[%s10309_s3 + $0x20] sm:$0xff]   ;;  %v8548_v26 = vld [vmem:[%s10309_s3 + $0x28] sm:$0xff]   ;;  %s7709_s6 = smul.u32 224, %s10349_s19 }
  0x13   : > { %6863 = vmatpush3.bf16.msra.mxu0 %v8432_v1  ;;  %v8555_v27 = vld [vmem:[%s10310_s4] ss:$0 sm:$0xff]  ;;  %s8624_s28 = scalar_lea.vmem %s10307_s1, %s7710_s24 }
  0x14   : > { %6900 = vmatprep.subr.bf16.mxu0 %v8527_v23  ;;  %s8693_s9 = scalar_lea.vmem %s10306_s0, %s7709_s6  ;;  %s10192_s21 = scalar_lea.vmem %s10311_s5, %s7709_s6 }
  0x16   : > { %6865 = vmatmul.mubr.bf16.vlgmr.msra.gmra.mrb[0].mxu0 %v8383_v2 }
  0x17   : > { %6901 = vmatpush3.bf16.msra.mxu0 %v8527_v23 }
  0x18   : > { %6902 = vmatprep.subr.bf16.mxu0 %v8534_v24 }
  0x1b   : > { %6903 = vmatpush3.bf16.msra.mxu0 %v8534_v24 }
  0x1c   : > { %6904 = vmatprep.subr.bf16.mxu0 %v8541_v25 }
  0x1f   : > { %6905 = vmatpush3.bf16.msra.mxu0 %v8541_v25 }
  0x20   : > { %6906 = vmatprep.subr.bf16.mxu0 %v8548_v26 }
  0x23   : > { %6907 = vmatpush3.bf16.msra.mxu0 %v8548_v26 }
  0xe9   : > { %v6866_v4 = vpop.f32.mrb[0].mxu0 }
  0xea   : > { %v379_v5 = vpop.f32.mrb[1].mxu0 }
  0xeb   : > { %v6867_v6 = vpop.f32.mrb[2].mxu0 }
  0xec   : > { %v395_v7 = vpack.c.bf16 %v6867_v6, %v6866_v4  ;;  %v382_v8 = vpop.f32.mrb[3].mxu0 }
  0xed   : > { %v394_v9 = vpack.c.bf16 %v382_v8, %v379_v5 }
  0xef   : > { %428 = vrot.lane.b32.xlu0 %v394_v9, %s8384_s26 }
  0xf3   : > { %430 = vrot.lane.b32.xlu0 %v395_v7, %s8384_s26 }
 0x161   : > { %v429_v10 = vpop.permute.xlu0 %428 }
 0x162   : > { %6868 = vmatprep.subr.bf16.mxu1 %v429_v10 }
 0x163   : > { %6869 = vmatpush3.bf16.msra.mxu1 %v429_v10  ;;  %v8585_v10 = vld [vmem:[%s10309_s3 + $0x30] sm:$0xff]  }
 0x165   : > { %v431_v11 = vpop.permute.xlu0 %430 }
 0x166   : > { %6870 = vmatprep.subr.bf16.mxu1 %v431_v11 }
 0x167   : > { %6871 = vmatpush3.bf16.msra.mxu1 %v431_v11  ;;  %v8590_v11 = vld [vmem:[%s10309_s3 + $0x38] sm:$0xff]  }
 0x168   : > { %6884 = vmatprep.subr.bf16.mxu1 %v394_v9 }
 0x16a   : > { %6873 = vmatmul.mubr.msk.bf16.vlgmr.msra.gmra.mrb[0].mxu1 %vm341_vm0, %v8450_v12 }
 0x16b   : > { %6885 = vmatpush3.bf16.msra.mxu1 %v394_v9  ;;  %6876 = vmatprep.mubr.msk.bf16.mxu1 %vm341_vm0, %v8455_v13  ;;  %v8578_v9 = vld [vmem:[%s10308_s2 + $0x60] sm:$0xff]  }
 0x16c   : > { %6886 = vmatprep.subr.bf16.mxu1 %v395_v7 }
 0x16f   : > { %6887 = vmatpush3.bf16.msra.mxu1 %v395_v7 }
 0x170   : > { %6942 = vmatprep.subr.bf16.mxu1 %v8585_v10 }
 0x172   : > { %6877 = vmatmul.mubr.msk.bf16.gmra.mrb[4].mxu1 %vm341_vm0, %v8464_v14 }
 0x173   : > { %6880 = vmatprep.mubr.msk.bf16.mxu1 %vm341_vm0, %v8469_v15 }
 0x17a   : > { %6881 = vmatmul.mubr.msk.bf16.gmra.mrb[8].mxu1 %vm341_vm0, %v8478_v16 }
 0x17b   : > { %6888 = vmatprep.mubr.msk.bf16.mxu1 %vm341_vm0, %v8483_v17 }
 0x182   : > { %6889 = vmatmul.mubr.msk.bf16.vlgmr.msra.gmra.mrb[0].mxu1 %vm341_vm0, %v8492_v18 }
 0x183   : > { %6892 = vmatprep.mubr.msk.bf16.mxu1 %vm341_vm0, %v8497_v19  ;;  %6943 = vmatpush3.bf16.msra.mxu1 %v8585_v10 }
 0x184   : > { %6944 = vmatprep.subr.bf16.mxu1 %v8590_v11 }
 0x187   : > { %6945 = vmatpush3.bf16.msra.mxu1 %v8590_v11 }
 0x18a   : > { %6893 = vmatmul.mubr.msk.bf16.gmra.mrb[4].mxu1 %vm341_vm0, %v8506_v20 }
 0x18b   : > { %6896 = vmatprep.mubr.msk.bf16.mxu1 %vm341_vm0, %v8511_v21 }
 0x192   : > { %6897 = vmatmul.mubr.msk.bf16.gmra.mrb[8].mxu1 %vm341_vm0, %v8520_v22 }
 0x255   : > { %v6890_v28 = vpop.f32.mrb[0].mxu1 }
 0x256   : > { %v668_v29 = vadd.f32 %v6890_v28, %v8555_v27  ;;  %v615_v30 = vpop.f32.mrb[1].mxu1  ;;  %v8598_v28 = vld [vmem:[%s10309_s3 + $0x40] sm:$0xff]  }
 0x257   : > { %v666_v31 = vadd.f32 %v8555_v27, %v615_v30  ;;  %v6891_v32 = vpop.f32.mrb[2].mxu1  ;;  %6946 = vmatprep.subr.bf16.mxu1 %v8598_v28 }
 0x258   : > { %7752 = vtanh.f32 %v668_v29  ;;  %v669_v33 = vadd.f32 %v6891_v32, %v8555_v27  ;;  %v618_v34 = vpop.f32.mrb[3].mxu1  ;;  %6947 = vmatpush3.bf16.msra.mxu1 %v8598_v28  ;;  %v8606_v29 = vld [vmem:[%s10310_s4 + $0x1] ss:$0 sm:$0xff] }
 0x259   : > { %7754 = vtanh.f32 %v666_v31  ;;  %v667_v35 = vadd.f32 %v8555_v27, %v618_v34 }
 0x25a   : > { %7756 = vtanh.f32 %v669_v33 }
 0x25b   : > { %7758 = vtanh.f32 %v667_v35 }
 0x25d   : > { %v6894_v36 = vpop.f32.mrb[4].mxu1 }
 0x25e   : > { %v672_v37 = vadd.f32 %v6894_v36, %v8555_v27  ;;  %v631_v38 = vpop.f32.mrb[5].mxu1 }
 0x25f   : > { %v670_v39 = vadd.f32 %v8555_v27, %v631_v38  ;;  %v6895_v40 = vpop.f32.mrb[6].mxu1 }
 0x260   : > { %7760 = vtanh.f32 %v672_v37  ;;  %v673_v41 = vadd.f32 %v6895_v40, %v8555_v27  ;;  %v634_v42 = vpop.f32.mrb[7].mxu1 }
 0x261   : > { %7762 = vtanh.f32 %v670_v39  ;;  %v671_v43 = vadd.f32 %v8555_v27, %v634_v42 }
 0x262   : > { %v7753_v44 = vpop.eup %7752  ;;  %7764 = vtanh.f32 %v673_v41 }
 0x263   : > { %v7755_v45 = vpop.eup %7754  ;;  %7766 = vtanh.f32 %v671_v43 }
 0x264   : > { %v7757_v46 = vpop.eup %7756 }
 0x265   : > { %v7759_v47 = vpop.eup %7758  ;;  %v6898_v48 = vpop.f32.mrb[8].mxu1  ;;  %v691_v49 = vpack.c.bf16 %v7757_v46, %v7753_v44 }
 0x266   : > { %v676_v50 = vadd.f32 %v6898_v48, %v8555_v27  ;;  %v647_v51 = vpop.f32.mrb[9].mxu1  ;;  %v690_v52 = vpack.c.bf16 %v7759_v47, %v7755_v45  ;;  %v8629_v47 = vld [vmem:[%s8624_s28 + $0x10] sm:$0xff]  ;;  %v8632_v48 = vld [vmem:[%s8624_s28 + $0x18] sm:$0xff] }
 0x267   : > { %v674_v53 = vadd.f32 %v8555_v27, %v647_v51  ;;  %v6899_v54 = vpop.f32.mrb[10].mxu1  ;;  %v8638_v51 = vld [vmem:[%s8624_s28 + $0x8] sm:$0xff] }
 0x268   : > { %7768 = vtanh.f32 %v676_v50  ;;  %v677_v55 = vadd.f32 %v6899_v54, %v8555_v27  ;;  %v650_v56 = vpop.f32.mrb[11].mxu1  ;;  %6908 = vmatprep.mubr.msk.bf16.mxu0 %vm724_vm1, %v690_v52  ;;  %v8635_v50 = vld [vmem:[%s8624_s28] sm:$0xff] }
 0x269   : > { %7770 = vtanh.f32 %v674_v53  ;;  %v675_v57 = vadd.f32 %v8555_v27, %v650_v56  ;;  %6909 = vmatmul.mubr.msk.bf16.vlgmr.msra.gmra.mrb[4].mxu0 %vm724_vm1, %v691_v49 }
 0x26a   : > { %v7761_v58 = vpop.eup %7760  ;;  %7772 = vtanh.f32 %v677_v55 }
 0x26b   : > { %v7763_v59 = vpop.eup %7762  ;;  %7774 = vtanh.f32 %v675_v57 }
 0x26c   : > { %v7765_v60 = vpop.eup %7764 }
 0x26d   : > { %v7767_v61 = vpop.eup %7766  ;;  %v693_v62 = vpack.c.bf16 %v7765_v60, %v7761_v58 }
 0x26e   : > { %v692_v63 = vpack.c.bf16 %v7767_v61, %v7763_v59 }
 0x270   : > { %6912 = vmatprep.mubr.msk.bf16.mxu0 %vm724_vm1, %v692_v63 }
 0x271   : > { %6913 = vmatmul.mubr.msk.bf16.gmra.mrb[8].mxu0 %vm724_vm1, %v693_v62 }
 0x272   : > { %v7769_v2 = vpop.eup %7768 }
 0x273   : > { %v7771_v4 = vpop.eup %7770 }
 0x274   : > { %v7773_v5 = vpop.eup %7772 }
 0x275   : > { %v7775_v6 = vpop.eup %7774  ;;  %v695_v7 = vpack.c.bf16 %v7773_v5, %v7769_v2 }
 0x276   : > { %v694_v8 = vpack.c.bf16 %v7775_v6, %v7771_v4 }
 0x278   : > { %6916 = vmatprep.mubr.msk.bf16.mxu0 %vm724_vm1, %v694_v8  ;;  %v8649_v8 = vld [vmem:[%s8624_s28 + $0x30] sm:$0xff] }
 0x279   : > { %6917 = vmatmul.mubr.msk.bf16.gmra.mrb[12].mxu0 %vm724_vm1, %v695_v7 }
 0x27a   : > { %6932 = vmatprep.mubr.msk.bf16.mxu0 %vm864_vm2, %v8578_v9 }
 0x33c   : > { %v6910_v30 = vpop.f32.mrb[4].mxu0 }
 0x33d   : > { %v786_v31 = vadd.f32 %v6910_v30, %v8606_v29  ;;  %v777_v32 = vpop.f32.mrb[5].mxu0  ;;  %v8652_v30 = vld [vmem:[%s8624_s28 + $0x38] sm:$0xff] }
 0x33e   : > { %v778_v33 = vadd.f32 %v8606_v29, %v777_v32  ;;  %v6911_v34 = vpop.f32.mrb[6].mxu0  ;;  %v8655_v32 = vld [vmem:[%s8624_s28 + $0x20] sm:$0xff] }
 0x33f   : > { %7776 = vtanh.f32 %v786_v31  ;;  %v789_v35 = vadd.f32 %v6911_v34, %v8606_v29  ;;  %v780_v36 = vpop.f32.mrb[7].mxu0 }
 0x340   : > { %7778 = vtanh.f32 %v778_v33  ;;  %v781_v37 = vadd.f32 %v8606_v29, %v780_v36  ;;  %v8658_v33 = vld [vmem:[%s8624_s28 + $0x28] sm:$0xff] }
 0x341   : > { %7780 = vtanh.f32 %v789_v35 }
 0x342   : > { %7782 = vtanh.f32 %v781_v37 }
 0x344   : > { %v6914_v38 = vpop.f32.mrb[8].mxu0 }
 0x345   : > { %v802_v39 = vadd.f32 %v6914_v38, %v8606_v29  ;;  %v793_v40 = vpop.f32.mrb[9].mxu0 }
 0x346   : > { %v794_v41 = vadd.f32 %v8606_v29, %v793_v40  ;;  %v6915_v42 = vpop.f32.mrb[10].mxu0 }
 0x347   : > { %7784 = vtanh.f32 %v802_v39  ;;  %v805_v43 = vadd.f32 %v6915_v42, %v8606_v29  ;;  %v796_v44 = vpop.f32.mrb[11].mxu0 }
 0x348   : > { %7786 = vtanh.f32 %v794_v41  ;;  %v797_v45 = vadd.f32 %v8606_v29, %v796_v44  ;;  %v8668_v44 = vld [vmem:[%s8624_s28 + $0x58] sm:$0xff] }
 0x349   : > { %v7777_v46 = vpop.eup %7776  ;;  %7788 = vtanh.f32 %v805_v43  ;;  %v8665_v43 = vld [vmem:[%s8624_s28 + $0x50] sm:$0xff] }
 0x34a   : > { %v7779_v49 = vpop.eup %7778  ;;  %7790 = vtanh.f32 %v797_v45  ;;  %v838_v55 = vmul.f32 %v7777_v46, %v8629_v47  ;;  %v8671_v46 = vld [vmem:[%s8624_s28 + $0x40] sm:$0xff] }
 0x34b   : > { %v7781_v52 = vpop.eup %7780  ;;  %v836_v59 = vmul.f32 %v7779_v49, %v8635_v50  ;;  %v8674_v49 = vld [vmem:[%s8624_s28 + $0x48] sm:$0xff] }
 0x34c   : > { %v7783_v53 = vpop.eup %7782  ;;  %v6918_v54 = vpop.f32.mrb[12].mxu0  ;;  %v839_v56 = vmul.f32 %v7781_v52, %v8632_v48 }
 0x34d   : > { %v818_v57 = vadd.f32 %v6918_v54, %v8606_v29  ;;  %v809_v58 = vpop.f32.mrb[13].mxu0  ;;  %v837_v60 = vmul.f32 %v7783_v53, %v8638_v51 }
 0x34e   : > { %v810_v61 = vadd.f32 %v8606_v29, %v809_v58  ;;  %v6919_v62 = vpop.f32.mrb[14].mxu0  ;;  %v849_v63 = vpack.c.bf16 %v839_v56, %v838_v55 }
 0x34f   : > { %7792 = vtanh.f32 %v818_v57  ;;  %v821_v2 = vadd.f32 %v6919_v62, %v8606_v29  ;;  %v812_v4 = vpop.f32.mrb[15].mxu0  ;;  %v848_v5 = vpack.c.bf16 %v837_v60, %v836_v59  ;;  %v8683_v60 = vld [vmem:[%s10308_s2 + $0x68] sm:$0xff]  }
 0x350   : > { %7794 = vtanh.f32 %v810_v61  ;;  %v813_v6 = vadd.f32 %v8606_v29, %v812_v4  ;;  %v8698_v61 = vld [vmem:[%s10309_s3 + $0x50] sm:$0x3]  ;;  %v8705_v62 = vld [vmem:[%s10309_s3 + $0x48] sm:$0xff]  }
 0x351   : > { %v7785_v7 = vpop.eup %7784  ;;  %7796 = vtanh.f32 %v821_v2  ;;  %6920 = vmatprep.subr.bf16.mxu0 %v848_v5  ;;  %v325_v2 = vld [vmem:[%s8693_s9] sm:$0xff]  ;;  %v326_v4 = vld [vmem:[%s8693_s9 + $0x8] sm:$0xff]  ;;  %6948 = vmatprep.subr.bf16.mxu1 %v8705_v62 }
 0x352   : > { %v7787_v31 = vpop.eup %7786  ;;  %7798 = vtanh.f32 %v813_v6  ;;  %6921 = vmatpush3.bf16.msra.mxu0 %v848_v5  ;;  %v842_v36 = vmul.f32 %v7785_v7, %v8649_v8  ;;  %v920_v5 = vpack.c.bf16 %v326_v4, %v325_v2  ;;  %v327_v6 = vld [vmem:[%s8693_s9 + $0x10] sm:$0xff]  ;;  %v328_v7 = vld [vmem:[%s8693_s9 + $0x18] sm:$0xff]  ;;  %6949 = vmatpush3.bf16.msra.mxu1 %v8705_v62 }
 0x353   : > { %v7789_v34 = vpop.eup %7788  ;;  %6922 = vmatprep.subr.bf16.mxu0 %v849_v63  ;;  %v840_v38 = vmul.f32 %v7787_v31, %v8655_v32  ;;  %v921_v31 = vpack.c.bf16 %v328_v7, %v327_v6 }
 0x354   : > { %v7791_v35 = vpop.eup %7790  ;;  %v843_v37 = vmul.f32 %v7789_v34, %v8652_v30 }
 0x355   : > { %v841_v39 = vmul.f32 %v7791_v35, %v8658_v33 }
 0x356   : > { %6923 = vmatpush3.bf16.msra.mxu0 %v849_v63  ;;  %v851_v40 = vpack.c.bf16 %v843_v37, %v842_v36  ;;  %v8709_v63 = vsel %vm933_vm3, %v8698_v61, 0 }
 0x357   : > { %v850_v41 = vpack.c.bf16 %v841_v39, %v840_v38 }
 0x359   : > { %v7793_v42 = vpop.eup %7792  ;;  %6924 = vmatprep.subr.bf16.mxu0 %v850_v41 }
 0x35a   : > { %v7795_v45 = vpop.eup %7794  ;;  %6925 = vmatpush3.bf16.msra.mxu0 %v850_v41  ;;  %v846_v54 = vmul.f32 %v7793_v42, %v8665_v43 }
 0x35b   : > { %v7797_v52 = vpop.eup %7796  ;;  %6926 = vmatprep.subr.bf16.mxu0 %v851_v40  ;;  %v844_v56 = vmul.f32 %v7795_v45, %v8671_v46 }
 0x35c   : > { %v7799_v53 = vpop.eup %7798  ;;  %v847_v55 = vmul.f32 %v7797_v52, %v8668_v44 }
 0x35d   : > { %v845_v57 = vmul.f32 %v7799_v53, %v8674_v49 }
 0x35e   : > { %6927 = vmatpush3.bf16.msra.mxu0 %v851_v40  ;;  %v853_v58 = vpack.c.bf16 %v847_v55, %v846_v54 }
 0x35f   : > { %v852_v59 = vpack.c.bf16 %v845_v57, %v844_v56 }
 0x361   : > { %6928 = vmatprep.subr.bf16.mxu0 %v852_v59 }
 0x362   : > { %6929 = vmatpush3.bf16.msra.mxu0 %v852_v59 }
 0x363   : > { %6930 = vmatprep.subr.bf16.mxu0 %v853_v58 }
 0x366   : > { %6931 = vmatpush3.bf16.msra.mxu0 %v853_v58 }
 0x367   : > { %7702 = vmatprep.subr.msk.bf16.mxu0 %vm933_vm3, %v8698_v61 }
 0x369   : > { %6933 = vmatmul.mubr.msk.bf16.vlgmr.msra.gmra.mrb[16].mxu0 %vm864_vm2, %v8683_v60 }
 0x36a   : > { %6937 = vmatpush3.bf16.msra.mxu0 %v8709_v63  ;;  %6938 = vmatprep.mubr.msk.bf16.mxu0 %vm926_vm4, %v920_v5 }
 0x36b   : > { %6954 = vmatprep.subr.bf16.mxu0 %v8427_v0 }
 0x371   : > { %6939 = vmatmul.mubr.msk.bf16.vlgmr.msra.gmra.mrb[20].mxu0 %vm926_vm4, %v921_v31 }
 0x372   : > { %6955 = vmatpush3.bf16.msra.mxu0 %v8427_v0 }
 0x373   : > { %6956 = vmatprep.subr.bf16.mxu0 %v8432_v1 }
 0x376   : > { %6957 = vmatpush3.bf16.msra.mxu0 %v8432_v1 }
 0x377   : > { %6994 = vmatprep.subr.bf16.mxu0 %v8527_v23 }
 0x43c   : > { %v6934_v34 = vpop.f32.mrb[16].mxu0 }
 0x43d   : > { %v905_v35 = vpop.f32.mrb[17].mxu0 }
 0x43e   : > { %v6935_v36 = vpop.f32.mrb[18].mxu0 }
 0x43f   : > { %v987_v37 = vpack.c.bf16 %v6935_v36, %v6934_v34  ;;  %v908_v38 = vpop.f32.mrb[19].mxu0 }
 0x440   : > { %v986_v39 = vpack.c.bf16 %v908_v38, %v905_v35 }
 0x442   : > { %6950 = vmatprep.mubr.msk.bf16.mxu1 %vm724_vm1, %v986_v39 }
 0x443   : > { %6951 = vmatmul.mubr.msk.bf16.vlgmr.msra.gmra.mrb[12].mxu1 %vm724_vm1, %v987_v37 }
 0x444   : > { %6966 = vmatprep.mubr.msk.bf16.mxu1 %vm341_vm0, %v8441_v3  ;;  %v6940_v0 = vpop.f32.mrb[20].mxu0  ;;  %v8736_v3 = vld [vmem:[%s10310_s4 + $0x2] ss:$0 sm:$0xff] }
 0x445   : > { %v971_v40 = vpop.f32.mrb[21].mxu0  ;;  %v980_v55 = vadd.f32 %v6940_v0, %v8736_v3 }
 0x446   : > { %v6941_v41 = vpop.f32.mrb[22].mxu0  ;;  %v972_v54 = vadd.f32 %v8736_v3, %v971_v40 }
 0x447   : > { %v974_v42 = vpop.f32.mrb[23].mxu0  ;;  %v983_v59 = vadd.f32 %v6941_v41, %v8736_v3 }
 0x448   : > { %v975_v56 = vadd.f32 %v8736_v3, %v974_v42 }
 0x516   : > { %v6952_v1 = vpop.f32.mrb[12].mxu1 }
 0x517   : > { %1103 = vrot.lane.b32.xlu0 %v6952_v1, %s8384_s26  ;;  %v1052_v45 = vpop.f32.mrb[13].mxu1  ;;  %v1069_v58 = vadd.f32 %v6952_v1, %v980_v55 }
 0x518   : > { %1099 = vrot.lane.b32.xlu1 %v1052_v45, %s8384_s26  ;;  %v6953_v52 = vpop.f32.mrb[14].mxu1  ;;  %v1067_v57 = vadd.f32 %v1052_v45, %v972_v54 }
 0x519   : > { %v1055_v53 = vpop.f32.mrb[15].mxu1  ;;  %v6248_v5 = vmul.f32 -1.442695, %v1069_v58  ;;  %v1070_v6 = vadd.f32 %v6953_v52, %v983_v59 }
 0x51a   : > { %v6246_v2 = vmul.f32 -1.442695, %v1067_v57  ;;  %v1068_v4 = vadd.f32 %v1055_v53, %v975_v56 }
 0x51b   : > { %v6249_v31 = vmul.f32 -1.442695, %v1070_v6 }
 0x51c   : > { %1101 = vrot.lane.b32.xlu1 %v1055_v53, %s8384_s26  ;;  %7800 = vpow2.f32 %v6246_v2  ;;  %v6247_v7 = vmul.f32 -1.442695, %v1068_v4 }
 0x51d   : > { %7802 = vpow2.f32 %v6248_v5 }
 0x51e   : > { %7804 = vpow2.f32 %v6247_v7 }
 0x51f   : > { %7806 = vpow2.f32 %v6249_v31 }
 0x520   : > { %1105 = vrot.lane.b32.xlu1 %v6953_v52, %s8384_s26 }
 0x526   : > { %v7801_v34 = vpop.eup %7800 }
 0x527   : > { %v7803_v35 = vpop.eup %7802  ;;  %v1083_v36 = vadd.f32 1.0, %v7801_v34 }
 0x528   : > { %v7805_v37 = vpop.eup %7804  ;;  %v1085_v38 = vadd.f32 1.0, %v7803_v35 }
 0x529   : > { %7808 = vrcp.f32 %v1083_v36  ;;  %v1084_v39 = vadd.f32 1.0, %v7805_v37  ;;  %v7807_v0 = vpop.eup %7806 }
 0x52a   : > { %7810 = vrcp.f32 %v1085_v38  ;;  %v1086_v40 = vadd.f32 1.0, %v7807_v0 }
 0x52b   : > { %7812 = vrcp.f32 %v1084_v39 }
 0x52c   : > { %7814 = vrcp.f32 %v1086_v40 }
 0x533   : > { %v7809_v41 = vpop.eup %7808 }
 0x534   : > { %v7811_v52 = vpop.eup %7810 }
 0x535   : > { %v7813_v53 = vpop.eup %7812 }
 0x536   : > { %v7815_v4 = vpop.eup %7814 }
 0x589   : > { %v1104_v45 = vpop.permute.xlu0 %1103 }
 0x58a   : > { %v1100_v42 = vpop.permute.xlu1 %1099  ;;  %v1113_v58 = vmul.f32 %v7811_v52, %v1104_v45  ;;  %v1140_v45 = vsub.f32 1.0, %v7813_v53 }
 0x58b   : > { %v1111_v1 = vmul.f32 %v7809_v41, %v1100_v42 }
 0x58d   : > { %1119 = vrot.lane.b32.xlu0 %v1111_v1, %s8384_s26 }
 0x58e   : > { %v1102_v57 = vpop.permute.xlu1 %1101 }
 0x58f   : > { %v1112_v2 = vmul.f32 %v7813_v53, %v1102_v57 }
 0x591   : > { %1121 = vrot.lane.b32.xlu1 %v1112_v2, %s8384_s26  ;;  %1123 = vrot.lane.b32.xlu0 %v1113_v58, %s8384_s26  ;;  %v1164_v58 = vmul.f32 0.0, %v7813_v53 }
 0x592   : > { %v1106_v5 = vpop.permute.xlu1 %1105 }
 0x593   : > { %v1114_v6 = vmul.f32 %v7815_v4, %v1106_v5  ;;  %v1141_v5 = vsub.f32 1.0, %v7811_v52 }
 0x595   : > { %1125 = vrot.lane.b32.xlu1 %v1114_v6, %s8384_s26 }
 0x5ff   : > { %v1120_v7 = vpop.permute.xlu0 %1119 }
 0x600   : > { %v1131_v31 = vadd.f32 %v1120_v7, %v972_v54 }
 0x602   : > { %7816 = vtanh.f32 %v1131_v31 }
 0x603   : > { %v1122_v34 = vpop.permute.xlu1 %1121  ;;  %v1124_v35 = vpop.permute.xlu0 %1123 }
 0x604   : > { %v1132_v36 = vadd.f32 %v1122_v34, %v975_v56  ;;  %v1133_v37 = vadd.f32 %v1124_v35, %v980_v55  ;;  %v1139_v55 = vsub.f32 1.0, %v7809_v41  ;;  %v1142_v35 = vsub.f32 1.0, %v7815_v4 }
 0x606   : > { %7818 = vtanh.f32 %v1132_v36 }
 0x607   : > { %7820 = vtanh.f32 %v1133_v37  ;;  %v1126_v38 = vpop.permute.xlu1 %1125  ;;  %v1165_v37 = vmul.f32 0.0, %v7811_v52 }
 0x608   : > { %v1134_v39 = vadd.f32 %v1126_v38, %v983_v59  ;;  %v1163_v59 = vmul.f32 0.0, %v7809_v41  ;;  %v1166_v38 = vmul.f32 0.0, %v7815_v4 }
 0x60a   : > { %7822 = vtanh.f32 %v1134_v39 }
 0x60c   : > { %v7817_v0 = vpop.eup %7816 }
 0x60d   : > { %1147 = vrot.lane.b32.xlu0 %v7817_v0, %s8385_s16 }
 0x610   : > { %v7819_v40 = vpop.eup %7818 }
 0x611   : > { %v7821_v42 = vpop.eup %7820  ;;  %1149 = vrot.lane.b32.xlu1 %v7819_v40, %s8385_s16 }
 0x612   : > { %1151 = vrot.lane.b32.xlu0 %v7821_v42, %s8385_s16 }
 0x614   : > { %v7823_v54 = vpop.eup %7822 }
 0x615   : > { %1153 = vrot.lane.b32.xlu1 %v7823_v54, %s8385_s16 }
 0x67f   : > { %v1148_v56 = vpop.permute.xlu0 %1147 }
 0x680   : > { %v1159_v1 = vmul.f32 %v1148_v56, %v1139_v55 }
 0x682   : > { %v8750_v7 = vadd.f32 %v1163_v59, %v1159_v1 }
 0x683   : > { %v1150_v57 = vpop.permute.xlu1 %1149 }
 0x684   : > { %v1160_v2 = vmul.f32 %v1150_v57, %v1140_v45  ;;  %v1152_v6 = vpop.permute.xlu0 %1151  ;;  %10324 = vst [vmem:[#allocation3_spill] sm:$0xff] %v8750_v7 }
 0x685   : > { %v1161_v34 = vmul.f32 %v1152_v6, %v1141_v5 }
 0x686   : > { %v8752_v31 = vadd.f32 %v1164_v58, %v1160_v2 }
 0x687   : > { %v1154_v36 = vpop.permute.xlu1 %1153  ;;  %v8756_v40 = vadd.f32 %v1165_v37, %v1161_v34 }
 0x688   : > { %10325 = vst [vmem:[#allocation4_spill] sm:$0xff] %v8752_v31  ;;  %v1162_v39 = vmul.f32 %v1154_v36, %v1142_v35  ;;  %v1195_v0 = vpack.c.bf16 %v8752_v31, %v8750_v7 }
 0x689   : > { %10326 = vst [vmem:[#allocation5_spill] sm:$0xff] %v8756_v40 }
 0x68a   : > { %v8758_v41 = vadd.f32 %v1166_v38, %v1162_v39  ;;  %1199 = vrot.lane.b32.xlu0 %v1195_v0, %s8385_s16 }
 0x68c   : > { %10327 = vst [vmem:[#allocation6_spill] sm:$0xff] %v8758_v41  ;;  %v1196_v53 = vpack.c.bf16 %v8758_v41, %v8756_v40 }
 0x68e   : > { %1201 = vrot.lane.b32.xlu1 %v1196_v53, %s8385_s16 }
 0x6fc   : > { %v1200_v42 = vpop.permute.xlu0 %1199 }
 0x6fd   : > { %6958 = vmatprep.mubr.msk.bf16.mxu0 %vm341_vm0, %v1200_v42 }
 0x700   : > { %v1202_v52 = vpop.permute.xlu1 %1201 }
 0x701   : > { %6959 = vmatmul.mubr.msk.bf16.vlgmr.msra.gmra.mrb[24].mxu0 %vm341_vm0, %v1202_v52 }
 0x702   : > { %6995 = vmatpush3.bf16.msra.mxu0 %v8527_v23 }
 0x703   : > { %6996 = vmatprep.subr.bf16.mxu0 %v8534_v24 }
 0x706   : > { %6997 = vmatpush3.bf16.msra.mxu0 %v8534_v24 }
 0x707   : > { %6998 = vmatprep.subr.bf16.mxu0 %v8541_v25 }
 0x70a   : > { %6999 = vmatpush3.bf16.msra.mxu0 %v8541_v25 }
 0x70b   : > { %7000 = vmatprep.subr.bf16.mxu0 %v8548_v26 }
 0x70e   : > { %7001 = vmatpush3.bf16.msra.mxu0 %v8548_v26 }
 0x7d4   : > { %v6960_v4 = vpop.f32.mrb[24].mxu0 }
 0x7d5   : > { %v1243_v54 = vpop.f32.mrb[25].mxu0 }
 0x7d6   : > { %v6961_v56 = vpop.f32.mrb[26].mxu0 }
 0x7d7   : > { %v1259_v55 = vpack.c.bf16 %v6961_v56, %v6960_v4  ;;  %v1246_v1 = vpop.f32.mrb[27].mxu0 }
 0x7d8   : > { %v1258_v45 = vpack.c.bf16 %v1246_v1, %v1243_v54 }
 0x7d9   : > { %1264 = vrot.lane.b32.xlu1 %v1259_v55, %s8384_s26 }
 0x7da   : > { %1262 = vrot.lane.b32.xlu0 %v1258_v45, %s8384_s26 }
 0x84b   : > { %v1265_v24 = vpop.permute.xlu1 %1264 }
 0x84c   : > { %v1263_v23 = vpop.permute.xlu0 %1262 }
 0x84d   : > { %6962 = vmatprep.subr.bf16.mxu1 %v1263_v23 }
 0x84e   : > { %6963 = vmatpush3.bf16.msra.mxu1 %v1263_v23 }
 0x84f   : > { %6964 = vmatprep.subr.bf16.mxu1 %v1265_v24 }
 0x852   : > { %6965 = vmatpush3.bf16.msra.mxu1 %v1265_v24 }
 0x853   : > { %6978 = vmatprep.subr.bf16.mxu1 %v1258_v45 }
 0x855   : > { %6967 = vmatmul.mubr.msk.bf16.vlgmr.msra.gmra.mrb[16].mxu1 %vm341_vm0, %v8450_v12 }
 0x856   : > { %6979 = vmatpush3.bf16.msra.mxu1 %v1258_v45  ;;  %6970 = vmatprep.mubr.msk.bf16.mxu1 %vm341_vm0, %v8455_v13 }
 0x857   : > { %6980 = vmatprep.subr.bf16.mxu1 %v1259_v55 }
 0x85a   : > { %6981 = vmatpush3.bf16.msra.mxu1 %v1259_v55 }
 0x85b   : > { %7036 = vmatprep.subr.bf16.mxu1 %v8585_v10 }
 0x85d   : > { %6971 = vmatmul.mubr.msk.bf16.gmra.mrb[20].mxu1 %vm341_vm0, %v8464_v14 }
 0x85e   : > { %6974 = vmatprep.mubr.msk.bf16.mxu1 %vm341_vm0, %v8469_v15 }
 0x865   : > { %6975 = vmatmul.mubr.msk.bf16.gmra.mrb[24].mxu1 %vm341_vm0, %v8478_v16 }
 0x866   : > { %6982 = vmatprep.mubr.msk.bf16.mxu1 %vm341_vm0, %v8483_v17 }
 0x86d   : > { %6983 = vmatmul.mubr.msk.bf16.vlgmr.msra.gmra.mrb[16].mxu1 %vm341_vm0, %v8492_v18 }
 0x86e   : > { %6986 = vmatprep.mubr.msk.bf16.mxu1 %vm341_vm0, %v8497_v19  ;;  %7037 = vmatpush3.bf16.msra.mxu1 %v8585_v10 }
 0x86f   : > { %7038 = vmatprep.subr.bf16.mxu1 %v8590_v11 }
 0x872   : > { %7039 = vmatpush3.bf16.msra.mxu1 %v8590_v11 }
 0x873   : > { %7040 = vmatprep.subr.bf16.mxu1 %v8598_v28 }
 0x875   : > { %6987 = vmatmul.mubr.msk.bf16.gmra.mrb[20].mxu1 %vm341_vm0, %v8506_v20 }
 0x876   : > { %6990 = vmatprep.mubr.msk.bf16.mxu1 %vm341_vm0, %v8511_v21  ;;  %7041 = vmatpush3.bf16.msra.mxu1 %v8598_v28 }
 0x877   : > { %7042 = vmatprep.subr.bf16.mxu1 %v8705_v62 }
 0x87a   : > { %7043 = vmatpush3.bf16.msra.mxu1 %v8705_v62 }
 0x87d   : > { %6991 = vmatmul.mubr.msk.bf16.gmra.mrb[24].mxu1 %vm341_vm0, %v8520_v22 }
 0x940   : > { %v6984_v12 = vpop.f32.mrb[16].mxu1 }
 0x941   : > { %v1432_v13 = vadd.f32 %v6984_v12, %v8555_v27  ;;  %v1383_v14 = vpop.f32.mrb[17].mxu1 }
 0x942   : > { %v1430_v15 = vadd.f32 %v8555_v27, %v1383_v14  ;;  %v6985_v16 = vpop.f32.mrb[18].mxu1 }
 0x943   : > { %7824 = vtanh.f32 %v1432_v13  ;;  %v1433_v17 = vadd.f32 %v6985_v16, %v8555_v27  ;;  %v1386_v18 = vpop.f32.mrb[19].mxu1 }
 0x944   : > { %7826 = vtanh.f32 %v1430_v15  ;;  %v1431_v19 = vadd.f32 %v8555_v27, %v1386_v18 }
 0x945   : > { %7828 = vtanh.f32 %v1433_v17 }
 0x946   : > { %7830 = vtanh.f32 %v1431_v19 }
 0x948   : > { %v6988_v20 = vpop.f32.mrb[20].mxu1 }
 0x949   : > { %v1436_v21 = vadd.f32 %v6988_v20, %v8555_v27  ;;  %v1399_v22 = vpop.f32.mrb[21].mxu1 }
 0x94a   : > { %v1434_v25 = vadd.f32 %v8555_v27, %v1399_v22  ;;  %v6989_v26 = vpop.f32.mrb[22].mxu1 }
 0x94b   : > { %7832 = vtanh.f32 %v1436_v21  ;;  %v1437_v10 = vadd.f32 %v6989_v26, %v8555_v27  ;;  %v1402_v11 = vpop.f32.mrb[23].mxu1 }
 0x94c   : > { %7834 = vtanh.f32 %v1434_v25  ;;  %v1435_v28 = vadd.f32 %v8555_v27, %v1402_v11 }
 0x94d   : > { %v7825_v57 = vpop.eup %7824  ;;  %7836 = vtanh.f32 %v1437_v10 }
 0x94e   : > { %v7827_v59 = vpop.eup %7826  ;;  %7838 = vtanh.f32 %v1435_v28 }
 0x94f   : > { %v7829_v58 = vpop.eup %7828 }
 0x950   : > { %v7831_v2 = vpop.eup %7830  ;;  %v6992_v5 = vpop.f32.mrb[24].mxu1  ;;  %v1455_v6 = vpack.c.bf16 %v7829_v58, %v7825_v57 }
 0x951   : > { %v1440_v34 = vadd.f32 %v6992_v5, %v8555_v27  ;;  %v1415_v35 = vpop.f32.mrb[25].mxu1  ;;  %v1454_v36 = vpack.c.bf16 %v7831_v2, %v7827_v59 }
 0x952   : > { %v1438_v37 = vadd.f32 %v8555_v27, %v1415_v35  ;;  %v6993_v38 = vpop.f32.mrb[26].mxu1 }
 0x953   : > { %7840 = vtanh.f32 %v1440_v34  ;;  %v1441_v39 = vadd.f32 %v6993_v38, %v8555_v27  ;;  %v1418_v0 = vpop.f32.mrb[27].mxu1  ;;  %7002 = vmatprep.mubr.msk.bf16.mxu0 %vm724_vm1, %v1454_v36 }
 0x954   : > { %7842 = vtanh.f32 %v1438_v37  ;;  %v1439_v53 = vadd.f32 %v8555_v27, %v1418_v0  ;;  %7003 = vmatmul.mubr.msk.bf16.vlgmr.msra.gmra.mrb[28].mxu0 %vm724_vm1, %v1455_v6 }
 0x955   : > { %v7833_v42 = vpop.eup %7832  ;;  %7844 = vtanh.f32 %v1441_v39 }
 0x956   : > { %v7835_v52 = vpop.eup %7834  ;;  %7846 = vtanh.f32 %v1439_v53 }
 0x957   : > { %v7837_v4 = vpop.eup %7836 }
 0x958   : > { %v7839_v54 = vpop.eup %7838  ;;  %v1457_v56 = vpack.c.bf16 %v7837_v4, %v7833_v42 }
 0x959   : > { %v1456_v55 = vpack.c.bf16 %v7839_v54, %v7835_v52 }
 0x95b   : > { %7006 = vmatprep.mubr.msk.bf16.mxu0 %vm724_vm1, %v1456_v55 }
 0x95c   : > { %7007 = vmatmul.mubr.msk.bf16.gmra.mrb[32].mxu0 %vm724_vm1, %v1457_v56 }
 0x95d   : > { %v7841_v1 = vpop.eup %7840 }
 0x95e   : > { %v7843_v45 = vpop.eup %7842 }
 0x95f   : > { %v7845_v23 = vpop.eup %7844 }
 0x960   : > { %v7847_v24 = vpop.eup %7846  ;;  %v1459_v12 = vpack.c.bf16 %v7845_v23, %v7841_v1 }
 0x961   : > { %v1458_v27 = vpack.c.bf16 %v7847_v24, %v7843_v45 }
 0x963   : > { %7010 = vmatprep.mubr.msk.bf16.mxu0 %vm724_vm1, %v1458_v27 }
 0x964   : > { %7011 = vmatmul.mubr.msk.bf16.gmra.mrb[36].mxu0 %vm724_vm1, %v1459_v12 }
 0x965   : > { %7026 = vmatprep.mubr.msk.bf16.mxu0 %vm864_vm2, %v8578_v9 }
 0xa27   : > { %v7004_v13 = vpop.f32.mrb[28].mxu0 }
 0xa28   : > { %v1521_v14 = vadd.f32 %v7004_v13, %v8606_v29  ;;  %v1512_v15 = vpop.f32.mrb[29].mxu0 }
 0xa29   : > { %v1513_v16 = vadd.f32 %v8606_v29, %v1512_v15  ;;  %v7005_v17 = vpop.f32.mrb[30].mxu0 }
 0xa2a   : > { %7848 = vtanh.f32 %v1521_v14  ;;  %v1524_v18 = vadd.f32 %v7005_v17, %v8606_v29  ;;  %v1515_v19 = vpop.f32.mrb[31].mxu0  ;;  %v1194_v17 = vld [vmem:[%s8693_s9 + $0x38] sm:$0xff] }
 0xa2b   : > { %7850 = vtanh.f32 %v1513_v16  ;;  %v1516_v20 = vadd.f32 %v8606_v29, %v1515_v19  ;;  %v1193_v16 = vld [vmem:[%s8693_s9 + $0x30] sm:$0xff] }
 0xa2c   : > { %7852 = vtanh.f32 %v1524_v18  ;;  %v1639_v18 = vpack.c.bf16 %v1194_v17, %v1193_v16 }
 0xa2d   : > { %7854 = vtanh.f32 %v1516_v20 }
 0xa2f   : > { %v7008_v21 = vpop.f32.mrb[32].mxu0 }
 0xa30   : > { %v1537_v22 = vadd.f32 %v7008_v21, %v8606_v29  ;;  %v1528_v9 = vpop.f32.mrb[33].mxu0 }
 0xa31   : > { %v1529_v25 = vadd.f32 %v8606_v29, %v1528_v9  ;;  %v7009_v26 = vpop.f32.mrb[34].mxu0 }
 0xa32   : > { %7856 = vtanh.f32 %v1537_v22  ;;  %v1540_v10 = vadd.f32 %v7009_v26, %v8606_v29  ;;  %v1531_v11 = vpop.f32.mrb[35].mxu0  ;;  %v8885_v26 = vld [vmem:[%s10308_s2 + $0x30] sm:$0xff]  }
 0xa33   : > { %7858 = vtanh.f32 %v1529_v25  ;;  %v1532_v28 = vadd.f32 %v8606_v29, %v1531_v11 }
 0xa34   : > { %v7849_v57 = vpop.eup %7848  ;;  %7860 = vtanh.f32 %v1540_v10 }
 0xa35   : > { %v7851_v59 = vpop.eup %7850  ;;  %7862 = vtanh.f32 %v1532_v28  ;;  %v1573_v6 = vmul.f32 %v7849_v57, %v8629_v47 }
 0xa36   : > { %v7853_v58 = vpop.eup %7852  ;;  %v1571_v37 = vmul.f32 %v7851_v59, %v8635_v50 }
 0xa37   : > { %v7855_v2 = vpop.eup %7854  ;;  %v7012_v5 = vpop.f32.mrb[36].mxu0  ;;  %v1574_v34 = vmul.f32 %v7853_v58, %v8632_v48 }
 0xa38   : > { %v1553_v35 = vadd.f32 %v7012_v5, %v8606_v29  ;;  %v1544_v36 = vpop.f32.mrb[37].mxu0  ;;  %v1572_v38 = vmul.f32 %v7855_v2, %v8638_v51 }
 0xa39   : > { %v1545_v39 = vadd.f32 %v8606_v29, %v1544_v36  ;;  %v7013_v0 = vpop.f32.mrb[38].mxu0  ;;  %v1584_v53 = vpack.c.bf16 %v1574_v34, %v1573_v6 }
 0xa3a   : > { %7864 = vtanh.f32 %v1553_v35  ;;  %v1556_v42 = vadd.f32 %v7013_v0, %v8606_v29  ;;  %v1547_v52 = vpop.f32.mrb[39].mxu0  ;;  %v1583_v4 = vpack.c.bf16 %v1572_v38, %v1571_v37 }
 0xa3b   : > { %7866 = vtanh.f32 %v1545_v39  ;;  %v1548_v47 = vadd.f32 %v8606_v29, %v1547_v52 }
 0xa3c   : > { %v7857_v48 = vpop.eup %7856  ;;  %7868 = vtanh.f32 %v1556_v42  ;;  %7014 = vmatprep.subr.bf16.mxu0 %v1583_v4 }
 0xa3d   : > { %v7859_v54 = vpop.eup %7858  ;;  %7870 = vtanh.f32 %v1548_v47  ;;  %7015 = vmatpush3.bf16.msra.mxu0 %v1583_v4  ;;  %v1577_v56 = vmul.f32 %v7857_v48, %v8649_v8 }
 0xa3e   : > { %v7861_v50 = vpop.eup %7860  ;;  %7016 = vmatprep.subr.bf16.mxu0 %v1584_v53  ;;  %v1575_v1 = vmul.f32 %v7859_v54, %v8655_v32 }
 0xa3f   : > { %v7863_v51 = vpop.eup %7862  ;;  %v1578_v55 = vmul.f32 %v7861_v50, %v8652_v30 }
 0xa40   : > { %v1576_v45 = vmul.f32 %v7863_v51, %v8658_v33 }
 0xa41   : > { %7017 = vmatpush3.bf16.msra.mxu0 %v1584_v53  ;;  %v1586_v23 = vpack.c.bf16 %v1578_v55, %v1577_v56 }
 0xa42   : > { %v1585_v29 = vpack.c.bf16 %v1576_v45, %v1575_v1 }
 0xa44   : > { %v7865_v24 = vpop.eup %7864  ;;  %7018 = vmatprep.subr.bf16.mxu0 %v1585_v29 }
 0xa45   : > { %v7867_v12 = vpop.eup %7866  ;;  %7019 = vmatpush3.bf16.msra.mxu0 %v1585_v29  ;;  %v1581_v14 = vmul.f32 %v7865_v24, %v8665_v43  ;;  %v8857_v43 = vld [vmem:[%s10309_s3] sm:$0xff]  }
 0xa46   : > { %v7869_v27 = vpop.eup %7868  ;;  %7020 = vmatprep.subr.bf16.mxu0 %v1586_v23  ;;  %v1579_v30 = vmul.f32 %v7867_v12, %v8671_v46  ;;  %v1192_v46 = vld [vmem:[%s8693_s9 + $0x28] sm:$0xff] }
 0xa47   : > { %v7871_v13 = vpop.eup %7870  ;;  %v1582_v8 = vmul.f32 %v7869_v27, %v8668_v44  ;;  %v1191_v44 = vld [vmem:[%s8693_s9 + $0x20] sm:$0xff] }
 0xa48   : > { %v1580_v32 = vmul.f32 %v7871_v13, %v8674_v49  ;;  %v1638_v49 = vpack.c.bf16 %v1192_v46, %v1191_v44 }
 0xa49   : > { %7021 = vmatpush3.bf16.msra.mxu0 %v1586_v23  ;;  %v1588_v33 = vpack.c.bf16 %v1582_v8, %v1581_v14 }
 0xa4a   : > { %v1587_v15 = vpack.c.bf16 %v1580_v32, %v1579_v30 }
 0xa4c   : > { %7022 = vmatprep.subr.bf16.mxu0 %v1587_v15 }
 0xa4d   : > { %7023 = vmatpush3.bf16.msra.mxu0 %v1587_v15 }
 0xa4e   : > { %7024 = vmatprep.subr.bf16.mxu0 %v1588_v33 }
 0xa51   : > { %7025 = vmatpush3.bf16.msra.mxu0 %v1588_v33 }
 0xa52   : > { %7703 = vmatprep.subr.msk.bf16.mxu0 %vm933_vm3, %v8698_v61  ;;  %v8877_v61 = vld [vmem:[%s10309_s3 + $0x10] sm:$0xff]  }
 0xa54   : > { %7027 = vmatmul.mubr.msk.bf16.vlgmr.msra.gmra.mrb[40].mxu0 %vm864_vm2, %v8683_v60  ;;  %v8870_v60 = vld [vmem:[%s10309_s3 + $0x8] sm:$0xff]  }
 0xa55   : > { %7031 = vmatpush3.bf16.msra.mxu0 %v8709_v63  ;;  %7032 = vmatprep.mubr.msk.bf16.mxu0 %vm926_vm4, %v1638_v49 }
 0xa56   : > { %7048 = vmatprep.subr.bf16.mxu0 %v8857_v43 }
 0xa5c   : > { %7033 = vmatmul.mubr.msk.bf16.vlgmr.msra.gmra.mrb[44].mxu0 %vm926_vm4, %v1639_v18 }
 0xa5d   : > { %7049 = vmatpush3.bf16.msra.mxu0 %v8857_v43 }
 0xa5e   : > { %7050 = vmatprep.subr.bf16.mxu0 %v8870_v60 }
 0xa61   : > { %7051 = vmatpush3.bf16.msra.mxu0 %v8870_v60 }
 0xa62   : > { %7088 = vmatprep.subr.bf16.mxu0 %v8877_v61 }
 0xb27   : > { %v7028_v19 = vpop.f32.mrb[40].mxu0 }
 0xb28   : > { %v1623_v20 = vpop.f32.mrb[41].mxu0 }
 0xb29   : > { %v7029_v21 = vpop.f32.mrb[42].mxu0 }
 0xb2a   : > { %v1696_v22 = vpack.c.bf16 %v7029_v21, %v7028_v19  ;;  %v1626_v9 = vpop.f32.mrb[43].mxu0 }
 0xb2b   : > { %v1695_v25 = vpack.c.bf16 %v1626_v9, %v1623_v20 }
 0xb2d   : > { %7044 = vmatprep.mubr.msk.bf16.mxu1 %vm724_vm1, %v1695_v25 }
 0xb2e   : > { %7045 = vmatmul.mubr.msk.bf16.vlgmr.msra.gmra.mrb[28].mxu1 %vm724_vm1, %v1696_v22 }
 0xb2f   : > { %7060 = vmatprep.mubr.msk.bf16.mxu1 %vm341_vm0, %v8885_v26  ;;  %v7034_v10 = vpop.f32.mrb[44].mxu0 }
 0xb30   : > { %v1680_v11 = vpop.f32.mrb[45].mxu0  ;;  %v1689_v35 = vadd.f32 %v7034_v10, %v8736_v3 }
 0xb31   : > { %v7035_v28 = vpop.f32.mrb[46].mxu0  ;;  %v1681_v6 = vadd.f32 %v8736_v3, %v1680_v11 }
 0xb32   : > { %v1683_v57 = vpop.f32.mrb[47].mxu0  ;;  %v1692_v37 = vadd.f32 %v7035_v28, %v8736_v3 }
 0xb33   : > { %v1684_v34 = vadd.f32 %v8736_v3, %v1683_v57 }
 0xc01   : > { %v7046_v59 = vpop.f32.mrb[28].mxu1 }
 0xc02   : > { %v1737_v58 = vpop.f32.mrb[29].mxu1  ;;  %v1754_v39 = vadd.f32 %v7046_v59, %v1689_v35 }
 0xc03   : > { %1784 = vrot.lane.b32.xlu0 %v1737_v58, %s8384_s26  ;;  %v7047_v2 = vpop.f32.mrb[30].mxu1  ;;  %v1752_v36 = vadd.f32 %v1737_v58, %v1681_v6 }
 0xc04   : > { %v1740_v5 = vpop.f32.mrb[31].mxu1  ;;  %v1755_v53 = vadd.f32 %v7047_v2, %v1692_v37  ;;  %v6278_v52 = vmul.f32 -1.442695, %v1754_v39 }
 0xc05   : > { %1786 = vrot.lane.b32.xlu1 %v1740_v5, %s8384_s26  ;;  %v1753_v38 = vadd.f32 %v1740_v5, %v1684_v34  ;;  %v6276_v0 = vmul.f32 -1.442695, %v1752_v36 }
 0xc06   : > { %v6279_v4 = vmul.f32 -1.442695, %v1755_v53 }
 0xc07   : > { %1788 = vrot.lane.b32.xlu0 %v7046_v59, %s8384_s26  ;;  %v6277_v42 = vmul.f32 -1.442695, %v1753_v38  ;;  %7872 = vpow2.f32 %v6276_v0 }
 0xc09   : > { %1790 = vrot.lane.b32.xlu1 %v7047_v2, %s8384_s26  ;;  %7874 = vpow2.f32 %v6277_v42 }
 0xc0a   : > { %7876 = vpow2.f32 %v6278_v52 }
 0xc0b   : > { %7878 = vpow2.f32 %v6279_v4 }
 0xc11   : > { %v7873_v47 = vpop.eup %7872 }
 0xc12   : > { %v1768_v54 = vadd.f32 1.0, %v7873_v47 }
 0xc13   : > { %v7875_v48 = vpop.eup %7874 }
 0xc14   : > { %v7877_v50 = vpop.eup %7876  ;;  %v1769_v51 = vadd.f32 1.0, %v7875_v48  ;;  %7880 = vrcp.f32 %v1768_v54  ;;  %v8929_v54 = vld [vmem:[%s10309_s3 + $0x18] sm:$0xff]  }
 0xc15   : > { %v7879_v56 = vpop.eup %7878  ;;  %v1770_v55 = vadd.f32 1.0, %v7877_v50  ;;  %v8936_v50 = vld [vmem:[%s10309_s3 + $0x20] sm:$0xff]  }
 0xc16   : > { %v1771_v3 = vadd.f32 1.0, %v7879_v56  ;;  %7882 = vrcp.f32 %v1769_v51  ;;  %v8943_v51 = vld [vmem:[%s10309_s3 + $0x28] sm:$0xff]  }
 0xc17   : > { %7884 = vrcp.f32 %v1770_v55 }
 0xc18   : > { %7886 = vrcp.f32 %v1771_v3 }
 0xc1e   : > { %v7881_v1 = vpop.eup %7880 }
 0xc1f   : > { %v1824_v9 = vsub.f32 1.0, %v7881_v1  ;;  %v1848_v57 = vmul.f32 %v7881_v1, %v8750_v7 }
 0xc20   : > { %v7883_v29 = vpop.eup %7882 }
 0xc21   : > { %v7885_v27 = vpop.eup %7884  ;;  %v1825_v11 = vsub.f32 1.0, %v7883_v29  ;;  %v1849_v59 = vmul.f32 %v7883_v29, %v8752_v31 }
 0xc22   : > { %v7887_v8 = vpop.eup %7886  ;;  %v1826_v2 = vsub.f32 1.0, %v7885_v27  ;;  %v1850_v38 = vmul.f32 %v7885_v27, %v8756_v40 }
 0xc23   : > { %v1827_v36 = vsub.f32 1.0, %v7887_v8  ;;  %v1851_v39 = vmul.f32 %v7887_v8, %v8758_v41 }
 0xc75   : > { %v1785_v45 = vpop.permute.xlu0 %1784 }
 0xc76   : > { %v1796_v23 = vmul.f32 %v7881_v1, %v1785_v45 }
 0xc77   : > { %v1787_v24 = vpop.permute.xlu1 %1786 }
 0xc78   : > { %v1797_v12 = vmul.f32 %v7883_v29, %v1787_v24  ;;  %1804 = vrot.lane.b32.xlu0 %v1796_v23, %s8384_s26 }
 0xc79   : > { %v1789_v13 = vpop.permute.xlu0 %1788 }
 0xc7a   : > { %v1798_v14 = vmul.f32 %v7885_v27, %v1789_v13  ;;  %1806 = vrot.lane.b32.xlu1 %v1797_v12, %s8384_s26  ;;  %v8952_v12 = vld [vmem:[%s10308_s2 + $0x38] sm:$0xff]   ;;  %v8959_v27 = vld [vmem:[%s10308_s2 + $0x40] sm:$0xff]   ;;  %v8966_v13 = vld [vmem:[%s10309_s3 + $0x30] sm:$0xff]  }
 0xc7b   : > { %v1791_v30 = vpop.permute.xlu1 %1790 }
 0xc7c   : > { %v1799_v32 = vmul.f32 %v7887_v8, %v1791_v30  ;;  %1808 = vrot.lane.b32.xlu0 %v1798_v14, %s8384_s26  ;;  %v8972_v14 = vld [vmem:[%s10308_s2 + $0x48] sm:$0xff]   ;;  %v8979_v8 = vld [vmem:[%s10308_s2 + $0x50] sm:$0xff]   ;;  %v8986_v30 = vld [vmem:[%s10308_s2 + $0x58] sm:$0xff]  }
 0xc7e   : > { %1810 = vrot.lane.b32.xlu1 %v1799_v32, %s8384_s26  ;;  %v8993_v32 = vld [vmem:[%s10308_s2] sm:$0xff]  }
 0xcea   : > { %v1805_v33 = vpop.permute.xlu0 %1804 }
 0xceb   : > { %v1816_v15 = vadd.f32 %v1805_v33, %v1681_v6  ;;  %v9000_v33 = vld [vmem:[%s10308_s2 + $0x8] sm:$0xff]  }
 0xcec   : > { %v1807_v44 = vpop.permute.xlu1 %1806 }
 0xced   : > { %7888 = vtanh.f32 %v1816_v15  ;;  %v1817_v46 = vadd.f32 %v1807_v44, %v1684_v34  ;;  %v9007_v15 = vld [vmem:[%s10308_s2 + $0x10] sm:$0xff]   ;;  %v9015_v44 = vld [vmem:[%s10309_s3 + $0x38] sm:$0xff]  }
 0xcee   : > { %v1809_v49 = vpop.permute.xlu0 %1808 }
 0xcef   : > { %7890 = vtanh.f32 %v1817_v46  ;;  %v1818_v16 = vadd.f32 %v1809_v49, %v1689_v35  ;;  %v9022_v46 = vld [vmem:[%s10309_s3 + $0x40] sm:$0xff]   ;;  %v9028_v49 = vld [vmem:[%s10308_s2 + $0x18] sm:$0xff]  }
 0xcf0   : > { %v1811_v17 = vpop.permute.xlu1 %1810 }
 0xcf1   : > { %7892 = vtanh.f32 %v1818_v16  ;;  %v1819_v18 = vadd.f32 %v1811_v17, %v1692_v37  ;;  %v9035_v16 = vld [vmem:[%s10308_s2 + $0x20] sm:$0xff]   ;;  %v9045_v17 = vld [vmem:[%s10308_s2 + $0x28] sm:$0xff]  }
 0xcf3   : > { %7894 = vtanh.f32 %v1819_v18 }
 0xcf7   : > { %v7889_v19 = vpop.eup %7888 }
 0xcf8   : > { %1832 = vrot.lane.b32.xlu0 %v7889_v19, %s8385_s16  ;;  %v9052_v19 = vld [vmem:[%s10310_s4] ss:$0 sm:$0xff] }
 0xcf9   : > { %v7891_v20 = vpop.eup %7890 }
 0xcfa   : > { %1834 = vrot.lane.b32.xlu1 %v7891_v20, %s8385_s16 }
 0xcfb   : > { %v7893_v21 = vpop.eup %7892 }
 0xcfc   : > { %1836 = vrot.lane.b32.xlu0 %v7893_v21, %s8385_s16 }
 0xcfd   : > { %v7895_v22 = vpop.eup %7894 }
 0xcfe   : > { %1838 = vrot.lane.b32.xlu1 %v7895_v22, %s8385_s16 }
 0xd6a   : > { %v1833_v25 = vpop.permute.xlu0 %1832 }
 0xd6b   : > { %v1844_v10 = vmul.f32 %v1833_v25, %v1824_v9 }
 0xd6c   : > { %v1835_v28 = vpop.permute.xlu1 %1834 }
 0xd6d   : > { %v1845_v58 = vmul.f32 %v1835_v28, %v1825_v11  ;;  %v8907_v6 = vadd.f32 %v1848_v57, %v1844_v10 }
 0xd6e   : > { %v1837_v5 = vpop.permute.xlu0 %1836 }
 0xd6f   : > { %10328 = vst [vmem:[#allocation7_spill] sm:$0xff] %v8907_v6  ;;  %v8909_v34 = vadd.f32 %v1849_v59, %v1845_v58  ;;  %v1846_v35 = vmul.f32 %v1837_v5, %v1826_v2 }
 0xd70   : > { %v1839_v37 = vpop.permute.xlu1 %1838 }
 0xd71   : > { %10329 = vst [vmem:[#allocation8_spill] sm:$0xff] %v8909_v34  ;;  %v1847_v0 = vmul.f32 %v1839_v37, %v1827_v36  ;;  %v1880_v53 = vpack.c.bf16 %v8909_v34, %v8907_v6  ;;  %v8915_v42 = vadd.f32 %v1850_v38, %v1846_v35 }
 0xd73   : > { %10330 = vst [vmem:[#allocation9_spill] sm:$0xff] %v8915_v42  ;;  %v8917_v52 = vadd.f32 %v1851_v39, %v1847_v0  ;;  %1884 = vrot.lane.b32.xlu0 %v1880_v53, %s8385_s16 }
 0xd75   : > { %10331 = vst [vmem:[#allocation10_spill] sm:$0xff] %v8917_v52  ;;  %v1881_v4 = vpack.c.bf16 %v8917_v52, %v8915_v42 }
 0xd77   : > { %1886 = vrot.lane.b32.xlu1 %v1881_v4, %s8385_s16 }
 0xde5   : > { %v1885_v47 = vpop.permute.xlu0 %1884 }
 0xde6   : > { %7052 = vmatprep.mubr.msk.bf16.mxu0 %vm341_vm0, %v1885_v47 }
 0xde9   : > { %v1887_v48 = vpop.permute.xlu1 %1886 }
 0xdea   : > { %7053 = vmatmul.mubr.msk.bf16.vlgmr.msra.gmra.mrb[48].mxu0 %vm341_vm0, %v1887_v48 }
 0xdeb   : > { %7089 = vmatpush3.bf16.msra.mxu0 %v8877_v61 }
 0xdec   : > { %7090 = vmatprep.subr.bf16.mxu0 %v8929_v54 }
 0xdef   : > { %7091 = vmatpush3.bf16.msra.mxu0 %v8929_v54 }
 0xdf0   : > { %7092 = vmatprep.subr.bf16.mxu0 %v8936_v50 }
 0xdf3   : > { %7093 = vmatpush3.bf16.msra.mxu0 %v8936_v50 }
 0xdf4   : > { %7094 = vmatprep.subr.bf16.mxu0 %v8943_v51 }
 0xdf7   : > { %7095 = vmatpush3.bf16.msra.mxu0 %v8943_v51 }
 0xebd   : > { %v7054_v56 = vpop.f32.mrb[48].mxu0 }
 0xebe   : > { %v1928_v55 = vpop.f32.mrb[49].mxu0 }
 0xebf   : > { %v7055_v3 = vpop.f32.mrb[50].mxu0 }
 0xec0   : > { %v1944_v1 = vpack.c.bf16 %v7055_v3, %v7054_v56  ;;  %v1931_v45 = vpop.f32.mrb[51].mxu0 }
 0xec1   : > { %v1943_v23 = vpack.c.bf16 %v1931_v45, %v1928_v55 }
 0xec2   : > { %1949 = vrot.lane.b32.xlu1 %v1944_v1, %s8384_s26 }
 0xec3   : > { %1947 = vrot.lane.b32.xlu0 %v1943_v23, %s8384_s26 }
 0xf34   : > { %v1950_v24 = vpop.permute.xlu1 %1949 }
 0xf35   : > { %v1948_v29 = vpop.permute.xlu0 %1947 }
 0xf36   : > { %7056 = vmatprep.subr.bf16.mxu1 %v1948_v29 }
 0xf37   : > { %7057 = vmatpush3.bf16.msra.mxu1 %v1948_v29 }
 0xf38   : > { %7058 = vmatprep.subr.bf16.mxu1 %v1950_v24 }
 0xf3b   : > { %7059 = vmatpush3.bf16.msra.mxu1 %v1950_v24 }
 0xf3c   : > { %7072 = vmatprep.subr.bf16.mxu1 %v1943_v23 }
 0xf3e   : > { %7061 = vmatmul.mubr.msk.bf16.vlgmr.msra.gmra.mrb[32].mxu1 %vm341_vm0, %v8952_v12 }
 0xf3f   : > { %7073 = vmatpush3.bf16.msra.mxu1 %v1943_v23  ;;  %7064 = vmatprep.mubr.msk.bf16.mxu1 %vm341_vm0, %v8959_v27 }
 0xf40   : > { %7074 = vmatprep.subr.bf16.mxu1 %v1944_v1 }
 0xf43   : > { %7075 = vmatpush3.bf16.msra.mxu1 %v1944_v1 }
 0xf44   : > { %7130 = vmatprep.subr.bf16.mxu1 %v8966_v13 }
 0xf46   : > { %7065 = vmatmul.mubr.msk.bf16.gmra.mrb[36].mxu1 %vm341_vm0, %v8972_v14 }
 0xf47   : > { %7068 = vmatprep.mubr.msk.bf16.mxu1 %vm341_vm0, %v8979_v8 }
 0xf4e   : > { %7069 = vmatmul.mubr.msk.bf16.gmra.mrb[40].mxu1 %vm341_vm0, %v8986_v30 }
 0xf4f   : > { %7076 = vmatprep.mubr.msk.bf16.mxu1 %vm341_vm0, %v8993_v32 }
 0xf56   : > { %7077 = vmatmul.mubr.msk.bf16.vlgmr.msra.gmra.mrb[32].mxu1 %vm341_vm0, %v9000_v33 }
 0xf57   : > { %7080 = vmatprep.mubr.msk.bf16.mxu1 %vm341_vm0, %v9007_v15  ;;  %7131 = vmatpush3.bf16.msra.mxu1 %v8966_v13 }
 0xf58   : > { %7132 = vmatprep.subr.bf16.mxu1 %v9015_v44 }
 0xf5b   : > { %7133 = vmatpush3.bf16.msra.mxu1 %v9015_v44 }
 0xf5c   : > { %7134 = vmatprep.subr.bf16.mxu1 %v9022_v46 }
 0xf5e   : > { %7081 = vmatmul.mubr.msk.bf16.gmra.mrb[36].mxu1 %vm341_vm0, %v9028_v49 }
 0xf5f   : > { %7084 = vmatprep.mubr.msk.bf16.mxu1 %vm341_vm0, %v9035_v16  ;;  %7135 = vmatpush3.bf16.msra.mxu1 %v9022_v46 }
 0xf60   : > { %7136 = vmatprep.subr.bf16.mxu1 %v8705_v62 }
 0xf63   : > { %7137 = vmatpush3.bf16.msra.mxu1 %v8705_v62 }
 0xf66   : > { %7085 = vmatmul.mubr.msk.bf16.gmra.mrb[40].mxu1 %vm341_vm0, %v9045_v17 }
0x1029   : > { %v7078_v18 = vpop.f32.mrb[32].mxu1 }
0x102a   : > { %v2117_v20 = vadd.f32 %v9052_v19, %v7078_v18  ;;  %v2068_v21 = vpop.f32.mrb[33].mxu1 }
0x102b   : > { %v2115_v22 = vadd.f32 %v9052_v19, %v2068_v21  ;;  %v7079_v62 = vpop.f32.mrb[34].mxu1 }
0x102c   : > { %7896 = vtanh.f32 %v2117_v20  ;;  %v2118_v9 = vadd.f32 %v9052_v19, %v7079_v62  ;;  %v2071_v25 = vpop.f32.mrb[35].mxu1 }
0x102d   : > { %7898 = vtanh.f32 %v2115_v22  ;;  %v2116_v10 = vadd.f32 %v9052_v19, %v2071_v25 }
0x102e   : > { %7900 = vtanh.f32 %v2118_v9 }
0x102f   : > { %7902 = vtanh.f32 %v2116_v10 }
0x1031   : > { %v7082_v11 = vpop.f32.mrb[36].mxu1 }
0x1032   : > { %v2121_v28 = vadd.f32 %v9052_v19, %v7082_v11  ;;  %v2084_v57 = vpop.f32.mrb[37].mxu1 }
0x1033   : > { %v2119_v59 = vadd.f32 %v9052_v19, %v2084_v57  ;;  %v7083_v58 = vpop.f32.mrb[38].mxu1 }
0x1034   : > { %7904 = vtanh.f32 %v2121_v28  ;;  %v2122_v2 = vadd.f32 %v9052_v19, %v7083_v58  ;;  %v2087_v5 = vpop.f32.mrb[39].mxu1  ;;  %v9075_v28 = vld [vmem:[%s10308_s2 + $0x60] sm:$0xff]  }
0x1035   : > { %7906 = vtanh.f32 %v2119_v59  ;;  %v2120_v35 = vadd.f32 %v9052_v19, %v2087_v5  ;;  %v9082_v59 = vld [vmem:[%s10310_s4 + $0x1] ss:$0 sm:$0xff] }
0x1036   : > { %v7897_v36 = vpop.eup %7896  ;;  %7908 = vtanh.f32 %v2122_v2 }
0x1037   : > { %v7899_v37 = vpop.eup %7898  ;;  %7910 = vtanh.f32 %v2120_v35 }
0x1038   : > { %v7901_v38 = vpop.eup %7900 }
0x1039   : > { %v7903_v39 = vpop.eup %7902  ;;  %v7086_v0 = vpop.f32.mrb[40].mxu1  ;;  %v2140_v53 = vpack.c.bf16 %v7901_v38, %v7897_v36 }
0x103a   : > { %v2125_v4 = vadd.f32 %v9052_v19, %v7086_v0  ;;  %v2100_v47 = vpop.f32.mrb[41].mxu1  ;;  %v2139_v48 = vpack.c.bf16 %v7903_v39, %v7899_v37 }
0x103b   : > { %v2123_v56 = vadd.f32 %v9052_v19, %v2100_v47  ;;  %v7087_v55 = vpop.f32.mrb[42].mxu1 }
0x103c   : > { %7912 = vtanh.f32 %v2125_v4  ;;  %v2126_v3 = vadd.f32 %v9052_v19, %v7087_v55  ;;  %v2103_v1 = vpop.f32.mrb[43].mxu1  ;;  %7096 = vmatprep.mubr.msk.bf16.mxu0 %vm724_vm1, %v2139_v48 }
0x103d   : > { %7914 = vtanh.f32 %v2123_v56  ;;  %v2124_v45 = vadd.f32 %v9052_v19, %v2103_v1  ;;  %7097 = vmatmul.mubr.msk.bf16.vlgmr.msra.gmra.mrb[52].mxu0 %vm724_vm1, %v2140_v53 }
0x103e   : > { %v7905_v23 = vpop.eup %7904  ;;  %7916 = vtanh.f32 %v2126_v3 }
0x103f   : > { %v7907_v29 = vpop.eup %7906  ;;  %7918 = vtanh.f32 %v2124_v45 }
0x1040   : > { %v7909_v24 = vpop.eup %7908 }
0x1041   : > { %v7911_v18 = vpop.eup %7910  ;;  %v2142_v20 = vpack.c.bf16 %v7909_v24, %v7905_v23  ;;  %v9093_v24 = vld [vmem:[%s8624_s28 + $0x10] sm:$0xff] }
0x1042   : > { %v2141_v21 = vpack.c.bf16 %v7911_v18, %v7907_v29 }
0x1044   : > { %7100 = vmatprep.mubr.msk.bf16.mxu0 %vm724_vm1, %v2141_v21 }
0x1045   : > { %7101 = vmatmul.mubr.msk.bf16.gmra.mrb[56].mxu0 %vm724_vm1, %v2142_v20  ;;  %v9097_v20 = vld [vmem:[%s8624_s28 + $0x18] sm:$0xff] }
0x1046   : > { %v7913_v22 = vpop.eup %7912 }
0x1047   : > { %v7915_v62 = vpop.eup %7914 }
0x1048   : > { %v7917_v9 = vpop.eup %7916 }
0x1049   : > { %v7919_v25 = vpop.eup %7918  ;;  %v2144_v10 = vpack.c.bf16 %v7917_v9, %v7913_v22  ;;  %v9102_v9 = vld [vmem:[%s8624_s28] sm:$0xff] }
0x104a   : > { %v2143_v11 = vpack.c.bf16 %v7919_v25, %v7915_v62 }
0x104c   : > { %7104 = vmatprep.mubr.msk.bf16.mxu0 %vm724_vm1, %v2143_v11 }
0x104d   : > { %7105 = vmatmul.mubr.msk.bf16.gmra.mrb[60].mxu0 %vm724_vm1, %v2144_v10  ;;  %v9106_v10 = vld [vmem:[%s8624_s28 + $0x8] sm:$0xff] }
0x104e   : > { %7120 = vmatprep.mubr.msk.bf16.mxu0 %vm864_vm2, %v9075_v28 }
0x1110   : > { %v7098_v57 = vpop.f32.mrb[52].mxu0 }
0x1111   : > { %v2206_v58 = vadd.f32 %v9082_v59, %v7098_v57  ;;  %v2197_v2 = vpop.f32.mrb[53].mxu0 }
0x1112   : > { %v2198_v5 = vadd.f32 %v9082_v59, %v2197_v2  ;;  %v7099_v35 = vpop.f32.mrb[54].mxu0 }
0x1113   : > { %7920 = vtanh.f32 %v2206_v58  ;;  %v2209_v36 = vadd.f32 %v9082_v59, %v7099_v35  ;;  %v2200_v37 = vpop.f32.mrb[55].mxu0 }
0x1114   : > { %7922 = vtanh.f32 %v2198_v5  ;;  %v2201_v38 = vadd.f32 %v9082_v59, %v2200_v37 }
0x1115   : > { %7924 = vtanh.f32 %v2209_v36 }
0x1116   : > { %7926 = vtanh.f32 %v2201_v38 }
0x1118   : > { %v7102_v39 = vpop.f32.mrb[56].mxu0 }
0x1119   : > { %v2222_v0 = vadd.f32 %v9082_v59, %v7102_v39  ;;  %v2213_v53 = vpop.f32.mrb[57].mxu0 }
0x111a   : > { %v2214_v4 = vadd.f32 %v9082_v59, %v2213_v53  ;;  %v7103_v47 = vpop.f32.mrb[58].mxu0 }
0x111b   : > { %7928 = vtanh.f32 %v2222_v0  ;;  %v2225_v48 = vadd.f32 %v9082_v59, %v7103_v47  ;;  %v2216_v56 = vpop.f32.mrb[59].mxu0 }
0x111c   : > { %7930 = vtanh.f32 %v2214_v4  ;;  %v2217_v55 = vadd.f32 %v9082_v59, %v2216_v56  ;;  %v9113_v4 = vld [vmem:[%s8624_s28 + $0x30] sm:$0xff] }
0x111d   : > { %v7921_v3 = vpop.eup %7920  ;;  %7932 = vtanh.f32 %v2225_v48  ;;  %v9117_v48 = vld [vmem:[%s8624_s28 + $0x38] sm:$0xff] }
0x111e   : > { %v7923_v1 = vpop.eup %7922  ;;  %7934 = vtanh.f32 %v2217_v55  ;;  %v2258_v18 = vmul.f32 %v9093_v24, %v7921_v3  ;;  %v9121_v55 = vld [vmem:[%s8624_s28 + $0x20] sm:$0xff] }
0x111f   : > { %v7925_v45 = vpop.eup %7924  ;;  %v2256_v25 = vmul.f32 %v9102_v9, %v7923_v1  ;;  %v9125_v1 = vld [vmem:[%s8624_s28 + $0x28] sm:$0xff] }
0x1120   : > { %v7927_v23 = vpop.eup %7926  ;;  %v7106_v29 = vpop.f32.mrb[60].mxu0  ;;  %v2259_v21 = vmul.f32 %v9097_v20, %v7925_v45 }
0x1121   : > { %v2238_v22 = vadd.f32 %v9082_v59, %v7106_v29  ;;  %v2229_v62 = vpop.f32.mrb[61].mxu0  ;;  %v2257_v11 = vmul.f32 %v9106_v10, %v7927_v23 }
0x1122   : > { %v2230_v57 = vadd.f32 %v9082_v59, %v2229_v62  ;;  %v7107_v58 = vpop.f32.mrb[62].mxu0  ;;  %v2269_v2 = vpack.c.bf16 %v2259_v21, %v2258_v18 }
0x1123   : > { %7936 = vtanh.f32 %v2238_v22  ;;  %v2241_v5 = vadd.f32 %v9082_v59, %v7107_v58  ;;  %v2232_v35 = vpop.f32.mrb[63].mxu0  ;;  %v2268_v36 = vpack.c.bf16 %v2257_v11, %v2256_v25  ;;  %v9129_v25 = vld [vmem:[%s8624_s28 + $0x50] sm:$0xff] }
0x1124   : > { %7938 = vtanh.f32 %v2230_v57  ;;  %v2233_v37 = vadd.f32 %v9082_v59, %v2232_v35  ;;  %v9133_v57 = vld [vmem:[%s8624_s28 + $0x58] sm:$0xff]  ;;  %v9141_v35 = vld [vmem:[%s8624_s28 + $0x48] sm:$0xff] }
0x1125   : > { %v7929_v38 = vpop.eup %7928  ;;  %7940 = vtanh.f32 %v2241_v5  ;;  %7108 = vmatprep.subr.bf16.mxu0 %v2268_v36  ;;  %v9137_v5 = vld [vmem:[%s8624_s28 + $0x40] sm:$0xff] }
0x1126   : > { %v7931_v39 = vpop.eup %7930  ;;  %7942 = vtanh.f32 %v2233_v37  ;;  %7109 = vmatpush3.bf16.msra.mxu0 %v2268_v36  ;;  %v2262_v47 = vmul.f32 %v9113_v4, %v7929_v38 }
0x1127   : > { %v7933_v0 = vpop.eup %7932  ;;  %7110 = vmatprep.subr.bf16.mxu0 %v2269_v2  ;;  %v2260_v3 = vmul.f32 %v9121_v55, %v7931_v39  ;;  %v9147_v39 = vld [vmem:[%s10309_s3 + $0x50] sm:$0x3] }
0x1128   : > { %v7935_v53 = vpop.eup %7934  ;;  %v2263_v56 = vmul.f32 %v9117_v48, %v7933_v0  ;;  %v9154_v0 = vld [vmem:[%s10308_s2 + $0x68] sm:$0xff]  }
0x1129   : > { %v2261_v45 = vmul.f32 %v9125_v1, %v7935_v53  ;;  %v1876_v53 = vld [vmem:[%s8693_s9 + $0x40] sm:$0xff] }
0x112a   : > { %7111 = vmatpush3.bf16.msra.mxu0 %v2269_v2  ;;  %v2271_v23 = vpack.c.bf16 %v2263_v56, %v2262_v47  ;;  %v1877_v47 = vld [vmem:[%s8693_s9 + $0x48] sm:$0xff] }
0x112b   : > { %v2270_v29 = vpack.c.bf16 %v2261_v45, %v2260_v3  ;;  %v2323_v56 = vpack.c.bf16 %v1877_v47, %v1876_v53  ;;  %v1878_v3 = vld [vmem:[%s8693_s9 + $0x50] sm:$0xff]  ;;  %v1879_v45 = vld [vmem:[%s8693_s9 + $0x58] sm:$0xff] }
0x112d   : > { %v7937_v18 = vpop.eup %7936  ;;  %7112 = vmatprep.subr.bf16.mxu0 %v2270_v29 }
0x112e   : > { %v7939_v21 = vpop.eup %7938  ;;  %7113 = vmatpush3.bf16.msra.mxu0 %v2270_v29  ;;  %v2266_v11 = vmul.f32 %v9129_v25, %v7937_v18 }
0x112f   : > { %v7941_v22 = vpop.eup %7940  ;;  %7114 = vmatprep.subr.bf16.mxu0 %v2271_v23  ;;  %v2264_v2 = vmul.f32 %v9137_v5, %v7939_v21 }
0x1130   : > { %v7943_v62 = vpop.eup %7942  ;;  %v2267_v58 = vmul.f32 %v9133_v57, %v7941_v22 }
0x1131   : > { %v2265_v36 = vmul.f32 %v9141_v35, %v7943_v62 }
0x1132   : > { %7115 = vmatpush3.bf16.msra.mxu0 %v2271_v23  ;;  %v2273_v37 = vpack.c.bf16 %v2267_v58, %v2266_v11  ;;  %v2324_v23 = vpack.c.bf16 %v1879_v45, %v1878_v3 }
0x1133   : > { %v2272_v38 = vpack.c.bf16 %v2265_v36, %v2264_v2 }
0x1135   : > { %7116 = vmatprep.subr.bf16.mxu0 %v2272_v38 }
0x1136   : > { %7117 = vmatpush3.bf16.msra.mxu0 %v2272_v38 }
0x1137   : > { %7118 = vmatprep.subr.bf16.mxu0 %v2273_v37 }
0x113a   : > { %7119 = vmatpush3.bf16.msra.mxu0 %v2273_v37 }
0x113b   : > { %7704 = vmatprep.subr.msk.bf16.mxu0 %vm933_vm3, %v9147_v39 }
0x113d   : > { %7121 = vmatmul.mubr.msk.bf16.vlgmr.msra.gmra.mrb[64].mxu0 %vm864_vm2, %v9154_v0 }
0x113e   : > { %7125 = vmatpush3.bf16.msra.mxu0 %v8709_v63  ;;  %7126 = vmatprep.mubr.msk.bf16.mxu0 %vm926_vm4, %v2323_v56 }
0x113f   : > { %7142 = vmatprep.subr.bf16.mxu0 %v8857_v43 }
0x1145   : > { %7127 = vmatmul.mubr.msk.bf16.vlgmr.msra.gmra.mrb[68].mxu0 %vm926_vm4, %v2324_v23 }
0x1146   : > { %7143 = vmatpush3.bf16.msra.mxu0 %v8857_v43 }
0x1147   : > { %7144 = vmatprep.subr.bf16.mxu0 %v8870_v60 }
0x114a   : > { %7145 = vmatpush3.bf16.msra.mxu0 %v8870_v60 }
0x114b   : > { %7182 = vmatprep.subr.bf16.mxu0 %v8877_v61 }
0x1210   : > { %v7122_v29 = vpop.f32.mrb[64].mxu0 }
0x1211   : > { %v2308_v18 = vpop.f32.mrb[65].mxu0 }
0x1212   : > { %v7123_v21 = vpop.f32.mrb[66].mxu0 }
0x1213   : > { %v2381_v22 = vpack.c.bf16 %v7123_v21, %v7122_v29  ;;  %v2311_v62 = vpop.f32.mrb[67].mxu0 }
0x1214   : > { %v2380_v11 = vpack.c.bf16 %v2311_v62, %v2308_v18 }
0x1216   : > { %7138 = vmatprep.mubr.msk.bf16.mxu1 %vm724_vm1, %v2380_v11 }
0x1217   : > { %7139 = vmatmul.mubr.msk.bf16.vlgmr.msra.gmra.mrb[44].mxu1 %vm724_vm1, %v2381_v22 }
0x1218   : > { %7154 = vmatprep.mubr.msk.bf16.mxu1 %vm341_vm0, %v8885_v26  ;;  %v7128_v43 = vpop.f32.mrb[68].mxu0  ;;  %v9181_v26 = vld [vmem:[%s10310_s4 + $0x2] ss:$0 sm:$0xff] }
0x1219   : > { %v2365_v58 = vpop.f32.mrb[69].mxu0  ;;  %v2374_v3 = vadd.f32 %v9181_v26, %v7128_v43 }
0x121a   : > { %v7129_v2 = vpop.f32.mrb[70].mxu0  ;;  %v2366_v47 = vadd.f32 %v9181_v26, %v2365_v58 }
0x121b   : > { %v2368_v36 = vpop.f32.mrb[71].mxu0  ;;  %v2377_v23 = vadd.f32 %v9181_v26, %v7129_v2 }
0x121c   : > { %v2369_v56 = vadd.f32 %v9181_v26, %v2368_v36 }
0x12ea   : > { %v7140_v60 = vpop.f32.mrb[44].mxu1 }
0x12eb   : > { %v2422_v37 = vpop.f32.mrb[45].mxu1  ;;  %v2439_v18 = vadd.f32 %v7140_v60, %v2374_v3 }
0x12ec   : > { %2469 = vrot.lane.b32.xlu0 %v2422_v37, %s8384_s26  ;;  %v7141_v38 = vpop.f32.mrb[46].mxu1  ;;  %v2437_v45 = vadd.f32 %v2422_v37, %v2366_v47 }
0x12ed   : > { %v2425_v53 = vpop.f32.mrb[47].mxu1  ;;  %v2440_v22 = vadd.f32 %v7141_v38, %v2377_v23  ;;  %v6308_v11 = vmul.f32 -1.442695, %v2439_v18 }
0x12ee   : > { %2471 = vrot.lane.b32.xlu1 %v2425_v53, %s8384_s26  ;;  %v2438_v29 = vadd.f32 %v2425_v53, %v2369_v56  ;;  %v6306_v21 = vmul.f32 -1.442695, %v2437_v45 }
0x12ef   : > { %v6309_v41 = vmul.f32 -1.442695, %v2440_v22 }
0x12f0   : > { %2473 = vrot.lane.b32.xlu0 %v7140_v60, %s8384_s26  ;;  %v6307_v62 = vmul.f32 -1.442695, %v2438_v29  ;;  %7944 = vpow2.f32 %v6306_v21 }
0x12f2   : > { %2475 = vrot.lane.b32.xlu1 %v7141_v38, %s8384_s26  ;;  %7946 = vpow2.f32 %v6307_v62 }
0x12f3   : > { %7948 = vpow2.f32 %v6308_v11 }
0x12f4   : > { %7950 = vpow2.f32 %v6309_v41 }
0x12fa   : > { %v7945_v40 = vpop.eup %7944 }
0x12fb   : > { %v2453_v31 = vadd.f32 1.0, %v7945_v40 }
0x12fc   : > { %v7947_v58 = vpop.eup %7946 }
0x12fd   : > { %v7949_v36 = vpop.eup %7948  ;;  %v2454_v7 = vadd.f32 1.0, %v7947_v58  ;;  %7952 = vrcp.f32 %v2453_v31 }
0x12fe   : > { %v7951_v43 = vpop.eup %7950  ;;  %v2455_v37 = vadd.f32 1.0, %v7949_v36 }
0x12ff   : > { %v2456_v2 = vadd.f32 1.0, %v7951_v43  ;;  %7954 = vrcp.f32 %v2454_v7 }
0x1300   : > { %7956 = vrcp.f32 %v2455_v37 }
0x1301   : > { %7958 = vrcp.f32 %v2456_v2 }
0x1307   : > { %v7953_v60 = vpop.eup %7952 }
0x1309   : > { %v7955_v45 = vpop.eup %7954 }
0x130a   : > { %v7957_v41 = vpop.eup %7956 }
0x130b   : > { %v7959_v22 = vpop.eup %7958 }
0x135e   : > { %v2470_v38 = vpop.permute.xlu0 %2469 }
0x135f   : > { %v2481_v53 = vmul.f32 %v7953_v60, %v2470_v38 }
0x1360   : > { %v2472_v29 = vpop.permute.xlu1 %2471 }
0x1361   : > { %v2482_v18 = vmul.f32 %v7955_v45, %v2472_v29  ;;  %2489 = vrot.lane.b32.xlu0 %v2481_v53, %s8384_s26 }
0x1362   : > { %v2474_v21 = vpop.permute.xlu0 %2473 }
0x1363   : > { %v2483_v40 = vmul.f32 %v7957_v41, %v2474_v21  ;;  %2491 = vrot.lane.b32.xlu1 %v2482_v18, %s8384_s26 }
0x1364   : > { %v2476_v62 = vpop.permute.xlu1 %2475 }
0x1365   : > { %v2484_v31 = vmul.f32 %v7959_v22, %v2476_v62  ;;  %2493 = vrot.lane.b32.xlu0 %v2483_v40, %s8384_s26 }
0x1367   : > { %2495 = vrot.lane.b32.xlu1 %v2484_v31, %s8384_s26  ;;  %v2534_v31 = vmul.f32 %v7955_v45, %v8909_v34 }
0x13d3   : > { %v2490_v7 = vpop.permute.xlu0 %2489 }
0x13d4   : > { %v2501_v11 = vadd.f32 %v2490_v7, %v2366_v47 }
0x13d5   : > { %v2492_v58 = vpop.permute.xlu1 %2491 }
0x13d6   : > { %7960 = vtanh.f32 %v2501_v11  ;;  %v2502_v36 = vadd.f32 %v2492_v58, %v2369_v56  ;;  %v2509_v56 = vsub.f32 1.0, %v7953_v60  ;;  %v2511_v11 = vsub.f32 1.0, %v7957_v41 }
0x13d7   : > { %v2494_v43 = vpop.permute.xlu0 %2493 }
0x13d8   : > { %7962 = vtanh.f32 %v2502_v36  ;;  %v2503_v37 = vadd.f32 %v2494_v43, %v2374_v3  ;;  %v2510_v3 = vsub.f32 1.0, %v7955_v45 }
0x13d9   : > { %v2496_v2 = vpop.permute.xlu1 %2495 }
0x13da   : > { %7964 = vtanh.f32 %v2503_v37  ;;  %v2504_v38 = vadd.f32 %v2496_v2, %v2377_v23  ;;  %v2533_v23 = vmul.f32 %v7953_v60, %v8907_v6  ;;  %v2512_v2 = vsub.f32 1.0, %v7959_v22 }
0x13dc   : > { %7966 = vtanh.f32 %v2504_v38 }
0x13e0   : > { %v7961_v53 = vpop.eup %7960 }
0x13e1   : > { %2517 = vrot.lane.b32.xlu0 %v7961_v53, %s8385_s16  ;;  %v2535_v53 = vmul.f32 %v7957_v41, %v8915_v42 }
0x13e2   : > { %v7963_v29 = vpop.eup %7962 }
0x13e3   : > { %2519 = vrot.lane.b32.xlu1 %v7963_v29, %s8385_s16  ;;  %v2536_v29 = vmul.f32 %v7959_v22, %v8917_v52 }
0x13e4   : > { %v7965_v18 = vpop.eup %7964 }
0x13e5   : > { %2521 = vrot.lane.b32.xlu0 %v7965_v18, %s8385_s16 }
0x13e6   : > { %v7967_v47 = vpop.eup %7966 }
0x13e7   : > { %2523 = vrot.lane.b32.xlu1 %v7967_v47, %s8385_s16 }
0x1453   : > { %v2518_v21 = vpop.permute.xlu0 %2517 }
0x1454   : > { %v2529_v40 = vmul.f32 %v2518_v21, %v2509_v56 }
0x1455   : > { %v2520_v62 = vpop.permute.xlu1 %2519 }
0x1456   : > { %v2530_v7 = vmul.f32 %v2520_v62, %v2510_v3  ;;  %v9197_v36 = vadd.f32 %v2533_v23, %v2529_v40 }
0x1457   : > { %v2522_v58 = vpop.permute.xlu0 %2521 }
0x1458   : > { %10332 = vst [vmem:[#allocation11_spill] sm:$0xff] %v9197_v36  ;;  %v9199_v43 = vadd.f32 %v2534_v31, %v2530_v7  ;;  %v2531_v37 = vmul.f32 %v2522_v58, %v2511_v11 }
0x1459   : > { %v2524_v38 = vpop.permute.xlu1 %2523 }
0x145a   : > { %10333 = vst [vmem:[#allocation12_spill] sm:$0xff] %v9199_v43  ;;  %v2532_v18 = vmul.f32 %v2524_v38, %v2512_v2  ;;  %v2565_v60 = vpack.c.bf16 %v9199_v43, %v9197_v36  ;;  %v9205_v47 = vadd.f32 %v2535_v53, %v2531_v37 }
0x145c   : > { %10334 = vst [vmem:[#allocation13_spill] sm:$0xff] %v9205_v47  ;;  %v9207_v45 = vadd.f32 %v2536_v29, %v2532_v18  ;;  %2569 = vrot.lane.b32.xlu0 %v2565_v60, %s8385_s16 }
0x145e   : > { %10335 = vst [vmem:[#allocation14_spill] sm:$0xff] %v9207_v45  ;;  %v2566_v56 = vpack.c.bf16 %v9207_v45, %v9205_v47 }
0x1460   : > { %2571 = vrot.lane.b32.xlu1 %v2566_v56, %s8385_s16 }
0x14ce   : > { %v2570_v21 = vpop.permute.xlu0 %2569 }
0x14cf   : > { %7146 = vmatprep.mubr.msk.bf16.mxu0 %vm341_vm0, %v2570_v21 }
0x14d2   : > { %v2572_v41 = vpop.permute.xlu1 %2571 }
0x14d3   : > { %7147 = vmatmul.mubr.msk.bf16.vlgmr.msra.gmra.mrb[72].mxu0 %vm341_vm0, %v2572_v41 }
0x14d4   : > { %7183 = vmatpush3.bf16.msra.mxu0 %v8877_v61 }
0x14d5   : > { %7184 = vmatprep.subr.bf16.mxu0 %v8929_v54 }
0x14d8   : > { %7185 = vmatpush3.bf16.msra.mxu0 %v8929_v54 }
0x14d9   : > { %7186 = vmatprep.subr.bf16.mxu0 %v8936_v50 }
0x14dc   : > { %7187 = vmatpush3.bf16.msra.mxu0 %v8936_v50  ;;  %v9253_v50 = vld [vmem:[%s10309_s3 + $0x48] sm:$0xff]  }
0x14dd   : > { %7188 = vmatprep.subr.bf16.mxu0 %v8943_v51 }
0x14e0   : > { %7189 = vmatpush3.bf16.msra.mxu0 %v8943_v51 }
0x15a6   : > { %v7148_v22 = vpop.f32.mrb[72].mxu0 }
0x15a7   : > { %v2613_v40 = vpop.f32.mrb[73].mxu0 }
0x15a8   : > { %v7149_v3 = vpop.f32.mrb[74].mxu0 }
0x15a9   : > { %v2629_v62 = vpack.c.bf16 %v7149_v3, %v7148_v22  ;;  %v2616_v23 = vpop.f32.mrb[75].mxu0 }
0x15aa   : > { %v2628_v31 = vpack.c.bf16 %v2616_v23, %v2613_v40 }
0x15ab   : > { %2634 = vrot.lane.b32.xlu1 %v2629_v62, %s8384_s26 }
0x15ac   : > { %2632 = vrot.lane.b32.xlu0 %v2628_v31, %s8384_s26 }
0x161d   : > { %v2635_v54 = vpop.permute.xlu1 %2634 }
0x161e   : > { %v2633_v61 = vpop.permute.xlu0 %2632 }
0x161f   : > { %7150 = vmatprep.subr.bf16.mxu1 %v2633_v61 }
0x1620   : > { %7151 = vmatpush3.bf16.msra.mxu1 %v2633_v61 }
0x1621   : > { %7152 = vmatprep.subr.bf16.mxu1 %v2635_v54 }
0x1624   : > { %7153 = vmatpush3.bf16.msra.mxu1 %v2635_v54 }
0x1625   : > { %7166 = vmatprep.subr.bf16.mxu1 %v2628_v31 }
0x1627   : > { %7155 = vmatmul.mubr.msk.bf16.vlgmr.msra.gmra.mrb[48].mxu1 %vm341_vm0, %v8952_v12 }
0x1628   : > { %7167 = vmatpush3.bf16.msra.mxu1 %v2628_v31  ;;  %7158 = vmatprep.mubr.msk.bf16.mxu1 %vm341_vm0, %v8959_v27 }
0x1629   : > { %7168 = vmatprep.subr.bf16.mxu1 %v2629_v62 }
0x162c   : > { %7169 = vmatpush3.bf16.msra.mxu1 %v2629_v62 }
0x162d   : > { %7224 = vmatprep.subr.bf16.mxu1 %v8966_v13 }
0x162f   : > { %7159 = vmatmul.mubr.msk.bf16.gmra.mrb[52].mxu1 %vm341_vm0, %v8972_v14 }
0x1630   : > { %7162 = vmatprep.mubr.msk.bf16.mxu1 %vm341_vm0, %v8979_v8 }
0x1637   : > { %7163 = vmatmul.mubr.msk.bf16.gmra.mrb[56].mxu1 %vm341_vm0, %v8986_v30 }
0x1638   : > { %7170 = vmatprep.mubr.msk.bf16.mxu1 %vm341_vm0, %v8993_v32 }
0x163f   : > { %7171 = vmatmul.mubr.msk.bf16.vlgmr.msra.gmra.mrb[48].mxu1 %vm341_vm0, %v9000_v33 }
0x1640   : > { %7174 = vmatprep.mubr.msk.bf16.mxu1 %vm341_vm0, %v9007_v15  ;;  %7225 = vmatpush3.bf16.msra.mxu1 %v8966_v13 }
0x1641   : > { %7226 = vmatprep.subr.bf16.mxu1 %v9015_v44 }
0x1644   : > { %7227 = vmatpush3.bf16.msra.mxu1 %v9015_v44 }
0x1645   : > { %7228 = vmatprep.subr.bf16.mxu1 %v9022_v46 }
0x1647   : > { %7175 = vmatmul.mubr.msk.bf16.gmra.mrb[52].mxu1 %vm341_vm0, %v9028_v49 }
0x1648   : > { %7178 = vmatprep.mubr.msk.bf16.mxu1 %vm341_vm0, %v9035_v16  ;;  %7229 = vmatpush3.bf16.msra.mxu1 %v9022_v46 }
0x1649   : > { %7230 = vmatprep.subr.bf16.mxu1 %v9253_v50 }
0x164c   : > { %7231 = vmatpush3.bf16.msra.mxu1 %v9253_v50 }
0x164f   : > { %7179 = vmatmul.mubr.msk.bf16.gmra.mrb[56].mxu1 %vm341_vm0, %v9045_v17 }
0x1712   : > { %v7172_v51 = vpop.f32.mrb[48].mxu1 }
0x1713   : > { %v2802_v12 = vadd.f32 %v9052_v19, %v7172_v51  ;;  %v2753_v27 = vpop.f32.mrb[49].mxu1 }
0x1714   : > { %v2800_v13 = vadd.f32 %v9052_v19, %v2753_v27  ;;  %v7173_v14 = vpop.f32.mrb[50].mxu1 }
0x1715   : > { %7968 = vtanh.f32 %v2802_v12  ;;  %v2803_v8 = vadd.f32 %v9052_v19, %v7173_v14  ;;  %v2756_v30 = vpop.f32.mrb[51].mxu1 }
0x1716   : > { %7970 = vtanh.f32 %v2800_v13  ;;  %v2801_v32 = vadd.f32 %v9052_v19, %v2756_v30 }
0x1717   : > { %7972 = vtanh.f32 %v2803_v8 }
0x1718   : > { %7974 = vtanh.f32 %v2801_v32 }
0x171a   : > { %v7176_v33 = vpop.f32.mrb[52].mxu1 }
0x171b   : > { %v2806_v15 = vadd.f32 %v9052_v19, %v7176_v33  ;;  %v2769_v44 = vpop.f32.mrb[53].mxu1 }
0x171c   : > { %v2804_v46 = vadd.f32 %v9052_v19, %v2769_v44  ;;  %v7177_v49 = vpop.f32.mrb[54].mxu1 }
0x171d   : > { %7976 = vtanh.f32 %v2806_v15  ;;  %v2807_v16 = vadd.f32 %v9052_v19, %v7177_v49  ;;  %v2772_v17 = vpop.f32.mrb[55].mxu1 }
0x171e   : > { %7978 = vtanh.f32 %v2804_v46  ;;  %v2805_v7 = vadd.f32 %v9052_v19, %v2772_v17 }
0x171f   : > { %v7969_v11 = vpop.eup %7968  ;;  %7980 = vtanh.f32 %v2807_v16 }
0x1720   : > { %v7971_v58 = vpop.eup %7970  ;;  %7982 = vtanh.f32 %v2805_v7 }
0x1721   : > { %v7973_v37 = vpop.eup %7972 }
0x1722   : > { %v7975_v2 = vpop.eup %7974  ;;  %v7180_v38 = vpop.f32.mrb[56].mxu1  ;;  %v2825_v53 = vpack.c.bf16 %v7973_v37, %v7969_v11 }
0x1723   : > { %v2810_v29 = vadd.f32 %v9052_v19, %v7180_v38  ;;  %v2785_v18 = vpop.f32.mrb[57].mxu1  ;;  %v2824_v60 = vpack.c.bf16 %v7975_v2, %v7971_v58 }
0x1724   : > { %v2808_v56 = vadd.f32 %v9052_v19, %v2785_v18  ;;  %v7181_v21 = vpop.f32.mrb[58].mxu1 }
0x1725   : > { %7984 = vtanh.f32 %v2810_v29  ;;  %v2811_v41 = vadd.f32 %v9052_v19, %v7181_v21  ;;  %v2788_v22 = vpop.f32.mrb[59].mxu1  ;;  %7190 = vmatprep.mubr.msk.bf16.mxu0 %vm724_vm1, %v2824_v60 }
0x1726   : > { %7986 = vtanh.f32 %v2808_v56  ;;  %v2809_v40 = vadd.f32 %v9052_v19, %v2788_v22  ;;  %7191 = vmatmul.mubr.msk.bf16.vlgmr.msra.gmra.mrb[76].mxu0 %vm724_vm1, %v2825_v53 }
0x1727   : > { %v7977_v3 = vpop.eup %7976  ;;  %7988 = vtanh.f32 %v2811_v41 }
0x1728   : > { %v7979_v62 = vpop.eup %7978  ;;  %7990 = vtanh.f32 %v2809_v40 }
0x1729   : > { %v7981_v23 = vpop.eup %7980 }
0x172a   : > { %v7983_v31 = vpop.eup %7982  ;;  %v2827_v61 = vpack.c.bf16 %v7981_v23, %v7977_v3 }
0x172b   : > { %v2826_v54 = vpack.c.bf16 %v7983_v31, %v7979_v62 }
0x172d   : > { %7194 = vmatprep.mubr.msk.bf16.mxu0 %vm724_vm1, %v2826_v54 }
0x172e   : > { %7195 = vmatmul.mubr.msk.bf16.gmra.mrb[80].mxu0 %vm724_vm1, %v2827_v61 }
0x172f   : > { %v7985_v51 = vpop.eup %7984 }
0x1730   : > { %v7987_v12 = vpop.eup %7986 }
0x1731   : > { %v7989_v27 = vpop.eup %7988 }
0x1732   : > { %v7991_v13 = vpop.eup %7990  ;;  %v2829_v14 = vpack.c.bf16 %v7989_v27, %v7985_v51 }
0x1733   : > { %v2828_v19 = vpack.c.bf16 %v7991_v13, %v7987_v12 }
0x1735   : > { %7198 = vmatprep.mubr.msk.bf16.mxu0 %vm724_vm1, %v2828_v19 }
0x1736   : > { %7199 = vmatmul.mubr.msk.bf16.gmra.mrb[84].mxu0 %vm724_vm1, %v2829_v14 }
0x1737   : > { %7214 = vmatprep.mubr.msk.bf16.mxu0 %vm864_vm2, %v9075_v28 }
0x17f9   : > { %v7192_v8 = vpop.f32.mrb[76].mxu0 }
0x17fa   : > { %v2891_v30 = vadd.f32 %v9082_v59, %v7192_v8  ;;  %v2882_v32 = vpop.f32.mrb[77].mxu0 }
0x17fb   : > { %v2883_v33 = vadd.f32 %v9082_v59, %v2882_v32  ;;  %v7193_v15 = vpop.f32.mrb[78].mxu0 }
0x17fc   : > { %7992 = vtanh.f32 %v2891_v30  ;;  %v2894_v44 = vadd.f32 %v9082_v59, %v7193_v15  ;;  %v2885_v46 = vpop.f32.mrb[79].mxu0 }
0x17fd   : > { %7994 = vtanh.f32 %v2883_v33  ;;  %v2886_v49 = vadd.f32 %v9082_v59, %v2885_v46 }
0x17fe   : > { %7996 = vtanh.f32 %v2894_v44 }
0x17ff   : > { %7998 = vtanh.f32 %v2886_v49  ;;  %v2563_v49 = vld [vmem:[%s8693_s9 + $0x70] sm:$0xff] }
0x1801   : > { %v7196_v16 = vpop.f32.mrb[80].mxu0 }
0x1802   : > { %v2907_v17 = vadd.f32 %v9082_v59, %v7196_v16  ;;  %v2898_v28 = vpop.f32.mrb[81].mxu0  ;;  %v2564_v16 = vld [vmem:[%s8693_s9 + $0x78] sm:$0xff] }
0x1803   : > { %v2899_v7 = vadd.f32 %v9082_v59, %v2898_v28  ;;  %v7197_v11 = vpop.f32.mrb[82].mxu0 }
0x1804   : > { %8000 = vtanh.f32 %v2907_v17  ;;  %v2910_v58 = vadd.f32 %v9082_v59, %v7197_v11  ;;  %v2901_v37 = vpop.f32.mrb[83].mxu0  ;;  %v3009_v17 = vpack.c.bf16 %v2564_v16, %v2563_v49 }
0x1805   : > { %8002 = vtanh.f32 %v2899_v7  ;;  %v2902_v2 = vadd.f32 %v9082_v59, %v2901_v37 }
0x1806   : > { %v7993_v38 = vpop.eup %7992  ;;  %8004 = vtanh.f32 %v2910_v58 }
0x1807   : > { %v7995_v53 = vpop.eup %7994  ;;  %8006 = vtanh.f32 %v2902_v2  ;;  %v2943_v56 = vmul.f32 %v9093_v24, %v7993_v38  ;;  %v9339_v38 = vld [vmem:[%s10308_s2 + $0x30] sm:$0xff]  }
0x1808   : > { %v7997_v29 = vpop.eup %7996  ;;  %v2941_v40 = vmul.f32 %v9102_v9, %v7995_v53 }
0x1809   : > { %v7999_v18 = vpop.eup %7998  ;;  %v7200_v60 = vpop.f32.mrb[84].mxu0  ;;  %v2944_v21 = vmul.f32 %v9097_v20, %v7997_v29 }
0x180a   : > { %v2923_v41 = vadd.f32 %v9082_v59, %v7200_v60  ;;  %v2914_v22 = vpop.f32.mrb[85].mxu0  ;;  %v2942_v3 = vmul.f32 %v9106_v10, %v7999_v18 }
0x180b   : > { %v2915_v62 = vadd.f32 %v9082_v59, %v2914_v22  ;;  %v7201_v23 = vpop.f32.mrb[86].mxu0  ;;  %v2954_v31 = vpack.c.bf16 %v2944_v21, %v2943_v56 }
0x180c   : > { %8008 = vtanh.f32 %v2923_v41  ;;  %v2926_v61 = vadd.f32 %v9082_v59, %v7201_v23  ;;  %v2917_v54 = vpop.f32.mrb[87].mxu0  ;;  %v2953_v51 = vpack.c.bf16 %v2942_v3, %v2941_v40 }
0x180d   : > { %8010 = vtanh.f32 %v2915_v62  ;;  %v2918_v24 = vadd.f32 %v9082_v59, %v2917_v54 }
0x180e   : > { %v8001_v20 = vpop.eup %8000  ;;  %8012 = vtanh.f32 %v2926_v61  ;;  %7202 = vmatprep.subr.bf16.mxu0 %v2953_v51 }
0x180f   : > { %v8003_v12 = vpop.eup %8002  ;;  %8014 = vtanh.f32 %v2918_v24  ;;  %7203 = vmatpush3.bf16.msra.mxu0 %v2953_v51  ;;  %v2947_v27 = vmul.f32 %v9113_v4, %v8001_v20 }
0x1810   : > { %v8005_v9 = vpop.eup %8004  ;;  %7204 = vmatprep.subr.bf16.mxu0 %v2954_v31  ;;  %v2945_v14 = vmul.f32 %v9121_v55, %v8003_v12 }
0x1811   : > { %v8007_v10 = vpop.eup %8006  ;;  %v2948_v13 = vmul.f32 %v9117_v48, %v8005_v9 }
0x1812   : > { %v2946_v19 = vmul.f32 %v9125_v1, %v8007_v10 }
0x1813   : > { %7205 = vmatpush3.bf16.msra.mxu0 %v2954_v31  ;;  %v2956_v8 = vpack.c.bf16 %v2948_v13, %v2947_v27 }
0x1814   : > { %v2955_v59 = vpack.c.bf16 %v2946_v19, %v2945_v14 }
0x1816   : > { %v8009_v30 = vpop.eup %8008  ;;  %7206 = vmatprep.subr.bf16.mxu0 %v2955_v59 }
0x1817   : > { %v8011_v32 = vpop.eup %8010  ;;  %7207 = vmatpush3.bf16.msra.mxu0 %v2955_v59  ;;  %v2951_v44 = vmul.f32 %v9129_v25, %v8009_v30  ;;  %v9311_v25 = vld [vmem:[%s10309_s3] sm:$0xff]  }
0x1818   : > { %v8013_v33 = vpop.eup %8012  ;;  %7208 = vmatprep.subr.bf16.mxu0 %v2956_v8  ;;  %v2949_v48 = vmul.f32 %v9137_v5, %v8011_v32  ;;  %v2562_v5 = vld [vmem:[%s8693_s9 + $0x68] sm:$0xff] }
0x1819   : > { %v8015_v15 = vpop.eup %8014  ;;  %v2952_v4 = vmul.f32 %v9133_v57, %v8013_v33  ;;  %v2561_v57 = vld [vmem:[%s8693_s9 + $0x60] sm:$0xff] }
0x181a   : > { %v2950_v55 = vmul.f32 %v9141_v35, %v8015_v15  ;;  %v3008_v35 = vpack.c.bf16 %v2562_v5, %v2561_v57 }
0x181b   : > { %7209 = vmatpush3.bf16.msra.mxu0 %v2956_v8  ;;  %v2958_v1 = vpack.c.bf16 %v2952_v4, %v2951_v44 }
0x181c   : > { %v2957_v46 = vpack.c.bf16 %v2950_v55, %v2949_v48 }
0x181e   : > { %7210 = vmatprep.subr.bf16.mxu0 %v2957_v46 }
0x181f   : > { %7211 = vmatpush3.bf16.msra.mxu0 %v2957_v46 }
0x1820   : > { %7212 = vmatprep.subr.bf16.mxu0 %v2958_v1 }
0x1823   : > { %7213 = vmatpush3.bf16.msra.mxu0 %v2958_v1 }
0x1824   : > { %7705 = vmatprep.subr.msk.bf16.mxu0 %vm933_vm3, %v9147_v39  ;;  %v9324_v39 = vld [vmem:[%s10309_s3 + $0x8] sm:$0xff]  }
0x1826   : > { %7215 = vmatmul.mubr.msk.bf16.vlgmr.msra.gmra.mrb[88].mxu0 %vm864_vm2, %v9154_v0  ;;  %v9331_v0 = vld [vmem:[%s10309_s3 + $0x10] sm:$0xff]  }
0x1827   : > { %7219 = vmatpush3.bf16.msra.mxu0 %v8709_v63  ;;  %7220 = vmatprep.mubr.msk.bf16.mxu0 %vm926_vm4, %v3008_v35 }
0x1828   : > { %7236 = vmatprep.subr.bf16.mxu0 %v9311_v25 }
0x182e   : > { %7221 = vmatmul.mubr.msk.bf16.vlgmr.msra.gmra.mrb[92].mxu0 %vm926_vm4, %v3009_v17 }
0x182f   : > { %7237 = vmatpush3.bf16.msra.mxu0 %v9311_v25 }
0x1830   : > { %7238 = vmatprep.subr.bf16.mxu0 %v9324_v39 }
0x1833   : > { %7239 = vmatpush3.bf16.msra.mxu0 %v9324_v39 }
0x1834   : > { %7276 = vmatprep.subr.bf16.mxu0 %v9331_v0 }
0x18f9   : > { %v7216_v28 = vpop.f32.mrb[88].mxu0 }
0x18fa   : > { %v2993_v7 = vpop.f32.mrb[89].mxu0 }
0x18fb   : > { %v7217_v11 = vpop.f32.mrb[90].mxu0 }
0x18fc   : > { %v3066_v58 = vpack.c.bf16 %v7217_v11, %v7216_v28  ;;  %v2996_v37 = vpop.f32.mrb[91].mxu0 }
0x18fd   : > { %v3065_v2 = vpack.c.bf16 %v2996_v37, %v2993_v7 }
0x18ff   : > { %7232 = vmatprep.mubr.msk.bf16.mxu1 %vm724_vm1, %v3065_v2 }
0x1900   : > { %7233 = vmatmul.mubr.msk.bf16.vlgmr.msra.gmra.mrb[60].mxu1 %vm724_vm1, %v3066_v58 }
0x1901   : > { %7248 = vmatprep.mubr.msk.bf16.mxu1 %vm341_vm0, %v9339_v38  ;;  %v7222_v53 = vpop.f32.mrb[92].mxu0 }
0x1902   : > { %v3050_v29 = vpop.f32.mrb[93].mxu0  ;;  %v3059_v62 = vadd.f32 %v9181_v26, %v7222_v53 }
0x1903   : > { %v7223_v18 = vpop.f32.mrb[94].mxu0  ;;  %v3051_v40 = vadd.f32 %v9181_v26, %v3050_v29 }
0x1904   : > { %v3053_v60 = vpop.f32.mrb[95].mxu0  ;;  %v3062_v31 = vadd.f32 %v9181_v26, %v7223_v18 }
0x1905   : > { %v3054_v3 = vadd.f32 %v9181_v26, %v3053_v60 }
0x19d3   : > { %v7234_v56 = vpop.f32.mrb[60].mxu1 }
0x19d4   : > { %v3107_v21 = vpop.f32.mrb[61].mxu1  ;;  %v3124_v54 = vadd.f32 %v7234_v56, %v3059_v62 }
0x19d5   : > { %3154 = vrot.lane.b32.xlu0 %v3107_v21, %s8384_s26  ;;  %v7235_v41 = vpop.f32.mrb[62].mxu1  ;;  %v3122_v23 = vadd.f32 %v3107_v21, %v3051_v40 }
0x19d6   : > { %v3110_v22 = vpop.f32.mrb[63].mxu1  ;;  %v3125_v24 = vadd.f32 %v7235_v41, %v3062_v31  ;;  %v6338_v12 = vmul.f32 -1.442695, %v3124_v54 }
0x19d7   : > { %3156 = vrot.lane.b32.xlu1 %v3110_v22, %s8384_s26  ;;  %v3123_v61 = vadd.f32 %v3110_v22, %v3054_v3  ;;  %v6336_v51 = vmul.f32 -1.442695, %v3122_v23 }
0x19d8   : > { %v6339_v9 = vmul.f32 -1.442695, %v3125_v24 }
0x19d9   : > { %3158 = vrot.lane.b32.xlu0 %v7234_v56, %s8384_s26  ;;  %v6337_v20 = vmul.f32 -1.442695, %v3123_v61  ;;  %8016 = vpow2.f32 %v6336_v51 }
0x19db   : > { %3160 = vrot.lane.b32.xlu1 %v7235_v41, %s8384_s26  ;;  %8018 = vpow2.f32 %v6337_v20 }
0x19dc   : > { %8020 = vpow2.f32 %v6338_v12 }
0x19dd   : > { %8022 = vpow2.f32 %v6339_v9 }
0x19e3   : > { %v8017_v10 = vpop.eup %8016 }
0x19e4   : > { %v3138_v13 = vadd.f32 1.0, %v8017_v10 }
0x19e5   : > { %v8019_v27 = vpop.eup %8018 }
0x19e6   : > { %v8021_v14 = vpop.eup %8020  ;;  %v3139_v19 = vadd.f32 1.0, %v8019_v27  ;;  %8024 = vrcp.f32 %v3138_v13 }
0x19e7   : > { %v8023_v8 = vpop.eup %8022  ;;  %v3140_v59 = vadd.f32 1.0, %v8021_v14 }
0x19e8   : > { %v3141_v26 = vadd.f32 1.0, %v8023_v8  ;;  %8026 = vrcp.f32 %v3139_v19 }
0x19e9   : > { %8028 = vrcp.f32 %v3140_v59  ;;  %v9383_v59 = vld [vmem:[%s10309_s3 + $0x18] sm:$0xff]  }
0x19ea   : > { %8030 = vrcp.f32 %v3141_v26  ;;  %v9390_v26 = vld [vmem:[%s10309_s3 + $0x20] sm:$0xff]  }
0x19f0   : > { %v8025_v30 = vpop.eup %8024 }
0x19f1   : > { %v3194_v18 = vsub.f32 1.0, %v8025_v30  ;;  %v3218_v22 = vmul.f32 %v8025_v30, %v9197_v36 }
0x19f2   : > { %v8027_v15 = vpop.eup %8026 }
0x19f3   : > { %v8029_v48 = vpop.eup %8028  ;;  %v3195_v21 = vsub.f32 1.0, %v8027_v15 }
0x19f4   : > { %v8031_v46 = vpop.eup %8030  ;;  %v3220_v20 = vmul.f32 %v8029_v48, %v9205_v47 }
0x19f5   : > { %v3197_v51 = vsub.f32 1.0, %v8031_v46  ;;  %v3221_v12 = vmul.f32 %v8031_v46, %v9207_v45 }
0x1a47   : > { %v3155_v32 = vpop.permute.xlu0 %3154 }
0x1a48   : > { %v3166_v33 = vmul.f32 %v8025_v30, %v3155_v32  ;;  %v9397_v30 = vld [vmem:[%s10309_s3 + $0x28] sm:$0xff]  }
0x1a49   : > { %v3157_v44 = vpop.permute.xlu1 %3156 }
0x1a4a   : > { %v3167_v4 = vmul.f32 %v8027_v15, %v3157_v44  ;;  %3174 = vrot.lane.b32.xlu0 %v3166_v33, %s8384_s26 }
0x1a4b   : > { %v3159_v55 = vpop.permute.xlu0 %3158 }
0x1a4c   : > { %v3168_v1 = vmul.f32 %v8029_v48, %v3159_v55  ;;  %3176 = vrot.lane.b32.xlu1 %v3167_v4, %s8384_s26 }
0x1a4d   : > { %v3161_v57 = vpop.permute.xlu1 %3160 }
0x1a4e   : > { %v3169_v5 = vmul.f32 %v8031_v46, %v3161_v57  ;;  %3178 = vrot.lane.b32.xlu0 %v3168_v1, %s8384_s26  ;;  %v9406_v46 = vld [vmem:[%s10308_s2 + $0x38] sm:$0xff]   ;;  %v9413_v57 = vld [vmem:[%s10308_s2 + $0x40] sm:$0xff]  }
0x1a50   : > { %3180 = vrot.lane.b32.xlu1 %v3169_v5, %s8384_s26  ;;  %v9420_v5 = vld [vmem:[%s10309_s3 + $0x30] sm:$0xff]  }
0x1abc   : > { %v3175_v35 = vpop.permute.xlu0 %3174 }
0x1abd   : > { %v3186_v49 = vadd.f32 %v3175_v35, %v3051_v40  ;;  %v3219_v40 = vmul.f32 %v8027_v15, %v9199_v43  ;;  %v9426_v35 = vld [vmem:[%s10308_s2 + $0x48] sm:$0xff]  }
0x1abe   : > { %v3177_v16 = vpop.permute.xlu1 %3176 }
0x1abf   : > { %8032 = vtanh.f32 %v3186_v49  ;;  %v3187_v17 = vadd.f32 %v3177_v16, %v3054_v3  ;;  %v9433_v49 = vld [vmem:[%s10308_s2 + $0x50] sm:$0xff]   ;;  %v9440_v16 = vld [vmem:[%s10308_s2 + $0x58] sm:$0xff]  }
0x1ac0   : > { %v3179_v28 = vpop.permute.xlu0 %3178 }
0x1ac1   : > { %8034 = vtanh.f32 %v3187_v17  ;;  %v3188_v7 = vadd.f32 %v3179_v28, %v3059_v62  ;;  %v3196_v62 = vsub.f32 1.0, %v8029_v48  ;;  %v9447_v17 = vld [vmem:[%s10308_s2] sm:$0xff]   ;;  %v9454_v28 = vld [vmem:[%s10308_s2 + $0x8] sm:$0xff]  }
0x1ac2   : > { %v3181_v11 = vpop.permute.xlu1 %3180 }
0x1ac3   : > { %8036 = vtanh.f32 %v3188_v7  ;;  %v3189_v58 = vadd.f32 %v3181_v11, %v3062_v31  ;;  %v9461_v7 = vld [vmem:[%s10308_s2 + $0x10] sm:$0xff]   ;;  %v9469_v11 = vld [vmem:[%s10309_s3 + $0x38] sm:$0xff]  }
0x1ac5   : > { %8038 = vtanh.f32 %v3189_v58  ;;  %v9476_v58 = vld [vmem:[%s10309_s3 + $0x40] sm:$0xff]  }
0x1ac9   : > { %v8033_v37 = vpop.eup %8032 }
0x1aca   : > { %3202 = vrot.lane.b32.xlu0 %v8033_v37, %s8385_s16  ;;  %v9482_v37 = vld [vmem:[%s10308_s2 + $0x18] sm:$0xff]  }
0x1acb   : > { %v8035_v2 = vpop.eup %8034 }
0x1acc   : > { %3204 = vrot.lane.b32.xlu1 %v8035_v2, %s8385_s16  ;;  %v9489_v2 = vld [vmem:[%s10308_s2 + $0x20] sm:$0xff]  }
0x1acd   : > { %v8037_v53 = vpop.eup %8036 }
0x1ace   : > { %3206 = vrot.lane.b32.xlu0 %v8037_v53, %s8385_s16  ;;  %v9499_v53 = vld [vmem:[%s10308_s2 + $0x28] sm:$0xff]  }
0x1acf   : > { %v8039_v29 = vpop.eup %8038 }
0x1ad0   : > { %3208 = vrot.lane.b32.xlu1 %v8039_v29, %s8385_s16 }
0x1b3c   : > { %v3203_v60 = vpop.permute.xlu0 %3202 }
0x1b3d   : > { %v3214_v56 = vmul.f32 %v3203_v60, %v3194_v18  ;;  %v9506_v18 = vld [vmem:[%s10310_s4] ss:$0 sm:$0xff] }
0x1b3e   : > { %v3205_v41 = vpop.permute.xlu1 %3204 }
0x1b3f   : > { %v3215_v3 = vmul.f32 %v3205_v41, %v3195_v21  ;;  %v9361_v31 = vadd.f32 %v3218_v22, %v3214_v56 }
0x1b40   : > { %v3207_v23 = vpop.permute.xlu0 %3206 }
0x1b41   : > { %v9363_v61 = vadd.f32 %v3219_v40, %v3215_v3  ;;  %v3216_v54 = vmul.f32 %v3207_v23, %v3196_v62 }
0x1b42   : > { %v3209_v24 = vpop.permute.xlu1 %3208 }
0x1b43   : > { %v3217_v9 = vmul.f32 %v3209_v24, %v3197_v51  ;;  %v3250_v10 = vpack.c.bf16 %v9363_v61, %v9361_v31  ;;  %v9369_v27 = vadd.f32 %v3220_v20, %v3216_v54 }
0x1b45   : > { %v9371_v13 = vadd.f32 %v3221_v12, %v3217_v9  ;;  %3254 = vrot.lane.b32.xlu0 %v3250_v10, %s8385_s16 }
0x1b47   : > { %v3251_v14 = vpack.c.bf16 %v9371_v13, %v9369_v27 }
0x1b49   : > { %3256 = vrot.lane.b32.xlu1 %v3251_v14, %s8385_s16 }
0x1bb7   : > { %v3255_v19 = vpop.permute.xlu0 %3254 }
0x1bb8   : > { %7240 = vmatprep.mubr.msk.bf16.mxu0 %vm341_vm0, %v3255_v19 }
0x1bbb   : > { %v3257_v8 = vpop.permute.xlu1 %3256 }
0x1bbc   : > { %7241 = vmatmul.mubr.msk.bf16.vlgmr.msra.gmra.mrb[96].mxu0 %vm341_vm0, %v3257_v8 }
0x1bbd   : > { %7277 = vmatpush3.bf16.msra.mxu0 %v9331_v0 }
0x1bbe   : > { %7278 = vmatprep.subr.bf16.mxu0 %v9383_v59 }
0x1bc1   : > { %7279 = vmatpush3.bf16.msra.mxu0 %v9383_v59 }
0x1bc2   : > { %7280 = vmatprep.subr.bf16.mxu0 %v9390_v26 }
0x1bc5   : > { %7281 = vmatpush3.bf16.msra.mxu0 %v9390_v26 }
0x1bc6   : > { %7282 = vmatprep.subr.bf16.mxu0 %v9397_v30 }
0x1bc9   : > { %7283 = vmatpush3.bf16.msra.mxu0 %v9397_v30 }
0x1c8f   : > { %v7242_v32 = vpop.f32.mrb[96].mxu0 }
0x1c90   : > { %v3298_v33 = vpop.f32.mrb[97].mxu0 }
0x1c91   : > { %v7243_v15 = vpop.f32.mrb[98].mxu0 }
0x1c92   : > { %v3314_v44 = vpack.c.bf16 %v7243_v15, %v7242_v32  ;;  %v3301_v4 = vpop.f32.mrb[99].mxu0 }
0x1c93   : > { %v3313_v48 = vpack.c.bf16 %v3301_v4, %v3298_v33 }
0x1c94   : > { %3319 = vrot.lane.b32.xlu1 %v3314_v44, %s8384_s26 }
0x1c95   : > { %3317 = vrot.lane.b32.xlu0 %v3313_v48, %s8384_s26 }
0x1d06   : > { %v3320_v1 = vpop.permute.xlu1 %3319 }
0x1d07   : > { %v3318_v55 = vpop.permute.xlu0 %3317 }
0x1d08   : > { %7244 = vmatprep.subr.bf16.mxu1 %v3318_v55 }
0x1d09   : > { %7245 = vmatpush3.bf16.msra.mxu1 %v3318_v55 }
0x1d0a   : > { %7246 = vmatprep.subr.bf16.mxu1 %v3320_v1 }
0x1d0d   : > { %7247 = vmatpush3.bf16.msra.mxu1 %v3320_v1 }
0x1d0e   : > { %7260 = vmatprep.subr.bf16.mxu1 %v3313_v48 }
0x1d10   : > { %7249 = vmatmul.mubr.msk.bf16.vlgmr.msra.gmra.mrb[64].mxu1 %vm341_vm0, %v9406_v46 }
0x1d11   : > { %7261 = vmatpush3.bf16.msra.mxu1 %v3313_v48  ;;  %7252 = vmatprep.mubr.msk.bf16.mxu1 %vm341_vm0, %v9413_v57 }
0x1d12   : > { %7262 = vmatprep.subr.bf16.mxu1 %v3314_v44 }
0x1d15   : > { %7263 = vmatpush3.bf16.msra.mxu1 %v3314_v44 }
0x1d16   : > { %7318 = vmatprep.subr.bf16.mxu1 %v9420_v5 }
0x1d18   : > { %7253 = vmatmul.mubr.msk.bf16.gmra.mrb[68].mxu1 %vm341_vm0, %v9426_v35 }
0x1d19   : > { %7256 = vmatprep.mubr.msk.bf16.mxu1 %vm341_vm0, %v9433_v49 }
0x1d20   : > { %7257 = vmatmul.mubr.msk.bf16.gmra.mrb[72].mxu1 %vm341_vm0, %v9440_v16 }
0x1d21   : > { %7264 = vmatprep.mubr.msk.bf16.mxu1 %vm341_vm0, %v9447_v17 }
0x1d28   : > { %7265 = vmatmul.mubr.msk.bf16.vlgmr.msra.gmra.mrb[64].mxu1 %vm341_vm0, %v9454_v28 }
0x1d29   : > { %7268 = vmatprep.mubr.msk.bf16.mxu1 %vm341_vm0, %v9461_v7  ;;  %7319 = vmatpush3.bf16.msra.mxu1 %v9420_v5 }
0x1d2a   : > { %7320 = vmatprep.subr.bf16.mxu1 %v9469_v11 }
0x1d2d   : > { %7321 = vmatpush3.bf16.msra.mxu1 %v9469_v11 }
0x1d2e   : > { %7322 = vmatprep.subr.bf16.mxu1 %v9476_v58 }
0x1d30   : > { %7269 = vmatmul.mubr.msk.bf16.gmra.mrb[68].mxu1 %vm341_vm0, %v9482_v37 }
0x1d31   : > { %7272 = vmatprep.mubr.msk.bf16.mxu1 %vm341_vm0, %v9489_v2  ;;  %7323 = vmatpush3.bf16.msra.mxu1 %v9476_v58 }
0x1d32   : > { %7324 = vmatprep.subr.bf16.mxu1 %v9253_v50 }
0x1d35   : > { %7325 = vmatpush3.bf16.msra.mxu1 %v9253_v50 }
0x1d38   : > { %7273 = vmatmul.mubr.msk.bf16.gmra.mrb[72].mxu1 %vm341_vm0, %v9499_v53 }
0x1dfb   : > { %v7266_v29 = vpop.f32.mrb[64].mxu1 }
0x1dfc   : > { %v3487_v60 = vadd.f32 %v9506_v18, %v7266_v29  ;;  %v3438_v56 = vpop.f32.mrb[65].mxu1 }
0x1dfd   : > { %v3485_v21 = vadd.f32 %v9506_v18, %v3438_v56  ;;  %v7267_v50 = vpop.f32.mrb[66].mxu1 }
0x1dfe   : > { %8040 = vtanh.f32 %v3487_v60  ;;  %v3488_v41 = vadd.f32 %v9506_v18, %v7267_v50  ;;  %v3441_v22 = vpop.f32.mrb[67].mxu1 }
0x1dff   : > { %8042 = vtanh.f32 %v3485_v21  ;;  %v3486_v40 = vadd.f32 %v9506_v18, %v3441_v22 }
0x1e00   : > { %8044 = vtanh.f32 %v3488_v41 }
0x1e01   : > { %8046 = vtanh.f32 %v3486_v40 }
0x1e03   : > { %v7270_v3 = vpop.f32.mrb[68].mxu1 }
0x1e04   : > { %v3491_v62 = vadd.f32 %v9506_v18, %v7270_v3  ;;  %v3454_v23 = vpop.f32.mrb[69].mxu1 }
0x1e05   : > { %v3489_v54 = vadd.f32 %v9506_v18, %v3454_v23  ;;  %v7271_v51 = vpop.f32.mrb[70].mxu1 }
0x1e06   : > { %8048 = vtanh.f32 %v3491_v62  ;;  %v3492_v24 = vadd.f32 %v9506_v18, %v7271_v51  ;;  %v3457_v20 = vpop.f32.mrb[71].mxu1 }
0x1e07   : > { %8050 = vtanh.f32 %v3489_v54  ;;  %v3490_v12 = vadd.f32 %v9506_v18, %v3457_v20 }
0x1e08   : > { %v8041_v9 = vpop.eup %8040  ;;  %8052 = vtanh.f32 %v3492_v24  ;;  %v9529_v24 = vld [vmem:[%s10308_s2 + $0x60] sm:$0xff]  }
0x1e09   : > { %v8043_v10 = vpop.eup %8042  ;;  %8054 = vtanh.f32 %v3490_v12  ;;  %v9536_v12 = vld [vmem:[%s10310_s4 + $0x1] ss:$0 sm:$0xff] }
0x1e0a   : > { %v8045_v14 = vpop.eup %8044 }
0x1e0b   : > { %v8047_v19 = vpop.eup %8046  ;;  %v7274_v8 = vpop.f32.mrb[72].mxu1  ;;  %v3510_v32 = vpack.c.bf16 %v8045_v14, %v8041_v9 }
0x1e0c   : > { %v3495_v33 = vadd.f32 %v9506_v18, %v7274_v8  ;;  %v3470_v15 = vpop.f32.mrb[73].mxu1  ;;  %v3509_v44 = vpack.c.bf16 %v8047_v19, %v8043_v10 }
0x1e0d   : > { %v3493_v4 = vadd.f32 %v9506_v18, %v3470_v15  ;;  %v7275_v48 = vpop.f32.mrb[74].mxu1 }
0x1e0e   : > { %8056 = vtanh.f32 %v3495_v33  ;;  %v3496_v55 = vadd.f32 %v9506_v18, %v7275_v48  ;;  %v3473_v1 = vpop.f32.mrb[75].mxu1  ;;  %7284 = vmatprep.mubr.msk.bf16.mxu0 %vm724_vm1, %v3509_v44 }
0x1e0f   : > { %8058 = vtanh.f32 %v3493_v4  ;;  %v3494_v29 = vadd.f32 %v9506_v18, %v3473_v1  ;;  %7285 = vmatmul.mubr.msk.bf16.vlgmr.msra.gmra.mrb[100].mxu0 %vm724_vm1, %v3510_v32 }
0x1e10   : > { %v8049_v60 = vpop.eup %8048  ;;  %8060 = vtanh.f32 %v3496_v55 }
0x1e11   : > { %v8051_v56 = vpop.eup %8050  ;;  %8062 = vtanh.f32 %v3494_v29 }
0x1e12   : > { %v8053_v21 = vpop.eup %8052 }
0x1e13   : > { %v8055_v50 = vpop.eup %8054  ;;  %v3512_v41 = vpack.c.bf16 %v8053_v21, %v8049_v60 }
0x1e14   : > { %v3511_v22 = vpack.c.bf16 %v8055_v50, %v8051_v56 }
0x1e16   : > { %7288 = vmatprep.mubr.msk.bf16.mxu0 %vm724_vm1, %v3511_v22 }
0x1e17   : > { %7289 = vmatmul.mubr.msk.bf16.gmra.mrb[104].mxu0 %vm724_vm1, %v3512_v41 }
0x1e18   : > { %v8057_v40 = vpop.eup %8056 }
0x1e19   : > { %v8059_v3 = vpop.eup %8058 }
0x1e1a   : > { %v8061_v62 = vpop.eup %8060 }
0x1e1b   : > { %v8063_v23 = vpop.eup %8062  ;;  %v3514_v54 = vpack.c.bf16 %v8061_v62, %v8057_v40  ;;  %v9547_v40 = vld [vmem:[%s8624_s28 + $0x10] sm:$0xff]  ;;  %v9551_v62 = vld [vmem:[%s8624_s28 + $0x18] sm:$0xff] }
0x1e1c   : > { %v3513_v51 = vpack.c.bf16 %v8063_v23, %v8059_v3 }
0x1e1e   : > { %7292 = vmatprep.mubr.msk.bf16.mxu0 %vm724_vm1, %v3513_v51 }
0x1e1f   : > { %7293 = vmatmul.mubr.msk.bf16.gmra.mrb[108].mxu0 %vm724_vm1, %v3514_v54 }
0x1e20   : > { %7308 = vmatprep.mubr.msk.bf16.mxu0 %vm864_vm2, %v9529_v24 }
0x1ee2   : > { %v7286_v20 = vpop.f32.mrb[100].mxu0 }
0x1ee3   : > { %v3576_v9 = vadd.f32 %v9536_v12, %v7286_v20  ;;  %v3567_v10 = vpop.f32.mrb[101].mxu0  ;;  %v9556_v20 = vld [vmem:[%s8624_s28] sm:$0xff] }
0x1ee4   : > { %v3568_v14 = vadd.f32 %v9536_v12, %v3567_v10  ;;  %v7287_v19 = vpop.f32.mrb[102].mxu0  ;;  %v9560_v10 = vld [vmem:[%s8624_s28 + $0x8] sm:$0xff] }
0x1ee5   : > { %8064 = vtanh.f32 %v3576_v9  ;;  %v3579_v8 = vadd.f32 %v9536_v12, %v7287_v19  ;;  %v3570_v32 = vpop.f32.mrb[103].mxu0 }
0x1ee6   : > { %8066 = vtanh.f32 %v3568_v14  ;;  %v3571_v33 = vadd.f32 %v9536_v12, %v3570_v32 }
0x1ee7   : > { %8068 = vtanh.f32 %v3579_v8 }
0x1ee8   : > { %8070 = vtanh.f32 %v3571_v33 }
0x1eea   : > { %v7290_v15 = vpop.f32.mrb[104].mxu0 }
0x1eeb   : > { %v3592_v44 = vadd.f32 %v9536_v12, %v7290_v15  ;;  %v3583_v4 = vpop.f32.mrb[105].mxu0 }
0x1eec   : > { %v3584_v48 = vadd.f32 %v9536_v12, %v3583_v4  ;;  %v7291_v55 = vpop.f32.mrb[106].mxu0 }
0x1eed   : > { %8072 = vtanh.f32 %v3592_v44  ;;  %v3595_v1 = vadd.f32 %v9536_v12, %v7291_v55  ;;  %v3586_v29 = vpop.f32.mrb[107].mxu0 }
0x1eee   : > { %8074 = vtanh.f32 %v3584_v48  ;;  %v3587_v60 = vadd.f32 %v9536_v12, %v3586_v29 }
0x1eef   : > { %v8065_v56 = vpop.eup %8064  ;;  %8076 = vtanh.f32 %v3595_v1 }
0x1ef0   : > { %v8067_v21 = vpop.eup %8066  ;;  %8078 = vtanh.f32 %v3587_v60  ;;  %v3628_v3 = vmul.f32 %v9547_v40, %v8065_v56  ;;  %v9567_v60 = vld [vmem:[%s8624_s28 + $0x30] sm:$0xff] }
0x1ef1   : > { %v8069_v50 = vpop.eup %8068  ;;  %v3626_v9 = vmul.f32 %v9556_v20, %v8067_v21  ;;  %v9571_v21 = vld [vmem:[%s8624_s28 + $0x38] sm:$0xff] }
0x1ef2   : > { %v8071_v41 = vpop.eup %8070  ;;  %v7294_v22 = vpop.f32.mrb[108].mxu0  ;;  %v3629_v23 = vmul.f32 %v9551_v62, %v8069_v50 }
0x1ef3   : > { %v3608_v54 = vadd.f32 %v9536_v12, %v7294_v22  ;;  %v3599_v51 = vpop.f32.mrb[109].mxu0  ;;  %v3627_v14 = vmul.f32 %v9560_v10, %v8071_v41  ;;  %v9575_v41 = vld [vmem:[%s8624_s28 + $0x20] sm:$0xff] }
0x1ef4   : > { %v3600_v19 = vadd.f32 %v9536_v12, %v3599_v51  ;;  %v7295_v8 = vpop.f32.mrb[110].mxu0  ;;  %v3639_v32 = vpack.c.bf16 %v3629_v23, %v3628_v3  ;;  %v9579_v3 = vld [vmem:[%s8624_s28 + $0x28] sm:$0xff] }
0x1ef5   : > { %8080 = vtanh.f32 %v3608_v54  ;;  %v3611_v33 = vadd.f32 %v9536_v12, %v7295_v8  ;;  %v3602_v15 = vpop.f32.mrb[111].mxu0  ;;  %v3638_v44 = vpack.c.bf16 %v3627_v14, %v3626_v9 }
0x1ef6   : > { %8082 = vtanh.f32 %v3600_v19  ;;  %v3603_v4 = vadd.f32 %v9536_v12, %v3602_v15 }
0x1ef7   : > { %v8073_v48 = vpop.eup %8072  ;;  %8084 = vtanh.f32 %v3611_v33  ;;  %7296 = vmatprep.subr.bf16.mxu0 %v3638_v44  ;;  %v9583_v33 = vld [vmem:[%s8624_s28 + $0x50] sm:$0xff] }
0x1ef8   : > { %v8075_v55 = vpop.eup %8074  ;;  %8086 = vtanh.f32 %v3603_v4  ;;  %7297 = vmatpush3.bf16.msra.mxu0 %v3638_v44  ;;  %v3632_v56 = vmul.f32 %v9567_v60, %v8073_v48  ;;  %v9587_v44 = vld [vmem:[%s8624_s28 + $0x58] sm:$0xff]  ;;  %v9591_v48 = vld [vmem:[%s8624_s28 + $0x40] sm:$0xff] }
0x1ef9   : > { %v8077_v1 = vpop.eup %8076  ;;  %7298 = vmatprep.subr.bf16.mxu0 %v3639_v32  ;;  %v3630_v22 = vmul.f32 %v9575_v41, %v8075_v55  ;;  %v9595_v55 = vld [vmem:[%s8624_s28 + $0x48] sm:$0xff] }
0x1efa   : > { %v8079_v29 = vpop.eup %8078  ;;  %v3633_v50 = vmul.f32 %v9571_v21, %v8077_v1 }
0x1efb   : > { %v3631_v23 = vmul.f32 %v9579_v3, %v8079_v29 }
0x1efc   : > { %7299 = vmatpush3.bf16.msra.mxu0 %v3639_v32  ;;  %v3641_v54 = vpack.c.bf16 %v3633_v50, %v3632_v56  ;;  %v9601_v50 = vld [vmem:[%s10309_s3 + $0x50] sm:$0x3] }
0x1efd   : > { %v3640_v51 = vpack.c.bf16 %v3631_v23, %v3630_v22  ;;  %v9608_v22 = vld [vmem:[%s10308_s2 + $0x68] sm:$0xff]   ;;  %v3246_v23 = vld [vmem:[%s8693_s9 + $0x80] sm:$0xff] }
0x1eff   : > { %v8081_v9 = vpop.eup %8080  ;;  %7300 = vmatprep.subr.bf16.mxu0 %v3640_v51 }
0x1f00   : > { %v8083_v14 = vpop.eup %8082  ;;  %7301 = vmatpush3.bf16.msra.mxu0 %v3640_v51  ;;  %v3636_v15 = vmul.f32 %v9583_v33, %v8081_v9  ;;  %v3248_v9 = vld [vmem:[%s8693_s9 + $0x90] sm:$0xff] }
0x1f01   : > { %v8085_v19 = vpop.eup %8084  ;;  %7302 = vmatprep.subr.bf16.mxu0 %v3641_v54  ;;  %v3634_v32 = vmul.f32 %v9591_v48, %v8083_v14  ;;  %v3249_v14 = vld [vmem:[%s8693_s9 + $0x98] sm:$0xff] }
0x1f02   : > { %v8087_v8 = vpop.eup %8086  ;;  %v3637_v4 = vmul.f32 %v9587_v44, %v8085_v19  ;;  %v3694_v19 = vpack.c.bf16 %v3249_v14, %v3248_v9 }
0x1f03   : > { %v3635_v1 = vmul.f32 %v9595_v55, %v8087_v8 }
0x1f04   : > { %7303 = vmatpush3.bf16.msra.mxu0 %v3641_v54  ;;  %v3643_v29 = vpack.c.bf16 %v3637_v4, %v3636_v15  ;;  %v3247_v54 = vld [vmem:[%s8693_s9 + $0x88] sm:$0xff] }
0x1f05   : > { %v3642_v56 = vpack.c.bf16 %v3635_v1, %v3634_v32  ;;  %v3693_v51 = vpack.c.bf16 %v3247_v54, %v3246_v23 }
0x1f07   : > { %7304 = vmatprep.subr.bf16.mxu0 %v3642_v56 }
0x1f08   : > { %7305 = vmatpush3.bf16.msra.mxu0 %v3642_v56 }
0x1f09   : > { %7306 = vmatprep.subr.bf16.mxu0 %v3643_v29 }
0x1f0c   : > { %7307 = vmatpush3.bf16.msra.mxu0 %v3643_v29 }
0x1f0d   : > { %7706 = vmatprep.subr.msk.bf16.mxu0 %vm933_vm3, %v9601_v50 }
0x1f0f   : > { %7309 = vmatmul.mubr.msk.bf16.vlgmr.msra.gmra.mrb[112].mxu0 %vm864_vm2, %v9608_v22 }
0x1f10   : > { %7313 = vmatpush3.bf16.msra.mxu0 %v8709_v63  ;;  %7314 = vmatprep.mubr.msk.bf16.mxu0 %vm926_vm4, %v3693_v51 }
0x1f11   : > { %7330 = vmatprep.subr.bf16.mxu0 %v9311_v25 }
0x1f17   : > { %7315 = vmatmul.mubr.msk.bf16.vlgmr.msra.gmra.mrb[116].mxu0 %vm926_vm4, %v3694_v19 }
0x1f18   : > { %7331 = vmatpush3.bf16.msra.mxu0 %v9311_v25 }
0x1f19   : > { %7332 = vmatprep.subr.bf16.mxu0 %v9324_v39 }
0x1f1c   : > { %7333 = vmatpush3.bf16.msra.mxu0 %v9324_v39 }
0x1f1d   : > { %7370 = vmatprep.subr.bf16.mxu0 %v9331_v0 }
0x1fe2   : > { %v7310_v8 = vpop.f32.mrb[112].mxu0 }
0x1fe3   : > { %v3678_v15 = vpop.f32.mrb[113].mxu0 }
0x1fe4   : > { %v7311_v4 = vpop.f32.mrb[114].mxu0 }
0x1fe5   : > { %v3751_v32 = vpack.c.bf16 %v7311_v4, %v7310_v8  ;;  %v3681_v1 = vpop.f32.mrb[115].mxu0 }
0x1fe6   : > { %v3750_v29 = vpack.c.bf16 %v3681_v1, %v3678_v15 }
0x1fe8   : > { %7326 = vmatprep.mubr.msk.bf16.mxu1 %vm724_vm1, %v3750_v29 }
0x1fe9   : > { %7327 = vmatmul.mubr.msk.bf16.vlgmr.msra.gmra.mrb[76].mxu1 %vm724_vm1, %v3751_v32 }
0x1fea   : > { %7342 = vmatprep.mubr.msk.bf16.mxu1 %vm341_vm0, %v9339_v38  ;;  %v7316_v25 = vpop.f32.mrb[116].mxu0  ;;  %v9635_v38 = vld [vmem:[%s10310_s4 + $0x2] ss:$0 sm:$0xff] }
0x1feb   : > { %v3735_v56 = vpop.f32.mrb[117].mxu0  ;;  %v3744_v15 = vadd.f32 %v9635_v38, %v7316_v25 }
0x1fec   : > { %v7317_v23 = vpop.f32.mrb[118].mxu0  ;;  %v3736_v19 = vadd.f32 %v9635_v38, %v3735_v56 }
0x1fed   : > { %v3738_v54 = vpop.f32.mrb[119].mxu0  ;;  %v3747_v32 = vadd.f32 %v9635_v38, %v7317_v23 }
0x1fee   : > { %v3739_v8 = vadd.f32 %v9635_v38, %v3738_v54 }
0x20bc   : > { %v7328_v39 = vpop.f32.mrb[76].mxu1 }
0x20bd   : > { %v3792_v51 = vpop.f32.mrb[77].mxu1  ;;  %v3809_v29 = vadd.f32 %v7328_v39, %v3744_v15 }
0x20be   : > { %3839 = vrot.lane.b32.xlu0 %v3792_v51, %s8384_s26  ;;  %v7329_v9 = vpop.f32.mrb[78].mxu1  ;;  %v3807_v4 = vadd.f32 %v3792_v51, %v3736_v19 }
0x20bf   : > { %v3795_v14 = vpop.f32.mrb[79].mxu1  ;;  %v3810_v47 = vadd.f32 %v7329_v9, %v3747_v32  ;;  %v6368_v36 = vmul.f32 -1.442695, %v3809_v29 }
0x20c0   : > { %3841 = vrot.lane.b32.xlu1 %v3795_v14, %s8384_s26  ;;  %v3808_v1 = vadd.f32 %v3795_v14, %v3739_v8  ;;  %v6366_v45 = vmul.f32 -1.442695, %v3807_v4 }
0x20c1   : > { %v6369_v52 = vmul.f32 -1.442695, %v3810_v47 }
0x20c2   : > { %3843 = vrot.lane.b32.xlu0 %v7328_v39, %s8384_s26  ;;  %v6367_v43 = vmul.f32 -1.442695, %v3808_v1  ;;  %8088 = vpow2.f32 %v6366_v45 }
0x20c4   : > { %3845 = vrot.lane.b32.xlu1 %v7329_v9, %s8384_s26  ;;  %8090 = vpow2.f32 %v6367_v43 }
0x20c5   : > { %8092 = vpow2.f32 %v6368_v36 }
0x20c6   : > { %8094 = vpow2.f32 %v6369_v52 }
0x20cc   : > { %v8089_v42 = vpop.eup %8088 }
0x20cd   : > { %v3823_v34 = vadd.f32 1.0, %v8089_v42 }
0x20ce   : > { %v8091_v56 = vpop.eup %8090 }
0x20cf   : > { %v8093_v54 = vpop.eup %8092  ;;  %v3824_v6 = vadd.f32 1.0, %v8091_v56  ;;  %8096 = vrcp.f32 %v3823_v34 }
0x20d0   : > { %v8095_v25 = vpop.eup %8094  ;;  %v3825_v51 = vadd.f32 1.0, %v8093_v54 }
0x20d1   : > { %v3826_v23 = vadd.f32 1.0, %v8095_v25  ;;  %8098 = vrcp.f32 %v3824_v6 }
0x20d2   : > { %8100 = vrcp.f32 %v3825_v51 }
0x20d3   : > { %8102 = vrcp.f32 %v3826_v23 }
0x20d9   : > { %v8097_v39 = vpop.eup %8096 }
0x20db   : > { %v8099_v45 = vpop.eup %8098 }
0x20dc   : > { %v8101_v52 = vpop.eup %8100 }
0x20dd   : > { %v8103_v4 = vpop.eup %8102 }
0x2130   : > { %v3840_v9 = vpop.permute.xlu0 %3839 }
0x2131   : > { %v3851_v14 = vmul.f32 %v8097_v39, %v3840_v9 }
0x2132   : > { %v3842_v47 = vpop.permute.xlu1 %3841 }
0x2133   : > { %v3852_v43 = vmul.f32 %v8099_v45, %v3842_v47  ;;  %3859 = vrot.lane.b32.xlu0 %v3851_v14, %s8384_s26 }
0x2134   : > { %v3844_v36 = vpop.permute.xlu0 %3843 }
0x2135   : > { %v3853_v42 = vmul.f32 %v8101_v52, %v3844_v36  ;;  %3861 = vrot.lane.b32.xlu1 %v3852_v43, %s8384_s26 }
0x2136   : > { %v3846_v1 = vpop.permute.xlu1 %3845 }
0x2137   : > { %v3854_v34 = vmul.f32 %v8103_v4, %v3846_v1  ;;  %3863 = vrot.lane.b32.xlu0 %v3853_v42, %s8384_s26 }
0x2139   : > { %3865 = vrot.lane.b32.xlu1 %v3854_v34, %s8384_s26  ;;  %v3904_v34 = vmul.f32 %v8099_v45, %v9363_v61 }
0x21a5   : > { %v3860_v6 = vpop.permute.xlu0 %3859 }
0x21a6   : > { %v3871_v29 = vadd.f32 %v3860_v6, %v3736_v19 }
0x21a7   : > { %v3862_v56 = vpop.permute.xlu1 %3861 }
0x21a8   : > { %8104 = vtanh.f32 %v3871_v29  ;;  %v3872_v54 = vadd.f32 %v3862_v56, %v3739_v8  ;;  %v3879_v8 = vsub.f32 1.0, %v8097_v39  ;;  %v3881_v29 = vsub.f32 1.0, %v8101_v52 }
0x21a9   : > { %v3864_v25 = vpop.permute.xlu0 %3863 }
0x21aa   : > { %8106 = vtanh.f32 %v3872_v54  ;;  %v3873_v51 = vadd.f32 %v3864_v25, %v3744_v15  ;;  %v3880_v15 = vsub.f32 1.0, %v8099_v45 }
0x21ab   : > { %v3866_v23 = vpop.permute.xlu1 %3865 }
0x21ac   : > { %8108 = vtanh.f32 %v3873_v51  ;;  %v3874_v9 = vadd.f32 %v3866_v23, %v3747_v32  ;;  %v3903_v32 = vmul.f32 %v8097_v39, %v9361_v31  ;;  %v3882_v23 = vsub.f32 1.0, %v8103_v4 }
0x21ae   : > { %8110 = vtanh.f32 %v3874_v9 }
0x21b2   : > { %v8105_v14 = vpop.eup %8104 }
0x21b3   : > { %3887 = vrot.lane.b32.xlu0 %v8105_v14, %s8385_s16  ;;  %v3905_v14 = vmul.f32 %v8101_v52, %v9369_v27 }
0x21b4   : > { %v8107_v47 = vpop.eup %8106 }
0x21b5   : > { %3889 = vrot.lane.b32.xlu1 %v8107_v47, %s8385_s16  ;;  %v3906_v47 = vmul.f32 %v8103_v4, %v9371_v13 }
0x21b6   : > { %v8109_v43 = vpop.eup %8108 }
0x21b7   : > { %3891 = vrot.lane.b32.xlu0 %v8109_v43, %s8385_s16 }
0x21b8   : > { %v8111_v19 = vpop.eup %8110 }
0x21b9   : > { %3893 = vrot.lane.b32.xlu1 %v8111_v19, %s8385_s16 }
0x2225   : > { %v3888_v36 = vpop.permute.xlu0 %3887 }
0x2226   : > { %v3899_v42 = vmul.f32 %v3888_v36, %v3879_v8 }
0x2227   : > { %v3890_v1 = vpop.permute.xlu1 %3889 }
0x2228   : > { %v3900_v6 = vmul.f32 %v3890_v1, %v3880_v15  ;;  %v9651_v54 = vadd.f32 %v3903_v32, %v3899_v42 }
0x2229   : > { %v3892_v56 = vpop.permute.xlu0 %3891 }
0x222a   : > { %v9653_v25 = vadd.f32 %v3904_v34, %v3900_v6  ;;  %v3901_v51 = vmul.f32 %v3892_v56, %v3881_v29 }
0x222b   : > { %v3894_v9 = vpop.permute.xlu1 %3893 }
0x222c   : > { %v3902_v43 = vmul.f32 %v3894_v9, %v3882_v23  ;;  %v3935_v39 = vpack.c.bf16 %v9653_v25, %v9651_v54  ;;  %v9659_v19 = vadd.f32 %v3905_v14, %v3901_v51 }
0x222e   : > { %v9661_v45 = vadd.f32 %v3906_v47, %v3902_v43  ;;  %3939 = vrot.lane.b32.xlu0 %v3935_v39, %s8385_s16 }
0x2230   : > { %v3936_v8 = vpack.c.bf16 %v9661_v45, %v9659_v19 }
0x2232   : > { %3941 = vrot.lane.b32.xlu1 %v3936_v8, %s8385_s16 }
0x22a0   : > { %v3940_v36 = vpop.permute.xlu0 %3939 }
0x22a1   : > { %7334 = vmatprep.mubr.msk.bf16.mxu0 %vm341_vm0, %v3940_v36 }
0x22a4   : > { %v3942_v52 = vpop.permute.xlu1 %3941 }
0x22a5   : > { %7335 = vmatmul.mubr.msk.bf16.vlgmr.msra.gmra.mrb[120].mxu0 %vm341_vm0, %v3942_v52 }
0x22a6   : > { %7371 = vmatpush3.bf16.msra.mxu0 %v9331_v0 }
0x22a7   : > { %7372 = vmatprep.subr.bf16.mxu0 %v9383_v59 }
0x22aa   : > { %7373 = vmatpush3.bf16.msra.mxu0 %v9383_v59 }
0x22ab   : > { %7374 = vmatprep.subr.bf16.mxu0 %v9390_v26 }
0x22ae   : > { %7375 = vmatpush3.bf16.msra.mxu0 %v9390_v26  ;;  %v9707_v26 = vld [vmem:[%s10309_s3 + $0x48] sm:$0xff]  }
0x22af   : > { %7376 = vmatprep.subr.bf16.mxu0 %v9397_v30 }
0x22b2   : > { %7377 = vmatpush3.bf16.msra.mxu0 %v9397_v30 }
0x2378   : > { %v7336_v4 = vpop.f32.mrb[120].mxu0 }
0x2379   : > { %v3983_v42 = vpop.f32.mrb[121].mxu0 }
0x237a   : > { %v7337_v15 = vpop.f32.mrb[122].mxu0 }
0x237b   : > { %v3999_v1 = vpack.c.bf16 %v7337_v15, %v7336_v4  ;;  %v3986_v32 = vpop.f32.mrb[123].mxu0 }
0x237c   : > { %v3998_v34 = vpack.c.bf16 %v3986_v32, %v3983_v42 }
0x237d   : > { %4004 = vrot.lane.b32.xlu1 %v3999_v1, %s8384_s26 }
0x237e   : > { %4002 = vrot.lane.b32.xlu0 %v3998_v34, %s8384_s26 }
0x23ef   : > { %v4005_v59 = vpop.permute.xlu1 %4004 }
0x23f0   : > { %v4003_v0 = vpop.permute.xlu0 %4002 }
0x23f1   : > { %7338 = vmatprep.subr.bf16.mxu1 %v4003_v0 }
0x23f2   : > { %7339 = vmatpush3.bf16.msra.mxu1 %v4003_v0 }
0x23f3   : > { %7340 = vmatprep.subr.bf16.mxu1 %v4005_v59 }
0x23f6   : > { %7341 = vmatpush3.bf16.msra.mxu1 %v4005_v59 }
0x23f7   : > { %7354 = vmatprep.subr.bf16.mxu1 %v3998_v34 }
0x23f9   : > { %7343 = vmatmul.mubr.msk.bf16.vlgmr.msra.gmra.mrb[80].mxu1 %vm341_vm0, %v9406_v46 }
0x23fa   : > { %7355 = vmatpush3.bf16.msra.mxu1 %v3998_v34  ;;  %7346 = vmatprep.mubr.msk.bf16.mxu1 %vm341_vm0, %v9413_v57 }
0x23fb   : > { %7356 = vmatprep.subr.bf16.mxu1 %v3999_v1 }
0x23fe   : > { %7357 = vmatpush3.bf16.msra.mxu1 %v3999_v1 }
0x23ff   : > { %7412 = vmatprep.subr.bf16.mxu1 %v9420_v5 }
0x2401   : > { %7347 = vmatmul.mubr.msk.bf16.gmra.mrb[84].mxu1 %vm341_vm0, %v9426_v35 }
0x2402   : > { %7350 = vmatprep.mubr.msk.bf16.mxu1 %vm341_vm0, %v9433_v49 }
0x2409   : > { %7351 = vmatmul.mubr.msk.bf16.gmra.mrb[88].mxu1 %vm341_vm0, %v9440_v16 }
0x240a   : > { %7358 = vmatprep.mubr.msk.bf16.mxu1 %vm341_vm0, %v9447_v17 }
0x2411   : > { %7359 = vmatmul.mubr.msk.bf16.vlgmr.msra.gmra.mrb[80].mxu1 %vm341_vm0, %v9454_v28 }
0x2412   : > { %7362 = vmatprep.mubr.msk.bf16.mxu1 %vm341_vm0, %v9461_v7  ;;  %7413 = vmatpush3.bf16.msra.mxu1 %v9420_v5 }
0x2413   : > { %7414 = vmatprep.subr.bf16.mxu1 %v9469_v11 }
0x2416   : > { %7415 = vmatpush3.bf16.msra.mxu1 %v9469_v11 }
0x2417   : > { %7416 = vmatprep.subr.bf16.mxu1 %v9476_v58 }
0x2419   : > { %7363 = vmatmul.mubr.msk.bf16.gmra.mrb[84].mxu1 %vm341_vm0, %v9482_v37 }
0x241a   : > { %7366 = vmatprep.mubr.msk.bf16.mxu1 %vm341_vm0, %v9489_v2  ;;  %7417 = vmatpush3.bf16.msra.mxu1 %v9476_v58 }
0x241b   : > { %7418 = vmatprep.subr.bf16.mxu1 %v9707_v26 }
0x241e   : > { %7419 = vmatpush3.bf16.msra.mxu1 %v9707_v26 }
0x2421   : > { %7367 = vmatmul.mubr.msk.bf16.gmra.mrb[88].mxu1 %vm341_vm0, %v9499_v53 }
0x24e4   : > { %v7360_v30 = vpop.f32.mrb[80].mxu1 }
0x24e5   : > { %v4172_v46 = vadd.f32 %v9506_v18, %v7360_v30  ;;  %v4123_v57 = vpop.f32.mrb[81].mxu1 }
0x24e6   : > { %v4170_v5 = vadd.f32 %v9506_v18, %v4123_v57  ;;  %v7361_v35 = vpop.f32.mrb[82].mxu1 }
0x24e7   : > { %8112 = vtanh.f32 %v4172_v46  ;;  %v4173_v49 = vadd.f32 %v9506_v18, %v7361_v35  ;;  %v4126_v16 = vpop.f32.mrb[83].mxu1 }
0x24e8   : > { %8114 = vtanh.f32 %v4170_v5  ;;  %v4171_v17 = vadd.f32 %v9506_v18, %v4126_v16 }
0x24e9   : > { %8116 = vtanh.f32 %v4173_v49 }
0x24ea   : > { %8118 = vtanh.f32 %v4171_v17 }
0x24ec   : > { %v7364_v28 = vpop.f32.mrb[84].mxu1 }
0x24ed   : > { %v4176_v7 = vadd.f32 %v9506_v18, %v7364_v28  ;;  %v4139_v11 = vpop.f32.mrb[85].mxu1 }
0x24ee   : > { %v4174_v58 = vadd.f32 %v9506_v18, %v4139_v11  ;;  %v7365_v37 = vpop.f32.mrb[86].mxu1 }
0x24ef   : > { %8120 = vtanh.f32 %v4176_v7  ;;  %v4177_v2 = vadd.f32 %v9506_v18, %v7365_v37  ;;  %v4142_v53 = vpop.f32.mrb[87].mxu1 }
0x24f0   : > { %8122 = vtanh.f32 %v4174_v58  ;;  %v4175_v6 = vadd.f32 %v9506_v18, %v4142_v53 }
0x24f1   : > { %v8113_v29 = vpop.eup %8112  ;;  %8124 = vtanh.f32 %v4177_v2 }
0x24f2   : > { %v8115_v56 = vpop.eup %8114  ;;  %8126 = vtanh.f32 %v4175_v6 }
0x24f3   : > { %v8117_v51 = vpop.eup %8116 }
0x24f4   : > { %v8119_v23 = vpop.eup %8118  ;;  %v7368_v9 = vpop.f32.mrb[88].mxu1  ;;  %v4195_v14 = vpack.c.bf16 %v8117_v51, %v8113_v29 }
0x24f5   : > { %v4180_v47 = vadd.f32 %v9506_v18, %v7368_v9  ;;  %v4155_v43 = vpop.f32.mrb[89].mxu1  ;;  %v4194_v39 = vpack.c.bf16 %v8119_v23, %v8115_v56 }
0x24f6   : > { %v4178_v8 = vadd.f32 %v9506_v18, %v4155_v43  ;;  %v7369_v36 = vpop.f32.mrb[90].mxu1 }
0x24f7   : > { %8128 = vtanh.f32 %v4180_v47  ;;  %v4181_v52 = vadd.f32 %v9506_v18, %v7369_v36  ;;  %v4158_v4 = vpop.f32.mrb[91].mxu1  ;;  %7378 = vmatprep.mubr.msk.bf16.mxu0 %vm724_vm1, %v4194_v39 }
0x24f8   : > { %8130 = vtanh.f32 %v4178_v8  ;;  %v4179_v42 = vadd.f32 %v9506_v18, %v4158_v4  ;;  %7379 = vmatmul.mubr.msk.bf16.vlgmr.msra.gmra.mrb[124].mxu0 %vm724_vm1, %v4195_v14 }
0x24f9   : > { %v8121_v15 = vpop.eup %8120  ;;  %8132 = vtanh.f32 %v4181_v52 }
0x24fa   : > { %v8123_v1 = vpop.eup %8122  ;;  %8134 = vtanh.f32 %v4179_v42 }
0x24fb   : > { %v8125_v32 = vpop.eup %8124 }
0x24fc   : > { %v8127_v34 = vpop.eup %8126  ;;  %v4197_v0 = vpack.c.bf16 %v8125_v32, %v8121_v15 }
0x24fd   : > { %v4196_v59 = vpack.c.bf16 %v8127_v34, %v8123_v1 }
0x24ff   : > { %7382 = vmatprep.mubr.msk.bf16.mxu0 %vm724_vm1, %v4196_v59 }
0x2500   : > { %7383 = vmatmul.mubr.msk.bf16.gmra.mrb[128].mxu0 %vm724_vm1, %v4197_v0 }
0x2501   : > { %v8129_v30 = vpop.eup %8128 }
0x2502   : > { %v8131_v46 = vpop.eup %8130 }
0x2503   : > { %v8133_v57 = vpop.eup %8132 }
0x2504   : > { %v8135_v5 = vpop.eup %8134  ;;  %v4199_v35 = vpack.c.bf16 %v8133_v57, %v8129_v30 }
0x2505   : > { %v4198_v18 = vpack.c.bf16 %v8135_v5, %v8131_v46 }
0x2507   : > { %7386 = vmatprep.mubr.msk.bf16.mxu0 %vm724_vm1, %v4198_v18 }
0x2508   : > { %7387 = vmatmul.mubr.msk.bf16.gmra.mrb[132].mxu0 %vm724_vm1, %v4199_v35 }
0x2509   : > { %7402 = vmatprep.mubr.msk.bf16.mxu0 %vm864_vm2, %v9529_v24 }
0x25cb   : > { %v7380_v49 = vpop.f32.mrb[124].mxu0 }
0x25cc   : > { %v4261_v16 = vadd.f32 %v9536_v12, %v7380_v49  ;;  %v4252_v17 = vpop.f32.mrb[125].mxu0 }
0x25cd   : > { %v4253_v28 = vadd.f32 %v9536_v12, %v4252_v17  ;;  %v7381_v7 = vpop.f32.mrb[126].mxu0 }
0x25ce   : > { %8136 = vtanh.f32 %v4261_v16  ;;  %v4264_v11 = vadd.f32 %v9536_v12, %v7381_v7  ;;  %v4255_v58 = vpop.f32.mrb[127].mxu0 }
0x25cf   : > { %8138 = vtanh.f32 %v4253_v28  ;;  %v4256_v37 = vadd.f32 %v9536_v12, %v4255_v58 }
0x25d0   : > { %8140 = vtanh.f32 %v4264_v11 }
0x25d1   : > { %8142 = vtanh.f32 %v4256_v37  ;;  %v3933_v37 = vld [vmem:[%s8693_s9 + $0xb0] sm:$0xff] }
0x25d3   : > { %v7384_v2 = vpop.f32.mrb[128].mxu0 }
0x25d4   : > { %v4277_v53 = vadd.f32 %v9536_v12, %v7384_v2  ;;  %v4268_v24 = vpop.f32.mrb[129].mxu0  ;;  %v3934_v2 = vld [vmem:[%s8693_s9 + $0xb8] sm:$0xff] }
0x25d5   : > { %v4269_v6 = vadd.f32 %v9536_v12, %v4268_v24  ;;  %v7385_v29 = vpop.f32.mrb[130].mxu0 }
0x25d6   : > { %8144 = vtanh.f32 %v4277_v53  ;;  %v4280_v56 = vadd.f32 %v9536_v12, %v7385_v29  ;;  %v4271_v51 = vpop.f32.mrb[131].mxu0  ;;  %v4379_v53 = vpack.c.bf16 %v3934_v2, %v3933_v37 }
0x25d7   : > { %8146 = vtanh.f32 %v4269_v6  ;;  %v4272_v23 = vadd.f32 %v9536_v12, %v4271_v51 }
0x25d8   : > { %v8137_v9 = vpop.eup %8136  ;;  %8148 = vtanh.f32 %v4280_v56 }
0x25d9   : > { %v8139_v14 = vpop.eup %8138  ;;  %8150 = vtanh.f32 %v4272_v23  ;;  %v4313_v8 = vmul.f32 %v9547_v40, %v8137_v9  ;;  %v8339_v9 = vld [vmem:[%s10308_s2 + $0x30] sm:$0xff]  }
0x25da   : > { %v8141_v47 = vpop.eup %8140  ;;  %v4311_v42 = vmul.f32 %v9556_v20, %v8139_v14 }
0x25db   : > { %v8143_v43 = vpop.eup %8142  ;;  %v7388_v39 = vpop.f32.mrb[132].mxu0  ;;  %v4314_v36 = vmul.f32 %v9551_v62, %v8141_v47 }
0x25dc   : > { %v4293_v52 = vadd.f32 %v9536_v12, %v7388_v39  ;;  %v4284_v4 = vpop.f32.mrb[133].mxu0  ;;  %v4312_v15 = vmul.f32 %v9560_v10, %v8143_v43 }
0x25dd   : > { %v4285_v1 = vadd.f32 %v9536_v12, %v4284_v4  ;;  %v7389_v32 = vpop.f32.mrb[134].mxu0  ;;  %v4324_v34 = vpack.c.bf16 %v4314_v36, %v4313_v8 }
0x25de   : > { %8152 = vtanh.f32 %v4293_v52  ;;  %v4296_v0 = vadd.f32 %v9536_v12, %v7389_v32  ;;  %v4287_v59 = vpop.f32.mrb[135].mxu0  ;;  %v4323_v30 = vpack.c.bf16 %v4312_v15, %v4311_v42 }
0x25df   : > { %8154 = vtanh.f32 %v4285_v1  ;;  %v4288_v40 = vadd.f32 %v9536_v12, %v4287_v59 }
0x25e0   : > { %v8145_v62 = vpop.eup %8144  ;;  %8156 = vtanh.f32 %v4296_v0  ;;  %7390 = vmatprep.subr.bf16.mxu0 %v4323_v30 }
0x25e1   : > { %v8147_v46 = vpop.eup %8146  ;;  %8158 = vtanh.f32 %v4288_v40  ;;  %7391 = vmatpush3.bf16.msra.mxu0 %v4323_v30  ;;  %v4317_v57 = vmul.f32 %v9567_v60, %v8145_v62 }
0x25e2   : > { %v8149_v20 = vpop.eup %8148  ;;  %7392 = vmatprep.subr.bf16.mxu0 %v4324_v34  ;;  %v4315_v35 = vmul.f32 %v9575_v41, %v8147_v46 }
0x25e3   : > { %v8151_v10 = vpop.eup %8150  ;;  %v4318_v5 = vmul.f32 %v9571_v21, %v8149_v20 }
0x25e4   : > { %v4316_v18 = vmul.f32 %v9579_v3, %v8151_v10 }
0x25e5   : > { %7393 = vmatpush3.bf16.msra.mxu0 %v4324_v34  ;;  %v4326_v49 = vpack.c.bf16 %v4318_v5, %v4317_v57 }
0x25e6   : > { %v4325_v12 = vpack.c.bf16 %v4316_v18, %v4315_v35 }
0x25e8   : > { %v8153_v16 = vpop.eup %8152  ;;  %7394 = vmatprep.subr.bf16.mxu0 %v4325_v12 }
0x25e9   : > { %v8155_v17 = vpop.eup %8154  ;;  %7395 = vmatpush3.bf16.msra.mxu0 %v4325_v12  ;;  %v4321_v11 = vmul.f32 %v9583_v33, %v8153_v16  ;;  %v8336_v33 = vld [vmem:[%s10309_s3] sm:$0xff]  }
0x25ea   : > { %v8157_v28 = vpop.eup %8156  ;;  %7396 = vmatprep.subr.bf16.mxu0 %v4326_v49  ;;  %v4319_v21 = vmul.f32 %v9591_v48, %v8155_v17  ;;  %v3932_v48 = vld [vmem:[%s8693_s9 + $0xa8] sm:$0xff] }
0x25eb   : > { %v8159_v7 = vpop.eup %8158  ;;  %v4322_v60 = vmul.f32 %v9587_v44, %v8157_v28  ;;  %v3931_v44 = vld [vmem:[%s8693_s9 + $0xa0] sm:$0xff] }
0x25ec   : > { %v4320_v41 = vmul.f32 %v9595_v55, %v8159_v7  ;;  %v4378_v55 = vpack.c.bf16 %v3932_v48, %v3931_v44 }
0x25ed   : > { %7397 = vmatpush3.bf16.msra.mxu0 %v4326_v49  ;;  %v4328_v3 = vpack.c.bf16 %v4322_v60, %v4321_v11 }
0x25ee   : > { %v4327_v58 = vpack.c.bf16 %v4320_v41, %v4319_v21 }
0x25f0   : > { %7398 = vmatprep.subr.bf16.mxu0 %v4327_v58 }
0x25f1   : > { %7399 = vmatpush3.bf16.msra.mxu0 %v4327_v58 }
0x25f2   : > { %7400 = vmatprep.subr.bf16.mxu0 %v4328_v3 }
0x25f5   : > { %7401 = vmatpush3.bf16.msra.mxu0 %v4328_v3 }
0x25f6   : > { %7707 = vmatprep.subr.msk.bf16.mxu0 %vm933_vm3, %v9601_v50  ;;  %v8337_v50 = vld [vmem:[%s10309_s3 + $0x8] sm:$0xff]  }
0x25f8   : > { %7403 = vmatmul.mubr.msk.bf16.vlgmr.msra.gmra.mrb[136].mxu0 %vm864_vm2, %v9608_v22  ;;  %v9777_v22 = vld [vmem:[%s10309_s3 + $0x10] sm:$0xff]  }
0x25f9   : > { %7407 = vmatpush3.bf16.msra.mxu0 %v8709_v63  ;;  %7408 = vmatprep.mubr.msk.bf16.mxu0 %vm926_vm4, %v4378_v55 }
0x25fa   : > { %7424 = vmatprep.subr.bf16.mxu0 %v8336_v33 }
0x2600   : > { %7409 = vmatmul.mubr.msk.bf16.vlgmr.msra.gmra.mrb[140].mxu0 %vm926_vm4, %v4379_v53 }
0x2601   : > { %7425 = vmatpush3.bf16.msra.mxu0 %v8336_v33 }
0x2602   : > { %7426 = vmatprep.subr.bf16.mxu0 %v8337_v50 }
0x2605   : > { %7427 = vmatpush3.bf16.msra.mxu0 %v8337_v50 }
0x2606   : > { %7464 = vmatprep.subr.bf16.mxu0 %v9777_v22 }
0x26cb   : > { %v7404_v24 = vpop.f32.mrb[136].mxu0 }
0x26cc   : > { %v4363_v6 = vpop.f32.mrb[137].mxu0 }
0x26cd   : > { %v7405_v29 = vpop.f32.mrb[138].mxu0 }
0x26ce   : > { %v4436_v56 = vpack.c.bf16 %v7405_v29, %v7404_v24  ;;  %v4366_v51 = vpop.f32.mrb[139].mxu0 }
0x26cf   : > { %v4435_v23 = vpack.c.bf16 %v4366_v51, %v4363_v6 }
0x26d1   : > { %7420 = vmatprep.mubr.msk.bf16.mxu1 %vm724_vm1, %v4435_v23 }
0x26d2   : > { %7421 = vmatmul.mubr.msk.bf16.vlgmr.msra.gmra.mrb[92].mxu1 %vm724_vm1, %v4436_v56 }
0x26d3   : > { %7436 = vmatprep.mubr.msk.bf16.mxu1 %vm341_vm0, %v8339_v9  ;;  %v7410_v14 = vpop.f32.mrb[140].mxu0 }
0x26d4   : > { %v4420_v47 = vpop.f32.mrb[141].mxu0  ;;  %v4429_v1 = vadd.f32 %v9635_v38, %v7410_v14 }
0x26d5   : > { %v7411_v43 = vpop.f32.mrb[142].mxu0  ;;  %v4421_v42 = vadd.f32 %v9635_v38, %v4420_v47 }
0x26d6   : > { %v4423_v39 = vpop.f32.mrb[143].mxu0  ;;  %v4432_v34 = vadd.f32 %v9635_v38, %v7411_v43 }
0x26d7   : > { %v4424_v15 = vadd.f32 %v9635_v38, %v4423_v39 }
0x27a5   : > { %v7422_v8 = vpop.f32.mrb[92].mxu1 }
0x27a6   : > { %v4477_v36 = vpop.f32.mrb[93].mxu1  ;;  %v4494_v59 = vadd.f32 %v7422_v8, %v4429_v1 }
0x27a7   : > { %4524 = vrot.lane.b32.xlu0 %v4477_v36, %s8384_s26  ;;  %v7423_v52 = vpop.f32.mrb[94].mxu1  ;;  %v4492_v32 = vadd.f32 %v4477_v36, %v4421_v42 }
0x27a8   : > { %v4480_v4 = vpop.f32.mrb[95].mxu1  ;;  %v4495_v40 = vadd.f32 %v7423_v52, %v4432_v34  ;;  %v6398_v46 = vmul.f32 -1.442695, %v4494_v59 }
0x27a9   : > { %4526 = vrot.lane.b32.xlu1 %v4480_v4, %s8384_s26  ;;  %v4493_v0 = vadd.f32 %v4480_v4, %v4424_v15  ;;  %v6396_v30 = vmul.f32 -1.442695, %v4492_v32 }
0x27aa   : > { %v6399_v20 = vmul.f32 -1.442695, %v4495_v40 }
0x27ab   : > { %4528 = vrot.lane.b32.xlu0 %v7422_v8, %s8384_s26  ;;  %v6397_v62 = vmul.f32 -1.442695, %v4493_v0  ;;  %8160 = vpow2.f32 %v6396_v30 }
0x27ad   : > { %4530 = vrot.lane.b32.xlu1 %v7423_v52, %s8384_s26  ;;  %8162 = vpow2.f32 %v6397_v62 }
0x27ae   : > { %8164 = vpow2.f32 %v6398_v46 }
0x27af   : > { %8166 = vpow2.f32 %v6399_v20 }
0x27b5   : > { %v8161_v10 = vpop.eup %8160 }
0x27b6   : > { %v4508_v5 = vadd.f32 1.0, %v8161_v10 }
0x27b7   : > { %v8163_v57 = vpop.eup %8162 }
0x27b8   : > { %v8165_v35 = vpop.eup %8164  ;;  %v4509_v18 = vadd.f32 1.0, %v8163_v57  ;;  %8168 = vrcp.f32 %v4508_v5 }
0x27b9   : > { %v8167_v49 = vpop.eup %8166  ;;  %v4510_v12 = vadd.f32 1.0, %v8165_v35  ;;  %v8340_v35 = vld [vmem:[%s10309_s3 + $0x18] sm:$0xff]  }
0x27ba   : > { %v4511_v38 = vadd.f32 1.0, %v8167_v49  ;;  %8170 = vrcp.f32 %v4509_v18  ;;  %v8341_v18 = vld [vmem:[%s10309_s3 + $0x20] sm:$0xff]   ;;  %v8342_v49 = vld [vmem:[%s10309_s3 + $0x28] sm:$0xff]  }
0x27bb   : > { %8172 = vrcp.f32 %v4510_v12 }
0x27bc   : > { %8174 = vrcp.f32 %v4511_v38 }
0x27c2   : > { %v8169_v16 = vpop.eup %8168 }
0x27c3   : > { %v4564_v9 = vsub.f32 1.0, %v8169_v16  ;;  %v4588_v8 = vmul.f32 %v8169_v16, %v9651_v54 }
0x27c4   : > { %v8171_v7 = vpop.eup %8170 }
0x27c5   : > { %v8173_v21 = vpop.eup %8172  ;;  %v4565_v43 = vsub.f32 1.0, %v8171_v7  ;;  %v4589_v36 = vmul.f32 %v8171_v7, %v9653_v25 }
0x27c6   : > { %v8175_v58 = vpop.eup %8174  ;;  %v4566_v4 = vsub.f32 1.0, %v8173_v21  ;;  %v4590_v59 = vmul.f32 %v8173_v21, %v9659_v19 }
0x27c7   : > { %v4591_v30 = vmul.f32 %v8175_v58, %v9661_v45 }
0x2819   : > { %v4525_v17 = vpop.permute.xlu0 %4524 }
0x281a   : > { %v4536_v28 = vmul.f32 %v8169_v16, %v4525_v17 }
0x281b   : > { %v4527_v11 = vpop.permute.xlu1 %4526 }
0x281c   : > { %v4537_v60 = vmul.f32 %v8171_v7, %v4527_v11  ;;  %4544 = vrot.lane.b32.xlu0 %v4536_v28, %s8384_s26 }
0x281d   : > { %v4529_v41 = vpop.permute.xlu0 %4528 }
0x281e   : > { %v4538_v3 = vmul.f32 %v8173_v21, %v4529_v41  ;;  %4546 = vrot.lane.b32.xlu1 %v4537_v60, %s8384_s26  ;;  %v8343_v60 = vld [vmem:[%s10308_s2 + $0x38] sm:$0xff]   ;;  %v8344_v21 = vld [vmem:[%s10308_s2 + $0x40] sm:$0xff]   ;;  %v8345_v41 = vld [vmem:[%s10309_s3 + $0x30] sm:$0xff]  }
0x281f   : > { %v4531_v33 = vpop.permute.xlu1 %4530 }
0x2820   : > { %v4539_v44 = vmul.f32 %v8175_v58, %v4531_v33  ;;  %4548 = vrot.lane.b32.xlu0 %v4538_v3, %s8384_s26  ;;  %v8346_v3 = vld [vmem:[%s10308_s2 + $0x48] sm:$0xff]   ;;  %v8348_v33 = vld [vmem:[%s10308_s2 + $0x58] sm:$0xff]  }
0x2822   : > { %4550 = vrot.lane.b32.xlu1 %v4539_v44, %s8384_s26  ;;  %v8349_v44 = vld [vmem:[%s10308_s2] sm:$0xff]  }
0x288e   : > { %v4545_v48 = vpop.permute.xlu0 %4544 }
0x288f   : > { %v4556_v55 = vadd.f32 %v4545_v48, %v4421_v42  ;;  %v8350_v48 = vld [vmem:[%s10308_s2 + $0x8] sm:$0xff]  }
0x2890   : > { %v4547_v37 = vpop.permute.xlu1 %4546 }
0x2891   : > { %8176 = vtanh.f32 %v4556_v55  ;;  %v4557_v2 = vadd.f32 %v4547_v37, %v4424_v15  ;;  %v8351_v55 = vld [vmem:[%s10308_s2 + $0x10] sm:$0xff]   ;;  %v8352_v37 = vld [vmem:[%s10309_s3 + $0x38] sm:$0xff]  }
0x2892   : > { %v4549_v53 = vpop.permute.xlu0 %4548 }
0x2893   : > { %8178 = vtanh.f32 %v4557_v2  ;;  %v4558_v50 = vadd.f32 %v4549_v53, %v4429_v1  ;;  %v8353_v2 = vld [vmem:[%s10309_s3 + $0x40] sm:$0xff]   ;;  %v8354_v53 = vld [vmem:[%s10308_s2 + $0x18] sm:$0xff]  }
0x2894   : > { %v4551_v24 = vpop.permute.xlu1 %4550 }
0x2895   : > { %8180 = vtanh.f32 %v4558_v50  ;;  %v4559_v6 = vadd.f32 %v4551_v24, %v4432_v34  ;;  %v4567_v34 = vsub.f32 1.0, %v8175_v58  ;;  %v8347_v58 = vld [vmem:[%s10308_s2 + $0x50] sm:$0xff]   ;;  %v8355_v50 = vld [vmem:[%s10308_s2 + $0x20] sm:$0xff]   ;;  %v8356_v24 = vld [vmem:[%s10308_s2 + $0x28] sm:$0xff]  }
0x2897   : > { %8182 = vtanh.f32 %v4559_v6 }
0x289b   : > { %v8177_v29 = vpop.eup %8176 }
0x289c   : > { %4572 = vrot.lane.b32.xlu0 %v8177_v29, %s8385_s16  ;;  %v8357_v29 = vld [vmem:[%s10310_s4] ss:$0 sm:$0xff] }
0x289d   : > { %v8179_v56 = vpop.eup %8178 }
0x289e   : > { %4574 = vrot.lane.b32.xlu1 %v8179_v56, %s8385_s16 }
0x289f   : > { %v8181_v51 = vpop.eup %8180 }
0x28a0   : > { %4576 = vrot.lane.b32.xlu0 %v8181_v51, %s8385_s16 }
0x28a1   : > { %v8183_v23 = vpop.eup %8182 }
0x28a2   : > { %4578 = vrot.lane.b32.xlu1 %v8183_v23, %s8385_s16 }
0x290e   : > { %v4573_v14 = vpop.permute.xlu0 %4572 }
0x290f   : > { %v4584_v47 = vmul.f32 %v4573_v14, %v4564_v9 }
0x2910   : > { %v4575_v39 = vpop.permute.xlu1 %4574 }
0x2911   : > { %v4585_v52 = vmul.f32 %v4575_v39, %v4565_v43  ;;  %v9804_v15 = vadd.f32 %v4588_v8, %v4584_v47 }
0x2912   : > { %v4577_v42 = vpop.permute.xlu0 %4576 }
0x2913   : > { %v9806_v1 = vadd.f32 %v4589_v36, %v4585_v52  ;;  %v4586_v32 = vmul.f32 %v4577_v42, %v4566_v4 }
0x2914   : > { %v4579_v0 = vpop.permute.xlu1 %4578 }
0x2915   : > { %v4587_v40 = vmul.f32 %v4579_v0, %v4567_v34  ;;  %v4620_v62 = vpack.c.bf16 %v9806_v1, %v9804_v15  ;;  %v9812_v46 = vadd.f32 %v4590_v59, %v4586_v32 }
0x2917   : > { %v9814_v20 = vadd.f32 %v4591_v30, %v4587_v40  ;;  %4624 = vrot.lane.b32.xlu0 %v4620_v62, %s8385_s16 }
0x2919   : > { %v4621_v10 = vpack.c.bf16 %v9814_v20, %v9812_v46 }
0x291b   : > { %4626 = vrot.lane.b32.xlu1 %v4621_v10, %s8385_s16 }
0x2989   : > { %v4625_v57 = vpop.permute.xlu0 %4624 }
0x298a   : > { %7428 = vmatprep.mubr.msk.bf16.mxu0 %vm341_vm0, %v4625_v57 }
0x298d   : > { %v4627_v5 = vpop.permute.xlu1 %4626 }
0x298e   : > { %7429 = vmatmul.mubr.msk.bf16.vlgmr.msra.gmra.mrb[144].mxu0 %vm341_vm0, %v4627_v5 }
0x298f   : > { %7465 = vmatpush3.bf16.msra.mxu0 %v9777_v22 }
0x2990   : > { %7466 = vmatprep.subr.bf16.mxu0 %v8340_v35 }
0x2993   : > { %7467 = vmatpush3.bf16.msra.mxu0 %v8340_v35 }
0x2994   : > { %7468 = vmatprep.subr.bf16.mxu0 %v8341_v18 }
0x2997   : > { %7469 = vmatpush3.bf16.msra.mxu0 %v8341_v18 }
0x2998   : > { %7470 = vmatprep.subr.bf16.mxu0 %v8342_v49 }
0x299b   : > { %7471 = vmatpush3.bf16.msra.mxu0 %v8342_v49 }
0x2a61   : > { %v7430_v12 = vpop.f32.mrb[144].mxu0 }
0x2a62   : > { %v4668_v22 = vpop.f32.mrb[145].mxu0 }
0x2a63   : > { %v7431_v38 = vpop.f32.mrb[146].mxu0 }
0x2a64   : > { %v4684_v16 = vpack.c.bf16 %v7431_v38, %v7430_v12  ;;  %v4671_v17 = vpop.f32.mrb[147].mxu0 }
0x2a65   : > { %v4683_v28 = vpack.c.bf16 %v4671_v17, %v4668_v22 }
0x2a66   : > { %4689 = vrot.lane.b32.xlu1 %v4684_v16, %s8384_s26 }
0x2a67   : > { %4687 = vrot.lane.b32.xlu0 %v4683_v28, %s8384_s26 }
0x2ad8   : > { %v4690_v11 = vpop.permute.xlu1 %4689 }
0x2ad9   : > { %v4688_v7 = vpop.permute.xlu0 %4687 }
0x2ada   : > { %7432 = vmatprep.subr.bf16.mxu1 %v4688_v7 }
0x2adb   : > { %7433 = vmatpush3.bf16.msra.mxu1 %v4688_v7 }
0x2adc   : > { %7434 = vmatprep.subr.bf16.mxu1 %v4690_v11 }
0x2adf   : > { %7435 = vmatpush3.bf16.msra.mxu1 %v4690_v11 }
0x2ae0   : > { %7448 = vmatprep.subr.bf16.mxu1 %v4683_v28 }
0x2ae2   : > { %7437 = vmatmul.mubr.msk.bf16.vlgmr.msra.gmra.mrb[96].mxu1 %vm341_vm0, %v8343_v60 }
0x2ae3   : > { %7449 = vmatpush3.bf16.msra.mxu1 %v4683_v28  ;;  %7440 = vmatprep.mubr.msk.bf16.mxu1 %vm341_vm0, %v8344_v21 }
0x2ae4   : > { %7450 = vmatprep.subr.bf16.mxu1 %v4684_v16 }
0x2ae7   : > { %7451 = vmatpush3.bf16.msra.mxu1 %v4684_v16 }
0x2ae8   : > { %7506 = vmatprep.subr.bf16.mxu1 %v8345_v41 }
0x2aea   : > { %7441 = vmatmul.mubr.msk.bf16.gmra.mrb[100].mxu1 %vm341_vm0, %v8346_v3 }
0x2aeb   : > { %7444 = vmatprep.mubr.msk.bf16.mxu1 %vm341_vm0, %v8347_v58 }
0x2af2   : > { %7445 = vmatmul.mubr.msk.bf16.gmra.mrb[104].mxu1 %vm341_vm0, %v8348_v33 }
0x2af3   : > { %7452 = vmatprep.mubr.msk.bf16.mxu1 %vm341_vm0, %v8349_v44  ;;  %v8358_v44 = vld [vmem:[%s10308_s2 + $0x60] sm:$0xff]  }
0x2afa   : > { %7453 = vmatmul.mubr.msk.bf16.vlgmr.msra.gmra.mrb[96].mxu1 %vm341_vm0, %v8350_v48 }
0x2afb   : > { %7456 = vmatprep.mubr.msk.bf16.mxu1 %vm341_vm0, %v8351_v55  ;;  %7507 = vmatpush3.bf16.msra.mxu1 %v8345_v41  ;;  %v8359_v55 = vld [vmem:[%s10310_s4 + $0x1] ss:$0 sm:$0xff] }
0x2afc   : > { %7508 = vmatprep.subr.bf16.mxu1 %v8352_v37 }
0x2aff   : > { %7509 = vmatpush3.bf16.msra.mxu1 %v8352_v37 }
0x2b00   : > { %7510 = vmatprep.subr.bf16.mxu1 %v8353_v2 }
0x2b02   : > { %7457 = vmatmul.mubr.msk.bf16.gmra.mrb[100].mxu1 %vm341_vm0, %v8354_v53 }
0x2b03   : > { %7460 = vmatprep.mubr.msk.bf16.mxu1 %vm341_vm0, %v8355_v50  ;;  %7511 = vmatpush3.bf16.msra.mxu1 %v8353_v2 }
0x2b04   : > { %7512 = vmatprep.subr.bf16.mxu1 %v9707_v26 }
0x2b07   : > { %7513 = vmatpush3.bf16.msra.mxu1 %v9707_v26 }
0x2b0a   : > { %7461 = vmatmul.mubr.msk.bf16.gmra.mrb[104].mxu1 %vm341_vm0, %v8356_v24 }
0x2bcd   : > { %v7454_v6 = vpop.f32.mrb[96].mxu1 }
0x2bce   : > { %v4857_v56 = vadd.f32 %v8357_v29, %v7454_v6  ;;  %v4808_v51 = vpop.f32.mrb[97].mxu1 }
0x2bcf   : > { %v4855_v23 = vadd.f32 %v8357_v29, %v4808_v51  ;;  %v7455_v9 = vpop.f32.mrb[98].mxu1 }
0x2bd0   : > { %8184 = vtanh.f32 %v4857_v56  ;;  %v4858_v14 = vadd.f32 %v8357_v29, %v7455_v9  ;;  %v4811_v47 = vpop.f32.mrb[99].mxu1 }
0x2bd1   : > { %8186 = vtanh.f32 %v4855_v23  ;;  %v4856_v26 = vadd.f32 %v8357_v29, %v4811_v47 }
0x2bd2   : > { %8188 = vtanh.f32 %v4858_v14 }
0x2bd3   : > { %8190 = vtanh.f32 %v4856_v26 }
0x2bd5   : > { %v7458_v43 = vpop.f32.mrb[100].mxu1 }
0x2bd6   : > { %v4861_v39 = vadd.f32 %v8357_v29, %v7458_v43  ;;  %v4824_v8 = vpop.f32.mrb[101].mxu1 }
0x2bd7   : > { %v4859_v36 = vadd.f32 %v8357_v29, %v4824_v8  ;;  %v7459_v52 = vpop.f32.mrb[102].mxu1 }
0x2bd8   : > { %8192 = vtanh.f32 %v4861_v39  ;;  %v4862_v4 = vadd.f32 %v8357_v29, %v7459_v52  ;;  %v4827_v42 = vpop.f32.mrb[103].mxu1 }
0x2bd9   : > { %8194 = vtanh.f32 %v4859_v36  ;;  %v4860_v32 = vadd.f32 %v8357_v29, %v4827_v42  ;;  %v8360_v42 = vld [vmem:[%s8624_s28 + $0x10] sm:$0xff] }
0x2bda   : > { %v8185_v34 = vpop.eup %8184  ;;  %8196 = vtanh.f32 %v4862_v4 }
0x2bdb   : > { %v8187_v0 = vpop.eup %8186  ;;  %8198 = vtanh.f32 %v4860_v32 }
0x2bdc   : > { %v8189_v59 = vpop.eup %8188 }
0x2bdd   : > { %v8191_v30 = vpop.eup %8190  ;;  %v7462_v40 = vpop.f32.mrb[104].mxu1  ;;  %v4880_v62 = vpack.c.bf16 %v8189_v59, %v8185_v34  ;;  %v8361_v34 = vld [vmem:[%s8624_s28 + $0x18] sm:$0xff] }
0x2bde   : > { %v4865_v10 = vadd.f32 %v8357_v29, %v7462_v40  ;;  %v4840_v57 = vpop.f32.mrb[105].mxu1  ;;  %v4879_v5 = vpack.c.bf16 %v8191_v30, %v8187_v0  ;;  %v8362_v40 = vld [vmem:[%s8624_s28] sm:$0xff] }
0x2bdf   : > { %v4863_v35 = vadd.f32 %v8357_v29, %v4840_v57  ;;  %v7463_v18 = vpop.f32.mrb[106].mxu1 }
0x2be0   : > { %8200 = vtanh.f32 %v4865_v10  ;;  %v4866_v49 = vadd.f32 %v8357_v29, %v7463_v18  ;;  %v4843_v12 = vpop.f32.mrb[107].mxu1  ;;  %7472 = vmatprep.mubr.msk.bf16.mxu0 %vm724_vm1, %v4879_v5  ;;  %v8363_v10 = vld [vmem:[%s8624_s28 + $0x8] sm:$0xff] }
0x2be1   : > { %8202 = vtanh.f32 %v4863_v35  ;;  %v4864_v22 = vadd.f32 %v8357_v29, %v4843_v12  ;;  %7473 = vmatmul.mubr.msk.bf16.vlgmr.msra.gmra.mrb[148].mxu0 %vm724_vm1, %v4880_v62 }
0x2be2   : > { %v8193_v38 = vpop.eup %8192  ;;  %8204 = vtanh.f32 %v4866_v49 }
0x2be3   : > { %v8195_v16 = vpop.eup %8194  ;;  %8206 = vtanh.f32 %v4864_v22 }
0x2be4   : > { %v8197_v17 = vpop.eup %8196 }
0x2be5   : > { %v8199_v28 = vpop.eup %8198  ;;  %v4882_v7 = vpack.c.bf16 %v8197_v17, %v8193_v38 }
0x2be6   : > { %v4881_v11 = vpack.c.bf16 %v8199_v28, %v8195_v16 }
0x2be8   : > { %7476 = vmatprep.mubr.msk.bf16.mxu0 %vm724_vm1, %v4881_v11  ;;  %v8364_v11 = vld [vmem:[%s8624_s28 + $0x30] sm:$0xff] }
0x2be9   : > { %7477 = vmatmul.mubr.msk.bf16.gmra.mrb[152].mxu0 %vm724_vm1, %v4882_v7 }
0x2bea   : > { %v8201_v60 = vpop.eup %8200 }
0x2beb   : > { %v8203_v21 = vpop.eup %8202 }
0x2bec   : > { %v8205_v41 = vpop.eup %8204 }
0x2bed   : > { %v8207_v3 = vpop.eup %8206  ;;  %v4884_v58 = vpack.c.bf16 %v8205_v41, %v8201_v60 }
0x2bee   : > { %v4883_v33 = vpack.c.bf16 %v8207_v3, %v8203_v21  ;;  %v8365_v21 = vld [vmem:[%s8624_s28 + $0x38] sm:$0xff]  ;;  %v8366_v3 = vld [vmem:[%s8624_s28 + $0x20] sm:$0xff] }
0x2bf0   : > { %7480 = vmatprep.mubr.msk.bf16.mxu0 %vm724_vm1, %v4883_v33  ;;  %v8367_v33 = vld [vmem:[%s8624_s28 + $0x28] sm:$0xff] }
0x2bf1   : > { %7481 = vmatmul.mubr.msk.bf16.gmra.mrb[156].mxu0 %vm724_vm1, %v4884_v58 }
0x2bf2   : > { %7496 = vmatprep.mubr.msk.bf16.mxu0 %vm864_vm2, %v8358_v44 }
0x2cb4   : > { %v7474_v48 = vpop.f32.mrb[148].mxu0 }
0x2cb5   : > { %v4946_v37 = vadd.f32 %v8359_v55, %v7474_v48  ;;  %v4937_v2 = vpop.f32.mrb[149].mxu0 }
0x2cb6   : > { %v4938_v53 = vadd.f32 %v8359_v55, %v4937_v2  ;;  %v7475_v50 = vpop.f32.mrb[150].mxu0 }
0x2cb7   : > { %8208 = vtanh.f32 %v4946_v37  ;;  %v4949_v24 = vadd.f32 %v8359_v55, %v7475_v50  ;;  %v4940_v6 = vpop.f32.mrb[151].mxu0 }
0x2cb8   : > { %8210 = vtanh.f32 %v4938_v53  ;;  %v4941_v29 = vadd.f32 %v8359_v55, %v4940_v6 }
0x2cb9   : > { %8212 = vtanh.f32 %v4949_v24  ;;  %v8368_v24 = vld [vmem:[%s8624_s28 + $0x50] sm:$0xff] }
0x2cba   : > { %8214 = vtanh.f32 %v4941_v29  ;;  %v8369_v29 = vld [vmem:[%s8624_s28 + $0x58] sm:$0xff] }
0x2cbc   : > { %v7478_v56 = vpop.f32.mrb[152].mxu0 }
0x2cbd   : > { %v4962_v51 = vadd.f32 %v8359_v55, %v7478_v56  ;;  %v4953_v23 = vpop.f32.mrb[153].mxu0 }
0x2cbe   : > { %v4954_v9 = vadd.f32 %v8359_v55, %v4953_v23  ;;  %v7479_v14 = vpop.f32.mrb[154].mxu0 }
0x2cbf   : > { %8216 = vtanh.f32 %v4962_v51  ;;  %v4965_v47 = vadd.f32 %v8359_v55, %v7479_v14  ;;  %v4956_v26 = vpop.f32.mrb[155].mxu0  ;;  %v8370_v51 = vld [vmem:[%s8624_s28 + $0x40] sm:$0xff] }
0x2cc0   : > { %8218 = vtanh.f32 %v4954_v9  ;;  %v4957_v43 = vadd.f32 %v8359_v55, %v4956_v26  ;;  %v8371_v9 = vld [vmem:[%s8624_s28 + $0x48] sm:$0xff] }
0x2cc1   : > { %v8209_v39 = vpop.eup %8208  ;;  %8220 = vtanh.f32 %v4965_v47 }
0x2cc2   : > { %v8211_v8 = vpop.eup %8210  ;;  %8222 = vtanh.f32 %v4957_v43  ;;  %v4998_v32 = vmul.f32 %v8360_v42, %v8209_v39  ;;  %v8372_v43 = vld [vmem:[%s10309_s3 + $0x50] sm:$0x3]  ;;  %v8373_v39 = vld [vmem:[%s10308_s2 + $0x68] sm:$0xff]   ;;  %v4619_v42 = vld [vmem:[%s8693_s9 + $0xd8] sm:$0xff] }
0x2cc3   : > { %v8213_v36 = vpop.eup %8212  ;;  %v4996_v62 = vmul.f32 %v8362_v40, %v8211_v8  ;;  %v4616_v8 = vld [vmem:[%s8693_s9 + $0xc0] sm:$0xff] }
0x2cc4   : > { %v8215_v52 = vpop.eup %8214  ;;  %v7482_v4 = vpop.f32.mrb[156].mxu0  ;;  %v4999_v0 = vmul.f32 %v8361_v34, %v8213_v36  ;;  %v4617_v36 = vld [vmem:[%s8693_s9 + $0xc8] sm:$0xff] }
0x2cc5   : > { %v4978_v59 = vadd.f32 %v8359_v55, %v7482_v4  ;;  %v4969_v30 = vpop.f32.mrb[157].mxu0  ;;  %v4997_v57 = vmul.f32 %v8363_v10, %v8215_v52  ;;  %v5063_v52 = vpack.c.bf16 %v4617_v36, %v4616_v8  ;;  %v4618_v4 = vld [vmem:[%s8693_s9 + $0xd0] sm:$0xff] }
0x2cc6   : > { %v4970_v5 = vadd.f32 %v8359_v55, %v4969_v30  ;;  %v7483_v35 = vpop.f32.mrb[158].mxu0  ;;  %v5009_v18 = vpack.c.bf16 %v4999_v0, %v4998_v32  ;;  %v5064_v32 = vpack.c.bf16 %v4619_v42, %v4618_v4 }
0x2cc7   : > { %8224 = vtanh.f32 %v4978_v59  ;;  %v4981_v49 = vadd.f32 %v8359_v55, %v7483_v35  ;;  %v4972_v12 = vpop.f32.mrb[159].mxu0  ;;  %v5008_v22 = vpack.c.bf16 %v4997_v57, %v4996_v62 }
0x2cc8   : > { %8226 = vtanh.f32 %v4970_v5  ;;  %v4973_v38 = vadd.f32 %v8359_v55, %v4972_v12 }
0x2cc9   : > { %v8217_v16 = vpop.eup %8216  ;;  %8228 = vtanh.f32 %v4981_v49  ;;  %7484 = vmatprep.subr.bf16.mxu0 %v5008_v22 }
0x2cca   : > { %v8219_v17 = vpop.eup %8218  ;;  %8230 = vtanh.f32 %v4973_v38  ;;  %7485 = vmatpush3.bf16.msra.mxu0 %v5008_v22  ;;  %v5002_v60 = vmul.f32 %v8364_v11, %v8217_v16  ;;  %v8374_v22 = vld [vmem:[%s10310_s4 + $0x2] ss:$0 sm:$0xff] }
0x2ccb   : > { %v8221_v28 = vpop.eup %8220  ;;  %7486 = vmatprep.subr.bf16.mxu0 %v5009_v18  ;;  %v5000_v58 = vmul.f32 %v8366_v3, %v8219_v17 }
0x2ccc   : > { %v8223_v7 = vpop.eup %8222  ;;  %v5003_v41 = vmul.f32 %v8365_v21, %v8221_v28 }
0x2ccd   : > { %v5001_v44 = vmul.f32 %v8367_v33, %v8223_v7 }
0x2cce   : > { %7487 = vmatpush3.bf16.msra.mxu0 %v5009_v18  ;;  %v5011_v48 = vpack.c.bf16 %v5003_v41, %v5002_v60 }
0x2ccf   : > { %v5010_v55 = vpack.c.bf16 %v5001_v44, %v5000_v58 }
0x2cd1   : > { %v8225_v37 = vpop.eup %8224  ;;  %7488 = vmatprep.subr.bf16.mxu0 %v5010_v55 }
0x2cd2   : > { %v8227_v2 = vpop.eup %8226  ;;  %7489 = vmatpush3.bf16.msra.mxu0 %v5010_v55  ;;  %v5006_v6 = vmul.f32 %v8368_v24, %v8225_v37 }
0x2cd3   : > { %v8229_v53 = vpop.eup %8228  ;;  %7490 = vmatprep.subr.bf16.mxu0 %v5011_v48  ;;  %v5004_v23 = vmul.f32 %v8370_v51, %v8227_v2 }
0x2cd4   : > { %v8231_v50 = vpop.eup %8230  ;;  %v5007_v56 = vmul.f32 %v8369_v29, %v8229_v53 }
0x2cd5   : > { %v5005_v14 = vmul.f32 %v8371_v9, %v8231_v50 }
0x2cd6   : > { %7491 = vmatpush3.bf16.msra.mxu0 %v5011_v48  ;;  %v5013_v47 = vpack.c.bf16 %v5007_v56, %v5006_v6 }
0x2cd7   : > { %v5012_v26 = vpack.c.bf16 %v5005_v14, %v5004_v23 }
0x2cd9   : > { %7492 = vmatprep.subr.bf16.mxu0 %v5012_v26 }
0x2cda   : > { %7493 = vmatpush3.bf16.msra.mxu0 %v5012_v26 }
0x2cdb   : > { %7494 = vmatprep.subr.bf16.mxu0 %v5013_v47 }
0x2cde   : > { %7495 = vmatpush3.bf16.msra.mxu0 %v5013_v47 }
0x2cdf   : > { %7708 = vmatprep.subr.msk.bf16.mxu0 %vm933_vm3, %v8372_v43 }
0x2ce1   : > { %7497 = vmatmul.mubr.msk.bf16.vlgmr.msra.gmra.mrb[160].mxu0 %vm864_vm2, %v8373_v39 }
0x2ce2   : > { %7501 = vmatpush3.bf16.msra.mxu0 %v8709_v63  ;;  %7502 = vmatprep.mubr.msk.bf16.mxu0 %vm926_vm4, %v5063_v52 }
0x2ce9   : > { %7503 = vmatmul.mubr.msk.bf16.vlgmr.msra.gmra.mrb[164].mxu0 %vm926_vm4, %v5064_v32 }
0x2db4   : > { %v7498_v34 = vpop.f32.mrb[160].mxu0 }
0x2db5   : > { %v5048_v0 = vpop.f32.mrb[161].mxu0 }
0x2db6   : > { %v7499_v59 = vpop.f32.mrb[162].mxu0 }
0x2db7   : > { %v5121_v30 = vpack.c.bf16 %v7499_v59, %v7498_v34  ;;  %v5051_v40 = vpop.f32.mrb[163].mxu0 }
0x2db8   : > { %v5120_v62 = vpack.c.bf16 %v5051_v40, %v5048_v0 }
0x2dba   : > { %7514 = vmatprep.mubr.msk.bf16.mxu1 %vm724_vm1, %v5120_v62  ;;  %v7746_v62 = vld [vmem:[%s10309_s3 + $0x58] sm:$0xff]  }
0x2dbb   : > { %7515 = vmatmul.mubr.msk.bf16.vlgmr.msra.gmra.mrb[108].mxu1 %vm724_vm1, %v5121_v30  ;;  %7518 = vmatprep.subr.bf16.mxu0 %v7746_v62 }
0x2dbc   : > { %v7504_v63 = vpop.f32.mrb[164].mxu0  ;;  %7519 = vmatpush3.bf16.msra.mxu0 %v7746_v62  ;;  %7614 = vmatprep.subr.bf16.mxu1 %v7746_v62 }
0x2dbd   : > { %v5105_v10 = vpop.f32.mrb[165].mxu0  ;;  %v5114_v17 = vadd.f32 %v8374_v22, %v7504_v63  ;;  %7616 = vmatpush3.bf16.msra.mxu1 %v7746_v62 }
0x2dbe   : > { %v7505_v57 = vpop.f32.mrb[166].mxu0  ;;  %v5106_v38 = vadd.f32 %v8374_v22, %v5105_v10 }
0x2dbf   : > { %v5108_v5 = vpop.f32.mrb[167].mxu0  ;;  %v5117_v7 = vadd.f32 %v8374_v22, %v7505_v57  ;;  %v7747_v57 = vld [vmem:[%s10309_s3 + $0x60] sm:$0xff]  }
0x2dc0   : > { %v5109_v16 = vadd.f32 %v8374_v22, %v5108_v5  ;;  %v10336_v5 = vld [vmem:[#allocation3_spill] sm:$0xff]  ;;  %7520 = vmatprep.subr.bf16.mxu0 %v7747_v57  ;;  %7615 = vmatprep.subr.bf16.mxu1 %v7747_v57  ;;  %v10341_v22 = vld [vmem:[#allocation8_spill] sm:$0xff] }
0x2dc1   : > { %7521 = vmatpush3.bf16.msra.mxu0 %v7747_v57  ;;  %7617 = vmatpush3.bf16.msra.mxu1 %v7747_v57 }
0x2e8e   : > { %v7516_v35 = vpop.f32.mrb[108].mxu1 }
0x2e8f   : > { %v5162_v18 = vpop.f32.mrb[109].mxu1  ;;  %v5179_v60 = vadd.f32 %v7516_v35, %v5114_v17 }
0x2e90   : > { %5209 = vrot.lane.b32.xlu0 %v5162_v18, %s8384_s26  ;;  %v7517_v49 = vpop.f32.mrb[110].mxu1  ;;  %v5177_v28 = vadd.f32 %v5162_v18, %v5106_v38  ;;  %v10338_v18 = vld [vmem:[#allocation5_spill] sm:$0xff] }
0x2e91   : > { %v5165_v12 = vpop.f32.mrb[111].mxu1  ;;  %v5180_v41 = vadd.f32 %v7517_v49, %v5117_v7  ;;  %v6428_v58 = vmul.f32 -1.442695, %v5179_v60 }
0x2e92   : > { %5211 = vrot.lane.b32.xlu1 %v5165_v12, %s8384_s26  ;;  %v5178_v11 = vadd.f32 %v5165_v12, %v5109_v16  ;;  %v6426_v21 = vmul.f32 -1.442695, %v5177_v28  ;;  %v10340_v12 = vld [vmem:[#allocation7_spill] sm:$0xff]  ;;  %v10345_v28 = vld [vmem:[#allocation12_spill] sm:$0xff] }
0x2e93   : > { %v6429_v33 = vmul.f32 -1.442695, %v5180_v41 }
0x2e94   : > { %5213 = vrot.lane.b32.xlu0 %v7516_v35, %s8384_s26  ;;  %v6427_v3 = vmul.f32 -1.442695, %v5178_v11  ;;  %8232 = vpow2.f32 %v6426_v21  ;;  %v10337_v35 = vld [vmem:[#allocation4_spill] sm:$0xff]  ;;  %v10347_v11 = vld [vmem:[#allocation14_spill] sm:$0xff] }
0x2e96   : > { %5215 = vrot.lane.b32.xlu1 %v7517_v49, %s8384_s26  ;;  %8234 = vpow2.f32 %v6427_v3  ;;  %v10339_v49 = vld [vmem:[#allocation6_spill] sm:$0xff] }
0x2e97   : > { %8236 = vpow2.f32 %v6428_v58 }
0x2e98   : > { %8238 = vpow2.f32 %v6429_v33 }
0x2e9e   : > { %v8233_v44 = vpop.eup %8232 }
0x2e9f   : > { %v5193_v55 = vadd.f32 1.0, %v8233_v44 }
0x2ea0   : > { %v8235_v48 = vpop.eup %8234 }
0x2ea1   : > { %v8237_v37 = vpop.eup %8236  ;;  %v5194_v2 = vadd.f32 1.0, %v8235_v48  ;;  %8240 = vrcp.f32 %v5193_v55 }
0x2ea2   : > { %v8239_v53 = vpop.eup %8238  ;;  %v5195_v50 = vadd.f32 1.0, %v8237_v37 }
0x2ea3   : > { %v5196_v24 = vadd.f32 1.0, %v8239_v53  ;;  %8242 = vrcp.f32 %v5194_v2 }
0x2ea4   : > { %8244 = vrcp.f32 %v5195_v50 }
0x2ea5   : > { %8246 = vrcp.f32 %v5196_v24 }
0x2eab   : > { %v9941_v6 = vpop.eup %8240 }
0x2ead   : > { %v9944_v51 = vpop.eup %8242 }
0x2eae   : > { %v9948_v14 = vpop.eup %8244 }
0x2eaf   : > { %v9952_v43 = vpop.eup %8246  ;;  %v5251_v21 = vsub.f32 1.0, %v9948_v14  ;;  %v5275_v58 = vmul.f32 %v9948_v14, %v9812_v46 }
0x2eb0   : > { %v5276_v55 = vmul.f32 %v9952_v43, %v9814_v20 }
0x2f02   : > { %v5210_v29 = vpop.permute.xlu0 %5209 }
0x2f03   : > { %v5221_v56 = vmul.f32 %v9941_v6, %v5210_v29 }
0x2f04   : > { %v5212_v23 = vpop.permute.xlu1 %5211 }
0x2f05   : > { %v5222_v9 = vmul.f32 %v9944_v51, %v5212_v23  ;;  %5229 = vrot.lane.b32.xlu0 %v5221_v56, %s8384_s26 }
0x2f06   : > { %v5214_v47 = vpop.permute.xlu0 %5213 }
0x2f07   : > { %v5223_v26 = vmul.f32 %v9948_v14, %v5214_v47  ;;  %5231 = vrot.lane.b32.xlu1 %v5222_v9, %s8384_s26 }
0x2f08   : > { %v5216_v39 = vpop.permute.xlu1 %5215 }
0x2f09   : > { %v5224_v8 = vmul.f32 %v9952_v43, %v5216_v39  ;;  %5233 = vrot.lane.b32.xlu0 %v5223_v26, %s8384_s26 }
0x2f0b   : > { %5235 = vrot.lane.b32.xlu1 %v5224_v8, %s8384_s26 }
0x2f77   : > { %v5230_v36 = vpop.permute.xlu0 %5229 }
0x2f78   : > { %v5241_v52 = vadd.f32 %v5230_v36, %v5106_v38  ;;  %v10342_v38 = vld [vmem:[#allocation9_spill] sm:$0xff] }
0x2f79   : > { %v5232_v4 = vpop.permute.xlu1 %5231 }
0x2f7a   : > { %8248 = vtanh.f32 %v5241_v52  ;;  %v5242_v42 = vadd.f32 %v5232_v4, %v5109_v16  ;;  %v10343_v16 = vld [vmem:[#allocation10_spill] sm:$0xff] }
0x2f7b   : > { %v5234_v32 = vpop.permute.xlu0 %5233 }
0x2f7c   : > { %8250 = vtanh.f32 %v5242_v42  ;;  %v5243_v34 = vadd.f32 %v5234_v32, %v5114_v17  ;;  %v10344_v17 = vld [vmem:[#allocation11_spill] sm:$0xff] }
0x2f7d   : > { %v5236_v0 = vpop.permute.xlu1 %5235 }
0x2f7e   : > { %8252 = vtanh.f32 %v5243_v34  ;;  %v5244_v59 = vadd.f32 %v5236_v0, %v5117_v7  ;;  %v10346_v7 = vld [vmem:[#allocation13_spill] sm:$0xff] }
0x2f80   : > { %8254 = vtanh.f32 %v5244_v59 }
0x2f84   : > { %v8249_v30 = vpop.eup %8248 }
0x2f85   : > { %5257 = vrot.lane.b32.xlu0 %v8249_v30, %s8385_s16 }
0x2f86   : > { %v8251_v40 = vpop.eup %8250 }
0x2f87   : > { %5259 = vrot.lane.b32.xlu1 %v8251_v40, %s8385_s16 }
0x2f88   : > { %v8253_v63 = vpop.eup %8252 }
0x2f89   : > { %5261 = vrot.lane.b32.xlu0 %v8253_v63, %s8385_s16 }
0x2f8a   : > { %v8255_v10 = vpop.eup %8254 }
0x2f8b   : > { %5263 = vrot.lane.b32.xlu1 %v8255_v10, %s8385_s16 }
0x2f8d   : > { %1175 = vrot.lane.b32.xlu0 %v10336_v5, %s8385_s16 }
0x2f8f   : > { %1177 = vrot.lane.b32.xlu1 %v10337_v35, %s8385_s16 }
0x2f91   : > { %1179 = vrot.lane.b32.xlu0 %v10338_v18, %s8385_s16 }
0x2f93   : > { %1181 = vrot.lane.b32.xlu1 %v10339_v49, %s8385_s16 }
0x2f95   : > { %1860 = vrot.lane.b32.xlu0 %v10340_v12, %s8385_s16 }
0x2f97   : > { %1862 = vrot.lane.b32.xlu1 %v10341_v22, %s8385_s16 }
0x2f99   : > { %1864 = vrot.lane.b32.xlu0 %v10342_v38, %s8385_s16 }
0x2f9b   : > { %1866 = vrot.lane.b32.xlu1 %v10343_v16, %s8385_s16 }
0x2f9d   : > { %2545 = vrot.lane.b32.xlu0 %v10344_v17, %s8385_s16 }
0x2f9f   : > { %2547 = vrot.lane.b32.xlu1 %v10345_v28, %s8385_s16 }
0x2fa1   : > { %2549 = vrot.lane.b32.xlu0 %v10346_v7, %s8385_s16 }
0x2fa3   : > { %2551 = vrot.lane.b32.xlu1 %v10347_v11, %s8385_s16 }
0x2fa5   : > { %3230 = vrot.lane.b32.xlu0 %v9361_v31, %s8385_s16  ;;  %v5249_v31 = vsub.f32 1.0, %v9941_v6 }
0x2fa7   : > { %3232 = vrot.lane.b32.xlu1 %v9363_v61, %s8385_s16 }
0x2fa9   : > { %3234 = vrot.lane.b32.xlu0 %v9369_v27, %s8385_s16  ;;  %v5273_v27 = vmul.f32 %v9941_v6, %v9804_v15 }
0x2fab   : > { %3236 = vrot.lane.b32.xlu1 %v9371_v13, %s8385_s16 }
0x2fad   : > { %3915 = vrot.lane.b32.xlu0 %v9651_v54, %s8385_s16  ;;  %v5250_v54 = vsub.f32 1.0, %v9944_v51 }
0x2faf   : > { %3917 = vrot.lane.b32.xlu1 %v9653_v25, %s8385_s16 }
0x2fb1   : > { %3919 = vrot.lane.b32.xlu0 %v9659_v19, %s8385_s16 }
0x2fb3   : > { %3921 = vrot.lane.b32.xlu1 %v9661_v45, %s8385_s16  ;;  %v5274_v45 = vmul.f32 %v9944_v51, %v9806_v1 }
0x2fb5   : > { %4600 = vrot.lane.b32.xlu0 %v9804_v15, %s8385_s16  ;;  %v5252_v15 = vsub.f32 1.0, %v9952_v43 }
0x2fb7   : > { %4602 = vrot.lane.b32.xlu1 %v9806_v1, %s8385_s16 }
0x2fb9   : > { %4604 = vrot.lane.b32.xlu0 %v9812_v46, %s8385_s16 }
0x2fbb   : > { %4606 = vrot.lane.b32.xlu1 %v9814_v20, %s8385_s16 }
0x2ff7   : > { %v5258_v61 = vpop.permute.xlu0 %5257 }
0x2ff8   : > { %v5269_v13 = vmul.f32 %v5258_v61, %v5249_v31 }
0x2ff9   : > { %v5260_v25 = vpop.permute.xlu1 %5259 }
0x2ffa   : > { %v5277_v19 = vadd.f32 %v5273_v27, %v5269_v13  ;;  %v5270_v60 = vmul.f32 %v5260_v25, %v5250_v54 }
0x2ffb   : > { %v5262_v41 = vpop.permute.xlu0 %5261 }
0x2ffc   : > { %v5278_v3 = vadd.f32 %v5274_v45, %v5270_v60  ;;  %v5271_v33 = vmul.f32 %v5262_v41, %v5251_v21  ;;  %5285 = vrot.lane.b32.xlu0 %v5277_v19, %s8385_s16 }
0x2ffd   : > { %v5264_v44 = vpop.permute.xlu1 %5263 }
0x2ffe   : > { %v5279_v48 = vadd.f32 %v5275_v58, %v5271_v33  ;;  %v5272_v37 = vmul.f32 %v5264_v44, %v5252_v15  ;;  %5287 = vrot.lane.b32.xlu1 %v5278_v3, %s8385_s16 }
0x2fff   : > { %v1176_v1 = vpop.permute.xlu0 %1175 }
0x3000   : > { %v5280_v2 = vadd.f32 %v5276_v55, %v5272_v37  ;;  %1187 = vst.msk [vmem:[#allocation2] sm:$0xff] %vm341_vm0, %v1176_v1  ;;  %5289 = vrot.lane.b32.xlu0 %v5279_v48, %s8385_s16  ;;  %v7748_v48 = vld [vmem:[%s10309_s3 + $0x68] sm:$0xff]   ;;  %v7749_v55 = vld [vmem:[%s10309_s3 + $0x70] sm:$0xff]  }
0x3001   : > { %v1178_v46 = vpop.permute.xlu1 %1177  ;;  %7550 = vmatprep.subr.bf16.mxu1 %v7748_v48 }
0x3002   : > { %1188 = vst.msk [vmem:[#allocation2 + $0x8] sm:$0xff] %vm341_vm0, %v1178_v46  ;;  %5291 = vrot.lane.b32.xlu1 %v5280_v2, %s8385_s16 }
0x3003   : > { %v1180_v53 = vpop.permute.xlu0 %1179 }
0x3004   : > { %1189 = vst.msk [vmem:[#allocation2 + $0x10] sm:$0xff] %vm341_vm0, %v1180_v53 }
0x3005   : > { %v1182_v50 = vpop.permute.xlu1 %1181 }
0x3006   : > { %1190 = vst.msk [vmem:[#allocation2 + $0x18] sm:$0xff] %vm341_vm0, %v1182_v50 }
0x3007   : > { %v1861_v20 = vpop.permute.xlu0 %1860  ;;  %v5301_v6 = vld [vmem:[#allocation2] sm:$0xff] }
0x3008   : > { %1872 = vst.msk [vmem:[#allocation2 + $0x20] sm:$0xff] %vm341_vm0, %v1861_v20 }
0x3009   : > { %v1863_v24 = vpop.permute.xlu1 %1862  ;;  %v5302_v29 = vld [vmem:[#allocation2 + $0x8] sm:$0xff] }
0x300a   : > { %1873 = vst.msk [vmem:[#allocation2 + $0x28] sm:$0xff] %vm341_vm0, %v1863_v24  ;;  %v5329_v56 = vpack.c.bf16 %v5302_v29, %v5301_v6 }
0x300b   : > { %v1865_v51 = vpop.permute.xlu0 %1864  ;;  %v5303_v9 = vld [vmem:[#allocation2 + $0x10] sm:$0xff] }
0x300c   : > { %1874 = vst.msk [vmem:[#allocation2 + $0x30] sm:$0xff] %vm341_vm0, %v1865_v51  ;;  %7522 = vmatprep.mubr.msk.bf16.mxu0 %vm341_vm0, %v5329_v56  ;;  %v10082_v56 = vld [vmem:[%s10310_s4 + $0x3] ss:$0 sm:$0xff] }
0x300d   : > { %v1867_v23 = vpop.permute.xlu1 %1866  ;;  %v5304_v14 = vld [vmem:[#allocation2 + $0x18] sm:$0xff] }
0x300e   : > { %1875 = vst.msk [vmem:[#allocation2 + $0x38] sm:$0xff] %vm341_vm0, %v1867_v23  ;;  %v5330_v47 = vpack.c.bf16 %v5304_v14, %v5303_v9 }
0x300f   : > { %v2546_v26 = vpop.permute.xlu0 %2545  ;;  %v5305_v39 = vld [vmem:[#allocation2 + $0x20] sm:$0xff] }
0x3010   : > { %2557 = vst.msk [vmem:[#allocation2 + $0x40] sm:$0xff] %vm341_vm0, %v2546_v26  ;;  %7523 = vmatmul.mubr.msk.bf16.vlgmr.msra.gmra.mrb[168].mxu0 %vm341_vm0, %v5330_v47 }
0x3011   : > { %v2548_v43 = vpop.permute.xlu1 %2547  ;;  %v5306_v8 = vld [vmem:[#allocation2 + $0x28] sm:$0xff] }
0x3012   : > { %2558 = vst.msk [vmem:[#allocation2 + $0x48] sm:$0xff] %vm341_vm0, %v2548_v43  ;;  %v5331_v36 = vpack.c.bf16 %v5306_v8, %v5305_v39 }
0x3013   : > { %v2550_v52 = vpop.permute.xlu0 %2549  ;;  %v5307_v42 = vld [vmem:[#allocation2 + $0x30] sm:$0xff] }
0x3014   : > { %2559 = vst.msk [vmem:[#allocation2 + $0x50] sm:$0xff] %vm341_vm0, %v2550_v52  ;;  %7526 = vmatprep.mubr.msk.bf16.mxu0 %vm341_vm0, %v5331_v36 }
0x3015   : > { %v2552_v4 = vpop.permute.xlu1 %2551  ;;  %v5308_v32 = vld [vmem:[#allocation2 + $0x38] sm:$0xff] }
0x3016   : > { %2560 = vst.msk [vmem:[#allocation2 + $0x58] sm:$0xff] %vm341_vm0, %v2552_v4  ;;  %v5332_v34 = vpack.c.bf16 %v5308_v32, %v5307_v42 }
0x3017   : > { %v3231_v0 = vpop.permute.xlu0 %3230  ;;  %v5309_v30 = vld [vmem:[#allocation2 + $0x40] sm:$0xff] }
0x3018   : > { %3242 = vst.msk [vmem:[#allocation2 + $0x60] sm:$0xff] %vm341_vm0, %v3231_v0  ;;  %7527 = vmatmul.mubr.msk.bf16.gmra.mrb[172].mxu0 %vm341_vm0, %v5332_v34 }
0x3019   : > { %v3233_v59 = vpop.permute.xlu1 %3232  ;;  %v5310_v40 = vld [vmem:[#allocation2 + $0x48] sm:$0xff] }
0x301a   : > { %3243 = vst.msk [vmem:[#allocation2 + $0x68] sm:$0xff] %vm341_vm0, %v3233_v59  ;;  %v5333_v62 = vpack.c.bf16 %v5310_v40, %v5309_v30 }
0x301b   : > { %v3235_v63 = vpop.permute.xlu0 %3234  ;;  %v5311_v57 = vld [vmem:[#allocation2 + $0x50] sm:$0xff] }
0x301c   : > { %3244 = vst.msk [vmem:[#allocation2 + $0x70] sm:$0xff] %vm341_vm0, %v3235_v63  ;;  %7530 = vmatprep.mubr.msk.bf16.mxu0 %vm341_vm0, %v5333_v62 }
0x301d   : > { %v3237_v10 = vpop.permute.xlu1 %3236  ;;  %v5312_v5 = vld [vmem:[#allocation2 + $0x58] sm:$0xff] }
0x301e   : > { %3245 = vst.msk [vmem:[#allocation2 + $0x78] sm:$0xff] %vm341_vm0, %v3237_v10  ;;  %v5334_v35 = vpack.c.bf16 %v5312_v5, %v5311_v57 }
0x301f   : > { %v3916_v18 = vpop.permute.xlu0 %3915  ;;  %v5313_v12 = vld [vmem:[#allocation2 + $0x60] sm:$0xff] }
0x3020   : > { %3927 = vst.msk [vmem:[#allocation2 + $0x80] sm:$0xff] %vm341_vm0, %v3916_v18  ;;  %7531 = vmatmul.mubr.msk.bf16.gmra.mrb[176].mxu0 %vm341_vm0, %v5334_v35 }
0x3021   : > { %v3918_v49 = vpop.permute.xlu1 %3917  ;;  %v5314_v22 = vld [vmem:[#allocation2 + $0x68] sm:$0xff] }
0x3022   : > { %3928 = vst.msk [vmem:[#allocation2 + $0x88] sm:$0xff] %vm341_vm0, %v3918_v49  ;;  %v5335_v38 = vpack.c.bf16 %v5314_v22, %v5313_v12 }
0x3023   : > { %v3920_v16 = vpop.permute.xlu0 %3919  ;;  %v5315_v28 = vld [vmem:[#allocation2 + $0x70] sm:$0xff] }
0x3024   : > { %3929 = vst.msk [vmem:[#allocation2 + $0x90] sm:$0xff] %vm341_vm0, %v3920_v16  ;;  %7534 = vmatprep.mubr.msk.bf16.mxu0 %vm341_vm0, %v5335_v38 }
0x3025   : > { %v3922_v17 = vpop.permute.xlu1 %3921  ;;  %v5316_v7 = vld [vmem:[#allocation2 + $0x78] sm:$0xff] }
0x3026   : > { %3930 = vst.msk [vmem:[#allocation2 + $0x98] sm:$0xff] %vm341_vm0, %v3922_v17  ;;  %v5336_v11 = vpack.c.bf16 %v5316_v7, %v5315_v28 }
0x3027   : > { %v4601_v31 = vpop.permute.xlu0 %4600  ;;  %v5317_v27 = vld [vmem:[#allocation2 + $0x80] sm:$0xff] }
0x3028   : > { %4612 = vst.msk [vmem:[#allocation2 + $0xa0] sm:$0xff] %vm341_vm0, %v4601_v31  ;;  %7535 = vmatmul.mubr.msk.bf16.gmra.mrb[180].mxu0 %vm341_vm0, %v5336_v11 }
0x3029   : > { %v4603_v61 = vpop.permute.xlu1 %4602  ;;  %v5318_v13 = vld [vmem:[#allocation2 + $0x88] sm:$0xff] }
0x302a   : > { %4613 = vst.msk [vmem:[#allocation2 + $0xa8] sm:$0xff] %vm341_vm0, %v4603_v61  ;;  %v5337_v54 = vpack.c.bf16 %v5318_v13, %v5317_v27 }
0x302b   : > { %v4605_v25 = vpop.permute.xlu0 %4604  ;;  %v5319_v45 = vld [vmem:[#allocation2 + $0x90] sm:$0xff] }
0x302c   : > { %4614 = vst.msk [vmem:[#allocation2 + $0xb0] sm:$0xff] %vm341_vm0, %v4605_v25  ;;  %7538 = vmatprep.mubr.msk.bf16.mxu1 %vm341_vm0, %v5337_v54 }
0x302d   : > { %v4607_v19 = vpop.permute.xlu1 %4606  ;;  %v5320_v60 = vld [vmem:[#allocation2 + $0x98] sm:$0xff] }
0x302e   : > { %4615 = vst.msk [vmem:[#allocation2 + $0xb8] sm:$0xff] %vm341_vm0, %v4607_v19  ;;  %v5338_v21 = vpack.c.bf16 %v5320_v60, %v5319_v45 }
0x302f   : > { %v5321_v41 = vld [vmem:[#allocation2 + $0xa0] sm:$0xff] }
0x3030   : > { %7539 = vmatmul.mubr.msk.bf16.vlgmr.msra.gmra.mrb[112].mxu1 %vm341_vm0, %v5338_v21 }
0x3031   : > { %v5322_v3 = vld [vmem:[#allocation2 + $0xa8] sm:$0xff]  ;;  %7551 = vmatpush3.bf16.msra.mxu1 %v7748_v48 }
0x3032   : > { %v5339_v58 = vpack.c.bf16 %v5322_v3, %v5321_v41  ;;  %7552 = vmatprep.subr.bf16.mxu1 %v7749_v55 }
0x3033   : > { %v5323_v33 = vld [vmem:[#allocation2 + $0xb0] sm:$0xff] }
0x3034   : > { %7542 = vmatprep.mubr.msk.bf16.mxu1 %vm341_vm0, %v5339_v58 }
0x3035   : > { %v5324_v15 = vld [vmem:[#allocation2 + $0xb8] sm:$0xff]  ;;  %7553 = vmatpush3.bf16.msra.mxu1 %v7749_v55 }
0x3036   : > { %v5340_v44 = vpack.c.bf16 %v5324_v15, %v5323_v33 }
0x3038   : > { %7543 = vmatmul.mubr.msk.bf16.gmra.mrb[116].mxu1 %vm341_vm0, %v5340_v44 }
0x306e   : > { %v5286_v37 = vpop.permute.xlu0 %5285 }
0x306f   : > { %5297 = vst.msk [vmem:[#allocation2 + $0xc0] sm:$0xff] %vm341_vm0, %v5286_v37 }
0x3070   : > { %v5288_v1 = vpop.permute.xlu1 %5287 }
0x3071   : > { %5298 = vst.msk [vmem:[#allocation2 + $0xc8] sm:$0xff] %vm341_vm0, %v5288_v1 }
0x3072   : > { %v5290_v2 = vpop.permute.xlu0 %5289 }
0x3073   : > { %5299 = vst.msk [vmem:[#allocation2 + $0xd0] sm:$0xff] %vm341_vm0, %v5290_v2 }
0x3074   : > { %v5292_v46 = vpop.permute.xlu1 %5291 }
0x3075   : > { %5300 = vst.msk [vmem:[#allocation2 + $0xd8] sm:$0xff] %vm341_vm0, %v5292_v46 }
0x3076   : > { %v5325_v53 = vld [vmem:[#allocation2 + $0xc0] sm:$0xff] }
0x3078   : > { %v5326_v50 = vld [vmem:[#allocation2 + $0xc8] sm:$0xff] }
0x3079   : > { %v5341_v20 = vpack.c.bf16 %v5326_v50, %v5325_v53 }
0x307a   : > { %v5327_v24 = vld [vmem:[#allocation2 + $0xd0] sm:$0xff] }
0x307b   : > { %7546 = vmatprep.mubr.msk.bf16.mxu1 %vm341_vm0, %v5341_v20 }
0x307c   : > { %v5328_v6 = vld [vmem:[#allocation2 + $0xd8] sm:$0xff] }
0x307d   : > { %v5342_v29 = vpack.c.bf16 %v5328_v6, %v5327_v24 }
0x307f   : > { %7547 = vmatmul.mubr.msk.bf16.gmra.mrb[120].mxu1 %vm341_vm0, %v5342_v29 }
0x30e3   : > { %v7524_v51 = vpop.f32.mrb[168].mxu0 }
0x30e4   : > { %v5444_v23 = vadd.f32 %v7524_v51, %v10082_v56  ;;  %v5435_v9 = vpop.f32.mrb[169].mxu0 }
0x30e5   : > { %v5436_v14 = vadd.f32 %v10082_v56, %v5435_v9  ;;  %v7525_v47 = vpop.f32.mrb[170].mxu0 }
0x30e6   : > { %v5447_v26 = vadd.f32 %v7525_v47, %v10082_v56  ;;  %v5438_v43 = vpop.f32.mrb[171].mxu0  ;;  %v5548_v8 = vmax.f32 %v5444_v23, 0.0 }
0x30e7   : > { %v5439_v39 = vadd.f32 %v10082_v56, %v5438_v43  ;;  %v5546_v52 = vmax.f32 %v5436_v14, 0.0 }
0x30e8   : > { %v5549_v36 = vmax.f32 %v5447_v26, 0.0 }
0x30e9   : > { %v5547_v4 = vmax.f32 %v5439_v39, 0.0 }
0x30ea   : > { %v5575_v42 = vpack.c.bf16 %v5549_v36, %v5548_v8 }
0x30eb   : > { %v5574_v32 = vpack.c.bf16 %v5547_v4, %v5546_v52  ;;  %v7528_v34 = vpop.f32.mrb[172].mxu0 }
0x30ec   : > { %v5460_v0 = vadd.f32 %v7528_v34, %v10082_v56  ;;  %v5451_v59 = vpop.f32.mrb[173].mxu0 }
0x30ed   : > { %v5452_v30 = vadd.f32 %v10082_v56, %v5451_v59  ;;  %v7529_v40 = vpop.f32.mrb[174].mxu0  ;;  %7554 = vmatprep.mubr.msk.bf16.mxu1 %vm341_vm0, %v5574_v32 }
0x30ee   : > { %v5463_v62 = vadd.f32 %v7529_v40, %v10082_v56  ;;  %v5454_v63 = vpop.f32.mrb[175].mxu0  ;;  %7555 = vmatmul.mubr.msk.bf16.vlgmr.msra.gmra.mrb[124].mxu1 %vm341_vm0, %v5575_v42  ;;  %v5552_v57 = vmax.f32 %v5460_v0, 0.0 }
0x30ef   : > { %v5455_v10 = vadd.f32 %v10082_v56, %v5454_v63  ;;  %v5550_v35 = vmax.f32 %v5452_v30, 0.0 }
0x30f0   : > { %v5553_v5 = vmax.f32 %v5463_v62, 0.0 }
0x30f1   : > { %v5551_v18 = vmax.f32 %v5455_v10, 0.0  ;;  %v7750_v10 = vld [vmem:[%s10309_s3 + $0x78] sm:$0xff]  }
0x30f2   : > { %v5577_v49 = vpack.c.bf16 %v5553_v5, %v5552_v57  ;;  %7582 = vmatprep.subr.bf16.mxu0 %v7750_v10  ;;  %v7751_v57 = vld [vmem:[%s10309_s3 + $0x80] sm:$0xff]  }
0x30f3   : > { %v5576_v12 = vpack.c.bf16 %v5551_v18, %v5550_v35  ;;  %v7532_v22 = vpop.f32.mrb[176].mxu0  ;;  %7583 = vmatpush3.bf16.msra.mxu0 %v7750_v10 }
0x30f4   : > { %v5476_v38 = vadd.f32 %v7532_v22, %v10082_v56  ;;  %v5467_v16 = vpop.f32.mrb[177].mxu0  ;;  %7584 = vmatprep.subr.bf16.mxu0 %v7751_v57 }
0x30f5   : > { %v5468_v17 = vadd.f32 %v10082_v56, %v5467_v16  ;;  %v7533_v28 = vpop.f32.mrb[178].mxu0  ;;  %7558 = vmatprep.mubr.msk.bf16.mxu1 %vm341_vm0, %v5576_v12 }
0x30f6   : > { %v5479_v7 = vadd.f32 %v7533_v28, %v10082_v56  ;;  %v5470_v11 = vpop.f32.mrb[179].mxu0  ;;  %7559 = vmatmul.mubr.msk.bf16.gmra.mrb[128].mxu1 %vm341_vm0, %v5577_v49  ;;  %v5556_v61 = vmax.f32 %v5476_v38, 0.0 }
0x30f7   : > { %v5471_v31 = vadd.f32 %v10082_v56, %v5470_v11  ;;  %v5554_v13 = vmax.f32 %v5468_v17, 0.0  ;;  %7585 = vmatpush3.bf16.msra.mxu0 %v7751_v57 }
0x30f8   : > { %v5557_v27 = vmax.f32 %v5479_v7, 0.0 }
0x30f9   : > { %v5555_v54 = vmax.f32 %v5471_v31, 0.0 }
0x30fa   : > { %v5579_v25 = vpack.c.bf16 %v5557_v27, %v5556_v61  ;;  %v10135_v27 = vld [vmem:[%s10310_s4 + $0x4] ss:$0 sm:$0xff] }
0x30fb   : > { %v5578_v19 = vpack.c.bf16 %v5555_v54, %v5554_v13  ;;  %v7536_v45 = vpop.f32.mrb[180].mxu0 }
0x30fc   : > { %v5492_v60 = vadd.f32 %v7536_v45, %v10082_v56  ;;  %v5483_v21 = vpop.f32.mrb[181].mxu0 }
0x30fd   : > { %v5484_v41 = vadd.f32 %v10082_v56, %v5483_v21  ;;  %v7537_v3 = vpop.f32.mrb[182].mxu0  ;;  %7562 = vmatprep.mubr.msk.bf16.mxu1 %vm341_vm0, %v5578_v19 }
0x30fe   : > { %v5495_v58 = vadd.f32 %v7537_v3, %v10082_v56  ;;  %v5486_v33 = vpop.f32.mrb[183].mxu0  ;;  %7563 = vmatmul.mubr.msk.bf16.gmra.mrb[132].mxu1 %vm341_vm0, %v5579_v25  ;;  %v5560_v44 = vmax.f32 %v5492_v60, 0.0 }
0x30ff   : > { %v5487_v15 = vadd.f32 %v10082_v56, %v5486_v33  ;;  %v5558_v55 = vmax.f32 %v5484_v41, 0.0 }
0x3100   : > { %v5561_v48 = vmax.f32 %v5495_v58, 0.0 }
0x3101   : > { %v5559_v37 = vmax.f32 %v5487_v15, 0.0 }
0x3102   : > { %v5581_v1 = vpack.c.bf16 %v5561_v48, %v5560_v44 }
0x3103   : > { %v5580_v2 = vpack.c.bf16 %v5559_v37, %v5558_v55  ;;  %v7540_v46 = vpop.f32.mrb[112].mxu1 }
0x3104   : > { %v5508_v53 = vadd.f32 %v7540_v46, %v10082_v56  ;;  %v5499_v50 = vpop.f32.mrb[113].mxu1 }
0x3105   : > { %v5500_v20 = vadd.f32 %v10082_v56, %v5499_v50  ;;  %v7541_v24 = vpop.f32.mrb[114].mxu1  ;;  %7566 = vmatprep.mubr.msk.bf16.mxu1 %vm341_vm0, %v5580_v2 }
0x3106   : > { %v5511_v6 = vadd.f32 %v7541_v24, %v10082_v56  ;;  %v5502_v29 = vpop.f32.mrb[115].mxu1  ;;  %7567 = vmatmul.mubr.msk.bf16.gmra.mrb[136].mxu1 %vm341_vm0, %v5581_v1  ;;  %v5564_v23 = vmax.f32 %v5508_v53, 0.0 }
0x3107   : > { %v5503_v51 = vadd.f32 %v10082_v56, %v5502_v29  ;;  %v5562_v14 = vmax.f32 %v5500_v20, 0.0 }
0x3108   : > { %v5565_v9 = vmax.f32 %v5511_v6, 0.0 }
0x3109   : > { %v5563_v47 = vmax.f32 %v5503_v51, 0.0 }
0x310a   : > { %v5583_v26 = vpack.c.bf16 %v5565_v9, %v5564_v23 }
0x310b   : > { %v5582_v43 = vpack.c.bf16 %v5563_v47, %v5562_v14  ;;  %v7544_v39 = vpop.f32.mrb[116].mxu1 }
0x310c   : > { %v5524_v8 = vadd.f32 %v7544_v39, %v10082_v56  ;;  %v5515_v36 = vpop.f32.mrb[117].mxu1 }
0x310d   : > { %v5516_v52 = vadd.f32 %v10082_v56, %v5515_v36  ;;  %v7545_v4 = vpop.f32.mrb[118].mxu1  ;;  %7570 = vmatprep.mubr.msk.bf16.mxu1 %vm341_vm0, %v5582_v43 }
0x310e   : > { %v5527_v42 = vadd.f32 %v7545_v4, %v10082_v56  ;;  %v5518_v32 = vpop.f32.mrb[119].mxu1  ;;  %7571 = vmatmul.mubr.msk.bf16.gmra.mrb[140].mxu1 %vm341_vm0, %v5583_v26  ;;  %v5568_v0 = vmax.f32 %v5524_v8, 0.0 }
0x310f   : > { %v5519_v34 = vadd.f32 %v10082_v56, %v5518_v32  ;;  %v5566_v30 = vmax.f32 %v5516_v52, 0.0 }
0x3110   : > { %v5569_v59 = vmax.f32 %v5527_v42, 0.0 }
0x3111   : > { %v5567_v40 = vmax.f32 %v5519_v34, 0.0 }
0x3112   : > { %v5585_v62 = vpack.c.bf16 %v5569_v59, %v5568_v0 }
0x3113   : > { %v5584_v63 = vpack.c.bf16 %v5567_v40, %v5566_v30 }
0x3115   : > { %7574 = vmatprep.mubr.msk.bf16.mxu1 %vm341_vm0, %v5584_v63 }
0x3116   : > { %7575 = vmatmul.mubr.msk.bf16.gmra.mrb[144].mxu1 %vm341_vm0, %v5585_v62 }
0x3152   : > { %v7548_v5 = vpop.f32.mrb[120].mxu1 }
0x3153   : > { %v5540_v35 = vadd.f32 %v7548_v5, %v10082_v56  ;;  %v5531_v18 = vpop.f32.mrb[121].mxu1 }
0x3154   : > { %v5532_v49 = vadd.f32 %v10082_v56, %v5531_v18  ;;  %v7549_v12 = vpop.f32.mrb[122].mxu1 }
0x3155   : > { %v5543_v22 = vadd.f32 %v7549_v12, %v10082_v56  ;;  %v5534_v38 = vpop.f32.mrb[123].mxu1  ;;  %v5572_v17 = vmax.f32 %v5540_v35, 0.0 }
0x3156   : > { %v5535_v16 = vadd.f32 %v10082_v56, %v5534_v38  ;;  %v5570_v7 = vmax.f32 %v5532_v49, 0.0 }
0x3157   : > { %v5573_v28 = vmax.f32 %v5543_v22, 0.0 }
0x3158   : > { %v5571_v11 = vmax.f32 %v5535_v16, 0.0 }
0x3159   : > { %v5587_v31 = vpack.c.bf16 %v5573_v28, %v5572_v17 }
0x315a   : > { %v5586_v61 = vpack.c.bf16 %v5571_v11, %v5570_v7 }
0x315c   : > { %7578 = vmatprep.mubr.msk.bf16.mxu1 %vm341_vm0, %v5586_v61 }
0x315d   : > { %7579 = vmatmul.mubr.msk.bf16.gmra.mrb[148].mxu1 %vm341_vm0, %v5587_v31 }
0x31c1   : > { %v7556_v13 = vpop.f32.mrb[124].mxu1 }
0x31c2   : > { %v5689_v54 = vadd.f32 %v7556_v13, %v10135_v27  ;;  %v5680_v25 = vpop.f32.mrb[125].mxu1 }
0x31c3   : > { %v5681_v56 = vadd.f32 %v10135_v27, %v5680_v25  ;;  %v7557_v19 = vpop.f32.mrb[126].mxu1 }
0x31c4   : > { %v5692_v45 = vadd.f32 %v7557_v19, %v10135_v27  ;;  %v5683_v60 = vpop.f32.mrb[127].mxu1  ;;  %v5793_v41 = vmax.f32 %v5689_v54, 0.0 }
0x31c5   : > { %v5684_v21 = vadd.f32 %v10135_v27, %v5683_v60  ;;  %v5791_v58 = vmax.f32 %v5681_v56, 0.0 }
0x31c6   : > { %v5794_v3 = vmax.f32 %v5692_v45, 0.0 }
0x31c7   : > { %v5792_v33 = vmax.f32 %v5684_v21, 0.0 }
0x31c8   : > { %v5820_v15 = vpack.c.bf16 %v5794_v3, %v5793_v41 }
0x31c9   : > { %v5819_v44 = vpack.c.bf16 %v5792_v33, %v5791_v58  ;;  %v7560_v48 = vpop.f32.mrb[128].mxu1 }
0x31ca   : > { %v5705_v55 = vadd.f32 %v7560_v48, %v10135_v27  ;;  %v5696_v37 = vpop.f32.mrb[129].mxu1 }
0x31cb   : > { %v5697_v1 = vadd.f32 %v10135_v27, %v5696_v37  ;;  %v7561_v2 = vpop.f32.mrb[130].mxu1  ;;  %7586 = vmatprep.mubr.msk.bf16.mxu0 %vm341_vm0, %v5819_v44 }
0x31cc   : > { %v5708_v46 = vadd.f32 %v7561_v2, %v10135_v27  ;;  %v5699_v53 = vpop.f32.mrb[131].mxu1  ;;  %7587 = vmatmul.mubr.msk.bf16.vlgmr.msra.gmra.mrb[184].mxu0 %vm341_vm0, %v5820_v15  ;;  %v5797_v20 = vmax.f32 %v5705_v55, 0.0 }
0x31cd   : > { %v5700_v50 = vadd.f32 %v10135_v27, %v5699_v53  ;;  %v5795_v6 = vmax.f32 %v5697_v1, 0.0 }
0x31ce   : > { %v5798_v24 = vmax.f32 %v5708_v46, 0.0 }
0x31cf   : > { %v5796_v29 = vmax.f32 %v5700_v50, 0.0 }
0x31d0   : > { %v5822_v51 = vpack.c.bf16 %v5798_v24, %v5797_v20 }
0x31d1   : > { %v5821_v23 = vpack.c.bf16 %v5796_v29, %v5795_v6  ;;  %v7564_v9 = vpop.f32.mrb[132].mxu1 }
0x31d2   : > { %v5721_v14 = vadd.f32 %v7564_v9, %v10135_v27  ;;  %v5712_v47 = vpop.f32.mrb[133].mxu1 }
0x31d3   : > { %v5713_v26 = vadd.f32 %v10135_v27, %v5712_v47  ;;  %v7565_v43 = vpop.f32.mrb[134].mxu1  ;;  %7590 = vmatprep.mubr.msk.bf16.mxu0 %vm341_vm0, %v5821_v23 }
0x31d4   : > { %v5724_v39 = vadd.f32 %v7565_v43, %v10135_v27  ;;  %v5715_v8 = vpop.f32.mrb[135].mxu1  ;;  %7591 = vmatmul.mubr.msk.bf16.gmra.mrb[188].mxu0 %vm341_vm0, %v5822_v51  ;;  %v5801_v52 = vmax.f32 %v5721_v14, 0.0 }
0x31d5   : > { %v5716_v36 = vadd.f32 %v10135_v27, %v5715_v8  ;;  %v5799_v42 = vmax.f32 %v5713_v26, 0.0 }
0x31d6   : > { %v5802_v4 = vmax.f32 %v5724_v39, 0.0 }
0x31d7   : > { %v5800_v32 = vmax.f32 %v5716_v36, 0.0  ;;  %v10182_v36 = vld [vmem:[%s10310_s4 + $0x5] ss:$0 sm:$0xff] }
0x31d8   : > { %v5824_v34 = vpack.c.bf16 %v5802_v4, %v5801_v52  ;;  %v6038_v4 = vld [vmem:[%s8693_s9 + $0x10] sm:$0xff] }
0x31d9   : > { %v5823_v0 = vpack.c.bf16 %v5800_v32, %v5799_v42  ;;  %v7568_v59 = vpop.f32.mrb[136].mxu1  ;;  %v6036_v32 = vld [vmem:[%s8693_s9] sm:$0xff] }
0x31da   : > { %v5737_v30 = vadd.f32 %v7568_v59, %v10135_v27  ;;  %v5728_v40 = vpop.f32.mrb[137].mxu1  ;;  %v6039_v59 = vld [vmem:[%s8693_s9 + $0x18] sm:$0xff] }
0x31db   : > { %v5729_v62 = vadd.f32 %v10135_v27, %v5728_v40  ;;  %v7569_v63 = vpop.f32.mrb[138].mxu1  ;;  %7594 = vmatprep.mubr.msk.bf16.mxu0 %vm341_vm0, %v5823_v0 }
0x31dc   : > { %v5740_v10 = vadd.f32 %v7569_v63, %v10135_v27  ;;  %v5731_v57 = vpop.f32.mrb[139].mxu1  ;;  %7595 = vmatmul.mubr.msk.bf16.gmra.mrb[192].mxu0 %vm341_vm0, %v5824_v34  ;;  %v5805_v35 = vmax.f32 %v5737_v30, 0.0  ;;  %v6037_v63 = vld [vmem:[%s8693_s9 + $0x8] sm:$0xff] }
0x31dd   : > { %v5732_v5 = vadd.f32 %v10135_v27, %v5731_v57  ;;  %v5803_v49 = vmax.f32 %v5729_v62, 0.0 }
0x31de   : > { %v5806_v18 = vmax.f32 %v5740_v10, 0.0 }
0x31df   : > { %v5804_v12 = vmax.f32 %v5732_v5, 0.0 }
0x31e0   : > { %v5826_v22 = vpack.c.bf16 %v5806_v18, %v5805_v35 }
0x31e1   : > { %v5825_v38 = vpack.c.bf16 %v5804_v12, %v5803_v49  ;;  %v7572_v16 = vpop.f32.mrb[140].mxu1  ;;  %v6042_v49 = vld [vmem:[%s8693_s9 + $0x30] sm:$0xff] }
0x31e2   : > { %v5753_v17 = vadd.f32 %v7572_v16, %v10135_v27  ;;  %v5744_v28 = vpop.f32.mrb[141].mxu1 }
0x31e3   : > { %v5745_v7 = vadd.f32 %v10135_v27, %v5744_v28  ;;  %v7573_v11 = vpop.f32.mrb[142].mxu1  ;;  %7598 = vmatprep.mubr.msk.bf16.mxu0 %vm341_vm0, %v5825_v38  ;;  %v6040_v38 = vld [vmem:[%s8693_s9 + $0x20] sm:$0xff]  ;;  %v6043_v28 = vld [vmem:[%s8693_s9 + $0x38] sm:$0xff] }
0x31e4   : > { %v5756_v31 = vadd.f32 %v7573_v11, %v10135_v27  ;;  %v5747_v61 = vpop.f32.mrb[143].mxu1  ;;  %7599 = vmatmul.mubr.msk.bf16.gmra.mrb[196].mxu0 %vm341_vm0, %v5826_v22  ;;  %v5809_v54 = vmax.f32 %v5753_v17, 0.0 }
0x31e5   : > { %v5748_v13 = vadd.f32 %v10135_v27, %v5747_v61  ;;  %v5807_v56 = vmax.f32 %v5745_v7, 0.0  ;;  %v6041_v61 = vld [vmem:[%s8693_s9 + $0x28] sm:$0xff] }
0x31e6   : > { %v5810_v25 = vmax.f32 %v5756_v31, 0.0 }
0x31e7   : > { %v5808_v19 = vmax.f32 %v5748_v13, 0.0 }
0x31e8   : > { %v5828_v45 = vpack.c.bf16 %v5810_v25, %v5809_v54 }
0x31e9   : > { %v5827_v60 = vpack.c.bf16 %v5808_v19, %v5807_v56  ;;  %v7576_v21 = vpop.f32.mrb[144].mxu1 }
0x31ea   : > { %v5769_v41 = vadd.f32 %v7576_v21, %v10135_v27  ;;  %v5760_v3 = vpop.f32.mrb[145].mxu1 }
0x31eb   : > { %v5761_v58 = vadd.f32 %v10135_v27, %v5760_v3  ;;  %v7577_v33 = vpop.f32.mrb[146].mxu1  ;;  %7602 = vmatprep.mubr.msk.bf16.mxu0 %vm341_vm0, %v5827_v60 }
0x31ec   : > { %v5772_v15 = vadd.f32 %v7577_v33, %v10135_v27  ;;  %v5763_v44 = vpop.f32.mrb[147].mxu1  ;;  %7603 = vmatmul.mubr.msk.bf16.gmra.mrb[200].mxu0 %vm341_vm0, %v5828_v45  ;;  %v5813_v55 = vmax.f32 %v5769_v41, 0.0  ;;  %v6046_v45 = vld [vmem:[%s8693_s9 + $0x50] sm:$0xff]  ;;  %v6044_v41 = vld [vmem:[%s8693_s9 + $0x40] sm:$0xff]  ;;  %v6047_v33 = vld [vmem:[%s8693_s9 + $0x58] sm:$0xff] }
0x31ed   : > { %v5764_v48 = vadd.f32 %v10135_v27, %v5763_v44  ;;  %v5811_v1 = vmax.f32 %v5761_v58, 0.0 }
0x31ee   : > { %v5814_v37 = vmax.f32 %v5772_v15, 0.0 }
0x31ef   : > { %v5812_v2 = vmax.f32 %v5764_v48, 0.0 }
0x31f0   : > { %v5830_v46 = vpack.c.bf16 %v5814_v37, %v5813_v55  ;;  %v6045_v55 = vld [vmem:[%s8693_s9 + $0x48] sm:$0xff] }
0x31f1   : > { %v5829_v53 = vpack.c.bf16 %v5812_v2, %v5811_v1 }
0x31f3   : > { %7606 = vmatprep.mubr.msk.bf16.mxu0 %vm341_vm0, %v5829_v53 }
0x31f4   : > { %7607 = vmatmul.mubr.msk.bf16.gmra.mrb[204].mxu0 %vm341_vm0, %v5830_v46 }
0x3230   : > { %v7580_v50 = vpop.f32.mrb[148].mxu1 }
0x3231   : > { %v5785_v20 = vadd.f32 %v7580_v50, %v10135_v27  ;;  %v5776_v24 = vpop.f32.mrb[149].mxu1  ;;  %v6050_v50 = vld [vmem:[%s8693_s9 + $0x70] sm:$0xff] }
0x3232   : > { %v5777_v6 = vadd.f32 %v10135_v27, %v5776_v24  ;;  %v7581_v29 = vpop.f32.mrb[150].mxu1 }
0x3233   : > { %v5788_v51 = vadd.f32 %v7581_v29, %v10135_v27  ;;  %v5779_v23 = vpop.f32.mrb[151].mxu1  ;;  %v5817_v14 = vmax.f32 %v5785_v20, 0.0 }
0x3234   : > { %v5780_v9 = vadd.f32 %v10135_v27, %v5779_v23  ;;  %v5815_v26 = vmax.f32 %v5777_v6, 0.0  ;;  %v6048_v6 = vld [vmem:[%s8693_s9 + $0x60] sm:$0xff]  ;;  %v6051_v23 = vld [vmem:[%s8693_s9 + $0x78] sm:$0xff] }
0x3235   : > { %v5818_v47 = vmax.f32 %v5788_v51, 0.0 }
0x3236   : > { %v5816_v43 = vmax.f32 %v5780_v9, 0.0 }
0x3237   : > { %v5832_v39 = vpack.c.bf16 %v5818_v47, %v5817_v14 }
0x3238   : > { %v5831_v8 = vpack.c.bf16 %v5816_v43, %v5815_v26  ;;  %v6049_v26 = vld [vmem:[%s8693_s9 + $0x68] sm:$0xff] }
0x323a   : > { %7610 = vmatprep.mubr.msk.bf16.mxu0 %vm341_vm0, %v5831_v8 }
0x323b   : > { %7611 = vmatmul.mubr.msk.bf16.gmra.mrb[208].mxu0 %vm341_vm0, %v5832_v39 }
0x329f   : > { %v7588_v52 = vpop.f32.mrb[184].mxu0 }
0x32a0   : > { %v5934_v27 = vadd.f32 %v7588_v52, %v10182_v36  ;;  %v5925_v42 = vpop.f32.mrb[185].mxu0 }
0x32a1   : > { %v5926_v34 = vadd.f32 %v10182_v36, %v5925_v42  ;;  %v7589_v0 = vpop.f32.mrb[186].mxu0 }
0x32a2   : > { %v6066_v30 = vadd.f32 %v6038_v4, %v5934_v27  ;;  %v5937_v40 = vadd.f32 %v7589_v0, %v10182_v36  ;;  %v5928_v62 = vpop.f32.mrb[187].mxu0  ;;  %v6054_v27 = vld [vmem:[%s8693_s9 + $0x90] sm:$0xff] }
0x32a3   : > { %v6064_v10 = vadd.f32 %v6036_v32, %v5926_v34  ;;  %v5929_v57 = vadd.f32 %v10182_v36, %v5928_v62  ;;  %v6052_v34 = vld [vmem:[%s8693_s9 + $0x80] sm:$0xff] }
0x32a4   : > { %6094 = vst.msk [vmem:[%s10192_s21 + $0x10] sm:$0xff] %vm926_vm4, %v6066_v30  ;;  %v6067_v5 = vadd.f32 %v6039_v59, %v5937_v40  ;;  %v6055_v30 = vld [vmem:[%s8693_s9 + $0x98] sm:$0xff] }
0x32a5   : > { %6092 = vst.msk [vmem:[%s10192_s21] sm:$0xff] %vm926_vm4, %v6064_v10  ;;  %v6065_v35 = vadd.f32 %v6037_v63, %v5929_v57  ;;  %v6053_v10 = vld [vmem:[%s8693_s9 + $0x88] sm:$0xff] }
0x32a6   : > { %6095 = vst.msk [vmem:[%s10192_s21 + $0x18] sm:$0xff] %vm926_vm4, %v6067_v5 }
0x32a7   : > { %6093 = vst.msk [vmem:[%s10192_s21 + $0x8] sm:$0xff] %vm926_vm4, %v6065_v35  ;;  %v7592_v18 = vpop.f32.mrb[188].mxu0 }
0x32a8   : > { %v5950_v12 = vadd.f32 %v7592_v18, %v10182_v36  ;;  %v5941_v22 = vpop.f32.mrb[189].mxu0 }
0x32a9   : > { %v5942_v16 = vadd.f32 %v10182_v36, %v5941_v22  ;;  %v7593_v17 = vpop.f32.mrb[190].mxu0 }
0x32aa   : > { %v6070_v7 = vadd.f32 %v6042_v49, %v5950_v12  ;;  %v5953_v11 = vadd.f32 %v7593_v17, %v10182_v36  ;;  %v5944_v31 = vpop.f32.mrb[191].mxu0  ;;  %v6058_v12 = vld [vmem:[%s8693_s9 + $0xb0] sm:$0xff] }
0x32ab   : > { %v6068_v13 = vadd.f32 %v6040_v38, %v5942_v16  ;;  %v5945_v54 = vadd.f32 %v10182_v36, %v5944_v31  ;;  %v6056_v16 = vld [vmem:[%s8693_s9 + $0xa0] sm:$0xff] }
0x32ac   : > { %6098 = vst.msk [vmem:[%s10192_s21 + $0x30] sm:$0xff] %vm926_vm4, %v6070_v7  ;;  %v6071_v25 = vadd.f32 %v6043_v28, %v5953_v11  ;;  %v6059_v7 = vld [vmem:[%s8693_s9 + $0xb8] sm:$0xff] }
0x32ad   : > { %6096 = vst.msk [vmem:[%s10192_s21 + $0x20] sm:$0xff] %vm926_vm4, %v6068_v13  ;;  %v6069_v56 = vadd.f32 %v6041_v61, %v5945_v54  ;;  %v6057_v13 = vld [vmem:[%s8693_s9 + $0xa8] sm:$0xff] }
0x32ae   : > { %6099 = vst.msk [vmem:[%s10192_s21 + $0x38] sm:$0xff] %vm926_vm4, %v6071_v25 }
0x32af   : > { %6097 = vst.msk [vmem:[%s10192_s21 + $0x28] sm:$0xff] %vm926_vm4, %v6069_v56  ;;  %v7596_v19 = vpop.f32.mrb[192].mxu0 }
0x32b0   : > { %v5966_v60 = vadd.f32 %v7596_v19, %v10182_v36  ;;  %v5957_v21 = vpop.f32.mrb[193].mxu0 }
0x32b1   : > { %v5958_v3 = vadd.f32 %v10182_v36, %v5957_v21  ;;  %v7597_v58 = vpop.f32.mrb[194].mxu0 }
0x32b2   : > { %v6074_v15 = vadd.f32 %v6046_v45, %v5966_v60  ;;  %v5969_v44 = vadd.f32 %v7597_v58, %v10182_v36  ;;  %v5960_v48 = vpop.f32.mrb[195].mxu0  ;;  %v6062_v60 = vld [vmem:[%s8693_s9 + $0xd0] sm:$0xff] }
0x32b3   : > { %v6072_v37 = vadd.f32 %v6044_v41, %v5958_v3  ;;  %v5961_v1 = vadd.f32 %v10182_v36, %v5960_v48  ;;  %v6060_v3 = vld [vmem:[%s8693_s9 + $0xc0] sm:$0xff] }
0x32b4   : > { %6102 = vst.msk [vmem:[%s10192_s21 + $0x50] sm:$0xff] %vm926_vm4, %v6074_v15  ;;  %v6075_v2 = vadd.f32 %v6047_v33, %v5969_v44  ;;  %v6063_v15 = vld [vmem:[%s8693_s9 + $0xd8] sm:$0xff] }
0x32b5   : > { %6100 = vst.msk [vmem:[%s10192_s21 + $0x40] sm:$0xff] %vm926_vm4, %v6072_v37  ;;  %v6073_v46 = vadd.f32 %v6045_v55, %v5961_v1  ;;  %v6061_v37 = vld [vmem:[%s8693_s9 + $0xc8] sm:$0xff] }
0x32b6   : > { %6103 = vst.msk [vmem:[%s10192_s21 + $0x58] sm:$0xff] %vm926_vm4, %v6075_v2 }
0x32b7   : > { %6101 = vst.msk [vmem:[%s10192_s21 + $0x48] sm:$0xff] %vm926_vm4, %v6073_v46  ;;  %v7600_v53 = vpop.f32.mrb[196].mxu0 }
0x32b8   : > { %v5982_v20 = vadd.f32 %v7600_v53, %v10182_v36  ;;  %v5973_v24 = vpop.f32.mrb[197].mxu0 }
0x32b9   : > { %v5974_v29 = vadd.f32 %v10182_v36, %v5973_v24  ;;  %v7601_v51 = vpop.f32.mrb[198].mxu0 }
0x32ba   : > { %v6078_v9 = vadd.f32 %v6050_v50, %v5982_v20  ;;  %v5985_v14 = vadd.f32 %v7601_v51, %v10182_v36  ;;  %v5976_v47 = vpop.f32.mrb[199].mxu0 }
0x32bb   : > { %v6076_v43 = vadd.f32 %v6048_v6, %v5974_v29  ;;  %v5977_v39 = vadd.f32 %v10182_v36, %v5976_v47 }
0x32bc   : > { %6106 = vst.msk [vmem:[%s10192_s21 + $0x70] sm:$0xff] %vm926_vm4, %v6078_v9  ;;  %v6079_v8 = vadd.f32 %v6051_v23, %v5985_v14 }
0x32bd   : > { %6104 = vst.msk [vmem:[%s10192_s21 + $0x60] sm:$0xff] %vm926_vm4, %v6076_v43  ;;  %v6077_v52 = vadd.f32 %v6049_v26, %v5977_v39 }
0x32be   : > { %6107 = vst.msk [vmem:[%s10192_s21 + $0x78] sm:$0xff] %vm926_vm4, %v6079_v8 }
0x32bf   : > { %6105 = vst.msk [vmem:[%s10192_s21 + $0x68] sm:$0xff] %vm926_vm4, %v6077_v52  ;;  %v7604_v4 = vpop.f32.mrb[200].mxu0 }
0x32c0   : > { %v5998_v42 = vadd.f32 %v7604_v4, %v10182_v36  ;;  %v5989_v32 = vpop.f32.mrb[201].mxu0 }
0x32c1   : > { %v5990_v0 = vadd.f32 %v10182_v36, %v5989_v32  ;;  %v7605_v59 = vpop.f32.mrb[202].mxu0 }
0x32c2   : > { %v6082_v40 = vadd.f32 %v6054_v27, %v5998_v42  ;;  %v6001_v62 = vadd.f32 %v7605_v59, %v10182_v36  ;;  %v5992_v63 = vpop.f32.mrb[203].mxu0 }
0x32c3   : > { %v6080_v57 = vadd.f32 %v6052_v34, %v5990_v0  ;;  %v5993_v5 = vadd.f32 %v10182_v36, %v5992_v63 }
0x32c4   : > { %6110 = vst.msk [vmem:[%s10192_s21 + $0x90] sm:$0xff] %vm926_vm4, %v6082_v40  ;;  %v6083_v35 = vadd.f32 %v6055_v30, %v6001_v62 }
0x32c5   : > { %6108 = vst.msk [vmem:[%s10192_s21 + $0x80] sm:$0xff] %vm926_vm4, %v6080_v57  ;;  %v6081_v18 = vadd.f32 %v6053_v10, %v5993_v5 }
0x32c6   : > { %6111 = vst.msk [vmem:[%s10192_s21 + $0x98] sm:$0xff] %vm926_vm4, %v6083_v35 }
0x32c7   : > { %6109 = vst.msk [vmem:[%s10192_s21 + $0x88] sm:$0xff] %vm926_vm4, %v6081_v18  ;;  %v7608_v49 = vpop.f32.mrb[204].mxu0 }
0x32c8   : > { %v6014_v22 = vadd.f32 %v7608_v49, %v10182_v36  ;;  %v6005_v38 = vpop.f32.mrb[205].mxu0 }
0x32c9   : > { %v6006_v17 = vadd.f32 %v10182_v36, %v6005_v38  ;;  %v7609_v28 = vpop.f32.mrb[206].mxu0 }
0x32ca   : > { %v6086_v11 = vadd.f32 %v6058_v12, %v6014_v22  ;;  %v6017_v31 = vadd.f32 %v7609_v28, %v10182_v36  ;;  %v6008_v61 = vpop.f32.mrb[207].mxu0 }
0x32cb   : > { %v6084_v54 = vadd.f32 %v6056_v16, %v6006_v17  ;;  %v6009_v25 = vadd.f32 %v10182_v36, %v6008_v61 }
0x32cc   : > { %6114 = vst.msk [vmem:[%s10192_s21 + $0xb0] sm:$0xff] %vm926_vm4, %v6086_v11  ;;  %v6087_v56 = vadd.f32 %v6059_v7, %v6017_v31 }
0x32cd   : > { %6112 = vst.msk [vmem:[%s10192_s21 + $0xa0] sm:$0xff] %vm926_vm4, %v6084_v54  ;;  %v6085_v19 = vadd.f32 %v6057_v13, %v6009_v25 }
0x32ce   : > { %6115 = vst.msk [vmem:[%s10192_s21 + $0xb8] sm:$0xff] %vm926_vm4, %v6087_v56 }
0x32cf   : > { %6113 = vst.msk [vmem:[%s10192_s21 + $0xa8] sm:$0xff] %vm926_vm4, %v6085_v19 }
0x330e   : > { %v7612_v45 = vpop.f32.mrb[208].mxu0 }
0x330f   : > { %v6030_v21 = vadd.f32 %v7612_v45, %v10182_v36  ;;  %v6021_v41 = vpop.f32.mrb[209].mxu0 }
0x3310   : > { %v6022_v58 = vadd.f32 %v10182_v36, %v6021_v41  ;;  %v7613_v33 = vpop.f32.mrb[210].mxu0 }
0x3311   : > { %v6090_v44 = vadd.f32 %v6062_v60, %v6030_v21  ;;  %v6033_v48 = vadd.f32 %v7613_v33, %v10182_v36  ;;  %v6024_v55 = vpop.f32.mrb[211].mxu0 }
0x3312   : > { %v6088_v1 = vadd.f32 %v6060_v3, %v6022_v58  ;;  %v6025_v2 = vadd.f32 %v10182_v36, %v6024_v55 }
0x3313   : > { %6118 = vst.msk [vmem:[%s10192_s21 + $0xd0] sm:$0xff] %vm926_vm4, %v6090_v44  ;;  %v6091_v46 = vadd.f32 %v6063_v15, %v6033_v48 }
0x3314   : > { %6116 = vst.msk [vmem:[%s10192_s21 + $0xc0] sm:$0xff] %vm926_vm4, %v6088_v1  ;;  %v6089_v53 = vadd.f32 %v6061_v37, %v6025_v2 }
0x3315   : > { %6119 = vst.msk [vmem:[%s10192_s21 + $0xd8] sm:$0xff] %vm926_vm4, %v6091_v46 }
0x3316   : > { %6117 = vst.msk [vmem:[%s10192_s21 + $0xc8] sm:$0xff] %vm926_vm4, %v6089_v53 }
0x3317 PF: > { %s15_s18 = sadd.s32 1, %s8381_s18  }
0x3318   : > { %p12_p4 = scmp.ge.s32.totalorder %s15_s18, 4  }
0x331a   :  { %14 = sbr.rel (!%p12_p4) target bundleno = 1 (0x1), region = 73 }

</bundles_post_ra>
